<compile_context>
chip_gen: v7x
topology: tpu7x:2x2x1
jax: 0.10.0
libtpu: 0.0.40
codegen_flags: <defaults>
</compile_context>

<pallas_src>
import functools

import jax
import jax.numpy as jnp
from jax.experimental import pallas as pl
from jax.experimental.pallas import tpu as pltpu

DIM_V = 1024
NUM_HEADS = 8
HEAD_DIM = DIM_V // NUM_HEADS          # 128

_MLP_VMEM = 40 * 1024 * 1024
_CA_VMEM = 32 * 1024 * 1024
_BCE_VMEM = 32 * 1024 * 1024


def _round_up(x, m):
    return ((x + m - 1) // m) * m


def _split_rows(m, tm_max):
    """Even row split: pad only to a multiple of 8, no round-up-to-tile waste."""
    mp8 = _round_up(max(m, 1), 8)
    grid = pl.cdiv(mp8, tm_max)
    tm = _round_up(pl.cdiv(mp8, grid), 8)
    return grid, tm, grid * tm


# -----------------------------------------------------------------------------
# Kernel 1: fused 2-layer MLP   y = relu(x @ W1 + b1) @ W2 + b2
# Grid = (M tiles,) only.  W1/W2 are bf16 and fully VMEM-resident (constant
# block index -> streamed from HBM once, regardless of M).  Accumulation f32.
# -----------------------------------------------------------------------------
def _mlp_kernel(x_ref, w1_ref, b1_ref, w2_ref, b2_ref, o_ref):
    x = x_ref[...].astype(jnp.bfloat16)
    hidden = jnp.dot(x, w1_ref[...],
                     preferred_element_type=jnp.float32) + b1_ref[...]
    hidden = jnp.maximum(hidden, 0.0).astype(jnp.bfloat16)
    y = jnp.dot(hidden, w2_ref[...],
                preferred_element_type=jnp.float32) + b2_ref[...]
    o_ref[...] = y.astype(o_ref.dtype)


def mlp_proj(x2d, w1, b1, w2, b2, *, out_dtype=jnp.float32, tm_max=256):
    """x2d: (M, d_in) -> (M, d_out) through Linear->ReLU->Linear (bf16 weights)."""
    M, d_in = x2d.shape
    d_hid, d_out = w2.shape
    assert w1.shape == (d_in, d_hid)

    grid_m, tm, Mp = _split_rows(M, tm_max)
    if Mp != M:
        x2d = jnp.pad(x2d, ((0, Mp - M), (0, 0)))

    out = pl.pallas_call(
        _mlp_kernel,
        out_shape=jax.ShapeDtypeStruct((Mp, d_out), out_dtype),
        grid_spec=pltpu.PrefetchScalarGridSpec(
            num_scalar_prefetch=0,
            grid=(grid_m,),
            in_specs=[
                pl.BlockSpec((tm, d_in), lambda i: (i, 0)),
                pl.BlockSpec((d_in, d_hid), lambda i: (0, 0)),   # resident
                pl.BlockSpec((1, d_hid), lambda i: (0, 0)),
                pl.BlockSpec((d_hid, d_out), lambda i: (0, 0)),  # resident
                pl.BlockSpec((1, d_out), lambda i: (0, 0)),
            ],
            out_specs=pl.BlockSpec((tm, d_out), lambda i: (i, 0)),
        ),
        # "arbitrary": with tiny / weight-DMA-bound M, duplicating the resident
        # weight DMA across the two v7x TensorCores is a net loss.
        compiler_params=pltpu.CompilerParams(
            dimension_semantics=("arbitrary",),
            vmem_limit_bytes=_MLP_VMEM),
    )(x2d, w1, b1.reshape(1, -1), w2, b2.reshape(1, -1))
    return out[:M]


# -----------------------------------------------------------------------------
# Kernel 2: fused residual cross-attention, single ungridded invocation.
#   q = (tgt @ Wq + bq) * 1/sqrt(dh);  k = src @ Wk + bk;  v = src @ Wv + bv
#   per-batch 8-head attention via a static block-diagonal mask, then
#   o = tgt + (attn @ Wo + bo).
# Batch is folded into rows; head outputs are folded straight into the output
# projection (no concatenate).  All weights VMEM-resident, single-buffered.
# -----------------------------------------------------------------------------
def _cross_attn_kernel(tgt_ref, src_ref, wq_ref, bq_ref, wk_ref, bk_ref,
                       wv_ref, bv_ref, wo_ref, bo_ref, o_ref, *, lt, ls):
    scale = 1.0 / float(HEAD_DIM) ** 0.5
    nq, E = tgt_ref.shape
    nk = src_ref.shape[0]

    tgt = tgt_ref[...].astype(jnp.float32)          # (B*Lt, E) residual kept f32
    tgt_bf = tgt.astype(jnp.bfloat16)
    src_bf = src_ref[...].astype(jnp.bfloat16)      # (B*Ls, E)

    q = (jnp.dot(tgt_bf, wq_ref[...], preferred_element_type=jnp.float32)
         + bq_ref[...]) * scale
    k = jnp.dot(src_bf, wk_ref[...],
                preferred_element_type=jnp.float32) + bk_ref[...]
    v = jnp.dot(src_bf, wv_ref[...],
                preferred_element_type=jnp.float32) + bv_ref[...]

    # Block-diagonal batch mask: query row i attends to key row j iff they
    # belong to the same batch element (i // lt == j // ls).
    qb = jax.lax.broadcasted_iota(jnp.int32, (nq, nk), 0) // lt
    kb = jax.lax.broadcasted_iota(jnp.int32, (nq, nk), 1) // ls
    bias = jnp.where(qb == kb, 0.0, -1e30).astype(jnp.float32)

    acc = None
    for h in range(NUM_HEADS):
        lo = h * HEAD_DIM
        hi = lo + HEAD_DIM
        qh = q[:, lo:hi].astype(jnp.bfloat16)
        kh = k[:, lo:hi].astype(jnp.bfloat16)
        vh = v[:, lo:hi].astype(jnp.bfloat16)
        s = jax.lax.dot_general(qh, kh, (((1,), (1,)), ((), ())),
                                preferred_element_type=jnp.float32) + bias
        s = s - jnp.max(s, axis=-1, keepdims=True)
        p = jnp.exp(s)
        p = p * pl.reciprocal(jnp.sum(p, axis=-1, keepdims=True), approx=True)
        oh = jnp.dot(p.astype(jnp.bfloat16), vh,
                     preferred_element_type=jnp.float32)
        contrib = jnp.dot(oh.astype(jnp.bfloat16), wo_ref[lo:hi, :],
                          preferred_element_type=jnp.float32)
        acc = contrib if acc is None else acc + contrib

    o_ref[...] = (tgt + acc + bo_ref[...]).astype(o_ref.dtype)


def cross_attention(tgt2d, src2d, wq, bq, wk, bk, wv, bv, wo, bo, *, lt, ls):
    """Batch-folded residual cross-attention.

    tgt2d: (B*lt, E), src2d: (B*ls, E) -> (B*lt, E) bf16.
    Approximates REF_AVS_Transformer(embed_dim=1024) as
    target + MHA(query=target, key=source, value=source).
    """
    # TODO(synk): exact internals of refavs_transformer.REF_AVS_Transformer are
    # not available; approximated as a residual multi-head cross-attention.
    nq, E = tgt2d.shape
    kern = functools.partial(_cross_attn_kernel, lt=lt, ls=ls)
    return pl.pallas_call(
        kern,
        out_shape=jax.ShapeDtypeStruct((nq, E), jnp.bfloat16),
        compiler_params=pltpu.CompilerParams(vmem_limit_bytes=_CA_VMEM),
    )(tgt2d, src2d, wq, bq.reshape(1, -1), wk, bk.reshape(1, -1),
      wv, bv.reshape(1, -1), wo, bo.reshape(1, -1))


# -----------------------------------------------------------------------------
# Kernel 3: binary_cross_entropy_with_logits, reduction='mean'
# loss(x, t) = mean( max(x, 0) - x*t + log1p(exp(-|x|)) )
# Inputs keep their native dtype (gt_label can be bf16 — 0/1 exact); padded
# rows (if any) are masked in-kernel.
# -----------------------------------------------------------------------------
def _bce_kernel(x_ref, t_ref, o_ref, acc_ref, *, inv_n, valid_rows):
    i = pl.program_id(0)

    @pl.when(i == 0)
    def _():
        acc_ref[...] = jnp.zeros_like(acc_ref)

    x = x_ref[...].astype(jnp.float32)
    t = t_ref[...].astype(jnp.float32)
    loss = jnp.maximum(x, 0.0) - x * t + jnp.log1p(jnp.exp(-jnp.abs(x)))

    if valid_rows is not None:  # static (trace-time) branch
        tm = x.shape[0]
        row = i * tm + jax.lax.broadcasted_iota(jnp.int32, loss.shape, 0)
        loss = jnp.where(row < valid_rows, loss, 0.0)

    acc_ref[...] += jnp.sum(loss, axis=0, keepdims=True)   # per-lane partials

    @pl.when(i == pl.num_programs(0) - 1)
    def _():
        o_ref[...] = jnp.sum(acc_ref[...], axis=1, keepdims=True) * inv_n


def bce_with_logits_mean(logits, targets, *, tm_max=2048):
    N, H, W = logits.shape
    R = N * H
    x = logits.reshape(R, W)
    t = targets.reshape(R, W)

    grid_r, tm, Rp = _split_rows(R, tm_max)
    if Rp != R:
        x = jnp.pad(x, ((0, Rp - R), (0, 0)))
        t = jnp.pad(t, ((0, Rp - R), (0, 0)))
        valid_rows = R
    else:
        valid_rows = None

    kern = functools.partial(_bce_kernel, inv_n=1.0 / float(R * W),
                             valid_rows=valid_rows)
    out = pl.pallas_call(
        kern,
        out_shape=jax.ShapeDtypeStruct((1, 1), jnp.float32),
        grid_spec=pltpu.PrefetchScalarGridSpec(
            num_scalar_prefetch=0,
            grid=(grid_r,),
            in_specs=[
                pl.BlockSpec((tm, W), lambda i: (i, 0)),
                pl.BlockSpec((tm, W), lambda i: (i, 0)),
            ],
            out_specs=pl.BlockSpec((1, 1), lambda i: (0, 0)),
            scratch_shapes=[pltpu.VMEM((1, W), jnp.float32)],
        ),
        compiler_params=pltpu.CompilerParams(
            dimension_semantics=("arbitrary",),
            vmem_limit_bytes=_BCE_VMEM),
    )(x, t)
    return out[0, 0]


# -----------------------------------------------------------------------------
# Parameter init (deterministic, synthetic) — weights stored as bf16,
# biases as f32 (bias-add and accumulation stay in f32 inside the kernels).
# -----------------------------------------------------------------------------
def _init_linear(key, d_in, d_out):
    k1, k2 = jax.random.split(key)
    w = (jax.random.normal(k1, (d_in, d_out), jnp.float32)
         / jnp.sqrt(float(d_in))).astype(jnp.bfloat16)
    b = 0.01 * jax.random.normal(k2, (d_out,), jnp.float32)
    return w, b


def init_params(key):
    ks = jax.random.split(key, 10)
    a1w, a1b = _init_linear(ks[0], 128, 2048)
    a2w, a2b = _init_linear(ks[1], 2048, DIM_V)
    t1w, t1b = _init_linear(ks[2], 1024, 2048)
    t2w, t2b = _init_linear(ks[3], 2048, DIM_V)
    p1w, p1b = _init_linear(ks[4], 1024, 2048)
    p2w, p2b = _init_linear(ks[5], 2048, 256)
    wq, bq = _init_linear(ks[6], DIM_V, DIM_V)
    wk, bk = _init_linear(ks[7], DIM_V, DIM_V)
    wv, bv = _init_linear(ks[8], DIM_V, DIM_V)
    wo, bo = _init_linear(ks[9], DIM_V, DIM_V)
    return {
        "audio_proj": (a1w, a1b, a2w, a2b),
        "text_proj": (t1w, t1b, t2w, t2b),
        "prompt_proj": (p1w, p1b, p2w, p2b),
        "ca": (wq, bq, wk, bk, wv, bv, wo, bo),
    }


# -----------------------------------------------------------------------------
# Forward pass mirroring AVS_Model_Base.forward (batch-first end-to-end).
# -----------------------------------------------------------------------------
def avs_forward(params, feat_aud, feat_text, pred_logits, gt_label, num_a):
    """
    feat_aud   : (bsz, frame_n, 128)        audio features
    feat_text  : (bsz, frame_n, L, 1024)    text features
    pred_logits: (bsz*frame_n, 256, 256)    stand-in segmentation logits
    gt_label   : (bsz*frame_n, 256, 256)    binary ground-truth masks (bf16 ok)
    """
    bsz, frame_n, _ = feat_aud.shape
    L = feat_text.shape[2]
    BF = bsz * frame_n

    # --- audio branch: project each (b, f) row once (identical repeated rows
    # give identical projections), broadcast to num_a afterwards -------------
    aud_p = mlp_proj(feat_aud.reshape(BF, 128), *params["audio_proj"],
                     out_dtype=jnp.bfloat16)                       # (BF, 1024)
    src2d = jnp.broadcast_to(aud_p[:, None, :], (BF, num_a, DIM_V)
                             ).reshape(BF * num_a, DIM_V)          # (BF*num_a, E)

    # --- text branch: kept batch-first / batch-folded (BF*L, E), f32 because
    # it feeds the f32 residual add in the cross-attention --------------------
    text_p = mlp_proj(feat_text.reshape(BF * L, 1024), *params["text_proj"],
                      out_dtype=jnp.float32)                       # (BF*L, 1024)

    # --- cross-attention fusion (self.ca): one ungridded fused kernel --------
    fused = cross_attention(text_p, src2d, *params["ca"],
                            lt=L, ls=num_a)                        # (BF*L, E) bf16

    # --- prompt projection ----------------------------------------------------
    prompt = mlp_proj(fused, *params["prompt_proj"],
                      out_dtype=jnp.float32).reshape(BF, L, 256)

    # TODO(synk): Mask2FormerForRefAVS forward + Mask2FormerImageProcessor
    # post_process_semantic_segmentation (pretrained backbone) have no clean
    # Pallas equivalent; `pred_logits` is an externally supplied stand-in for
    # `pred_instance_map` so the BCE-with-logits loss kernel can be exercised.
    loss_frame = bce_with_logits_mean(pred_logits, gt_label)

    loss_uid = [loss_frame]
    uid_preds = [pred_logits]
    # `prompt` corresponds to 'prompt_features_projected' fed to the backbone.
    return loss_uid, uid_preds, prompt


# -----------------------------------------------------------------------------
if __name__ == "__main__":
    key = jax.random.PRNGKey(0)
    kp, k1, k2, k3, k4 = jax.random.split(key, 5)

    # small shapes consistent with the module
    bsz, frame_n, num_a, L = 2, 2, 2, 4

    params = init_params(kp)
    feat_aud = jax.random.normal(k1, (bsz, frame_n, 128), jnp.float32)
    feat_text = jax.random.normal(k2, (bsz, frame_n, L, 1024), jnp.float32)
    pred_logits = jax.random.normal(k3, (bsz * frame_n, 256, 256), jnp.float32)
    gt_label = (jax.random.uniform(k4, (bsz * frame_n, 256, 256)) > 0.5
                ).astype(jnp.bfloat16)   # 0/1 exact in bf16, halves BCE traffic

    loss_uid, uid_preds, prompt = avs_forward(
        params, feat_aud, feat_text, pred_logits, gt_label, num_a)

    jax.block_until_ready((loss_uid[0], uid_preds[0], prompt))

    assert prompt.shape == (bsz * frame_n, L, 256)
    assert loss_uid[0].shape == ()
    assert bool(jnp.isfinite(loss_uid[0]))
    print("KERNEL_OK")
</pallas_src>

<mosaic_0001>
module attributes {stable_mosaic.version = 11 : i64} {
  func.func @_mlp_kernel(%arg0: i32, %arg1: memref<8x128xf32, #tpu.memory_space<vmem>>, %arg2: memref<128x2048xbf16, #tpu.memory_space<vmem>>, %arg3: memref<1x2048xf32, #tpu.memory_space<vmem>>, %arg4: memref<2048x1024xbf16, #tpu.memory_space<vmem>>, %arg5: memref<1x1024xf32, #tpu.memory_space<vmem>>, %arg6: memref<8x1024xbf16, #tpu.memory_space<vmem>>) attributes {dimension_semantics = [#tpu.dimension_semantics<arbitrary>], iteration_bounds = array<i64: 1>, scalar_prefetch = 0 : i64, scratch_operands = 0 : i64, tpu.core_type = #tpu.core_type<tc>, window_params = [{transform_indices = @transform_0, window_bounds = array<i64: 8, 128>}, {pipeline_mode = #tpu.pipeline_mode<synchronous>, transform_indices = @transform_1, window_bounds = array<i64: 128, 2048>}, {pipeline_mode = #tpu.pipeline_mode<synchronous>, transform_indices = @transform_2, window_bounds = array<i64: 1, 2048>}, {pipeline_mode = #tpu.pipeline_mode<synchronous>, transform_indices = @transform_3, window_bounds = array<i64: 2048, 1024>}, {pipeline_mode = #tpu.pipeline_mode<synchronous>, transform_indices = @transform_4, window_bounds = array<i64: 1, 1024>}, {transform_indices = @transform_5, window_bounds = array<i64: 8, 1024>}]} {
    %c0 = arith.constant 0 : index
    %c0_0 = arith.constant 0 : index
    %0 = vector.load %arg1[%c0, %c0_0] : memref<8x128xf32, #tpu.memory_space<vmem>>, vector<8x128xf32>
    %1 = arith.truncf %0 : vector<8x128xf32> to vector<8x128xbf16>
    %c0_1 = arith.constant 0 : index
    %c0_2 = arith.constant 0 : index
    %2 = vector.load %arg2[%c0_1, %c0_2] : memref<128x2048xbf16, #tpu.memory_space<vmem>>, vector<128x2048xbf16>
    %cst = arith.constant dense<0.000000e+00> : vector<8x2048xf32>
    %3 = tpu.matmul %1, %2, %cst {dimension_numbers = #tpu.dot_dimension_numbers<[1], [0], [0], [1], [0, 0, 1, 1], [], []>} : vector<8x128xbf16>, vector<128x2048xbf16>, vector<8x2048xf32> -> vector<8x2048xf32>
    %c0_3 = arith.constant 0 : index
    %c0_4 = arith.constant 0 : index
    %4 = vector.load %arg3[%c0_3, %c0_4] : memref<1x2048xf32, #tpu.memory_space<vmem>>, vector<1x2048xf32>
    %5 = vector.broadcast %4 : vector<1x2048xf32> to vector<8x2048xf32>
    %6 = arith.addf %3, %5 : vector<8x2048xf32>
    %cst_5 = arith.constant 0.000000e+00 : f32
    %7 = vector.broadcast %cst_5 : f32 to vector<8x2048xf32>
    %8 = arith.maximumf %6, %7 : vector<8x2048xf32>
    %9 = arith.truncf %8 : vector<8x2048xf32> to vector<8x2048xbf16>
    %c0_6 = arith.constant 0 : index
    %c0_7 = arith.constant 0 : index
    %10 = vector.load %arg4[%c0_6, %c0_7] : memref<2048x1024xbf16, #tpu.memory_space<vmem>>, vector<2048x1024xbf16>
    %cst_8 = arith.constant dense<0.000000e+00> : vector<8x1024xf32>
    %11 = tpu.matmul %9, %10, %cst_8 {dimension_numbers = #tpu.dot_dimension_numbers<[1], [0], [0], [1], [0, 0, 1, 1], [], []>} : vector<8x2048xbf16>, vector<2048x1024xbf16>, vector<8x1024xf32> -> vector<8x1024xf32>
    %c0_9 = arith.constant 0 : index
    %c0_10 = arith.constant 0 : index
    %12 = vector.load %arg5[%c0_9, %c0_10] : memref<1x1024xf32, #tpu.memory_space<vmem>>, vector<1x1024xf32>
    %13 = vector.broadcast %12 : vector<1x1024xf32> to vector<8x1024xf32>
    %14 = arith.addf %11, %13 : vector<8x1024xf32>
    %15 = arith.truncf %14 : vector<8x1024xf32> to vector<8x1024xbf16>
    %c0_11 = arith.constant 0 : index
    %c0_12 = arith.constant 0 : index
    %16 = vector.load %arg6[%c0_11, %c0_12] : memref<8x1024xbf16, #tpu.memory_space<vmem>>, vector<8x1024xbf16>
    tpu.vector_store %arg6[%c0_11, %c0_12], %15 {strides = array<i32>} : memref<8x1024xbf16, #tpu.memory_space<vmem>>, vector<8x1024xbf16>,
    return
  }
  func.func @transform_0(%arg0: i32) -> (i32, i32) {
    %c0_i32 = arith.constant 0 : i32
    %c0_i32_0 = arith.constant 0 : i32
    return %arg0, %c0_i32 : i32, i32
  }
  func.func @transform_1(%arg0: i32) -> (i32, i32) {
    %c0_i32 = arith.constant 0 : i32
    %c0_i32_0 = arith.constant 0 : i32
    %c0_i32_1 = arith.constant 0 : i32
    return %c0_i32, %c0_i32_0 : i32, i32
  }
  func.func @transform_2(%arg0: i32) -> (i32, i32) {
    %c0_i32 = arith.constant 0 : i32
    %c0_i32_0 = arith.constant 0 : i32
    %c0_i32_1 = arith.constant 0 : i32
    return %c0_i32, %c0_i32_0 : i32, i32
  }
  func.func @transform_3(%arg0: i32) -> (i32, i32) {
    %c0_i32 = arith.constant 0 : i32
    %c0_i32_0 = arith.constant 0 : i32
    %c0_i32_1 = arith.constant 0 : i32
    return %c0_i32, %c0_i32_0 : i32, i32
  }
  func.func @transform_4(%arg0: i32) -> (i32, i32) {
    %c0_i32 = arith.constant 0 : i32
    %c0_i32_0 = arith.constant 0 : i32
    %c0_i32_1 = arith.constant 0 : i32
    return %c0_i32, %c0_i32_0 : i32, i32
  }
  func.func @transform_5(%arg0: i32) -> (i32, i32) {
    %c0_i32 = arith.constant 0 : i32
    %c0_i32_0 = arith.constant 0 : i32
    return %arg0, %c0_i32 : i32, i32
  }
}

</mosaic_0001>

<bundles_post_ra>
// kernel: tpu_custom_call.1
= control target key start
LH: loop header
LB: loop body
LE: loop exit
PB: predicated region body
PF: predicated region fallthrough
CT: control target
= control target key end

     0   :  { %10 = vsyncpa [#allocation3], 0  ;;  %s10625_s0 = inlined_call_operand.hbm [shape: f32[8,128], index: 0, kind: input, shape index: {}]   ;;  %s10626_s1 = inlined_call_operand.hbm [shape: bf16[128,2048], index: 1, kind: input, shape index: {}]   ;;  %s10627_s2 = inlined_call_operand.hbm [shape: f32[1,2048], index: 2, kind: input, shape index: {}]   ;;  %s10628_s3 = inlined_call_operand.hbm [shape: bf16[2048,1024], index: 3, kind: input, shape index: {}]   ;;  %s10629_s4 = inlined_call_operand.hbm [shape: f32[1,1024], index: 4, kind: input, shape index: {}]   ;;  %s10630_s5 = inlined_call_operand.hbm [shape: bf16[8,1024], index: 5, kind: output, shape index: {}]  }
   0x1   :  { %11 = vsyncpa [#allocation6], 0 }
   0x2   :  { %12 = vsyncpa [#allocation9], 0 }
   0x3   :  { %13 = vsyncpa [#allocation4], 0  ;;  %s10283_s18 = smov [#allocation5]   ;;  %s10143_s22 = scalar_lea.hbm %s10626_s1, 16384 }
   0x4   :  { %s29_s19 = sshll.u32 %s10283_s18, 4  ;;  %p10144_p0 = scmp.ne.s32.totalorder %s10626_s1, %s10143_s22  ;;  %s30_s19 = int_to_ptr.vmem [resolvable:$true] %s29_s19 }
   0x5   :  { %p10147_p1 = scmp.lt.u32.totalorder %s10143_s22, %s10626_s1 }
   0x7   :  { %p10149_p2 = pnand %p10147_p1, %p10144_p0 }
   0x9   :  { %10152 = shalt.err (!%p10149_p2)
}
   0xa   :  { %s10153_s27 = scalar_lea.vmem %s30_s19, 16384  ;;  %p10158_p4 = scmp.lt.s32.totalorder %s30_s19, %s30_s19 }
   0xb   :  { %p10154_p3 = scmp.ne.s32.totalorder %s30_s19, %s10153_s27  ;;  %p10159_p5 = scmp.lt.s32.totalorder %s10153_s27, %s10153_s27 }
   0xd   :  { %p10160_p6 = por %p10159_p5, %p10158_p4 }
   0xf   :  { %p10161_p7 = pnand %p10160_p6, %p10154_p3 }
  0x11   :  { %10164 = shalt.err (!%p10161_p7)
}
  0x12   :  { %s10284_s28 = smov 1024   ;;  %s10285_s29 = smov 64  }
  0x13   :  { %35 = dma.hbm_to_vmem [thread:$0]  %s10626_s1, 16384, %s30_s19, [#allocation6], %s10284_s28, %s10284_s28, %s10285_s29  }
  0x14   :  { %s10286_s7 = smov [#allocation8]   ;;  %s10165_s11 = scalar_lea.hbm %s10628_s3, 131072 }
  0x15   :  { %s51_s8 = sshll.u32 %s10286_s7, 4  ;;  %p10166_p8 = scmp.ne.s32.totalorder %s10628_s3, %s10165_s11  ;;  %s52_s8 = int_to_ptr.vmem [resolvable:$true] %s51_s8 }
  0x16   :  { %p10169_p9 = scmp.lt.u32.totalorder %s10165_s11, %s10628_s3 }
  0x18   :  { %p10171_p10 = pnand %p10169_p9, %p10166_p8 }
  0x1a   :  { %10174 = shalt.err (!%p10171_p10)
}
  0x1b   :  { %s10175_s16 = scalar_lea.vmem %s52_s8, 131072  ;;  %p10180_p12 = scmp.lt.s32.totalorder %s52_s8, %s52_s8 }
  0x1c   :  { %p10176_p11 = scmp.ne.s32.totalorder %s52_s8, %s10175_s16  ;;  %p10181_p13 = scmp.lt.s32.totalorder %s10175_s16, %s10175_s16 }
  0x1e   :  { %p10182_p0 = por %p10181_p13, %p10180_p12 }
  0x20   :  { %p10183_p1 = pnand %p10182_p0, %p10176_p11 }
  0x22   :  { %10186 = shalt.err (!%p10183_p1)
}
  0x23   :  { %s10287_s1 = smov 512   ;;  %s10288_s17 = smov 32  }
  0x24   :  { %57 = dma.hbm_to_vmem [thread:$0]  %s10628_s3, 131072, %s52_s8, [#allocation9], %s10287_s1, %s10287_s1, %s10288_s17  }
  0x25   :  { %s10289_s20 = smov [#allocation2]   ;;  %s10290_s22 = smov [#allocation7]  }
  0x26   :  { %s20_s21 = sshll.u32 %s10289_s20, 4  ;;  %s42_s23 = sshll.u32 %s10290_s22, 4  ;;  %s21_s21 = int_to_ptr.vmem [resolvable:$true] %s20_s21  ;;  %s43_s23 = int_to_ptr.vmem [resolvable:$true] %s42_s23 }
  0x27   :  { %s10187_s26 = scalar_lea.hbm %s10625_s0, 128 }
  0x28   :  { %p10188_p2 = scmp.ne.s32.totalorder %s10625_s0, %s10187_s26  ;;  %p10191_p3 = scmp.lt.u32.totalorder %s10187_s26, %s10625_s0 }
  0x2a   :  { %p10193_p4 = pnand %p10191_p3, %p10188_p2 }
  0x2c   :  { %10196 = shalt.err (!%p10193_p4)
}
  0x2d   :  { %s10197_s3 = scalar_lea.vmem %s21_s21, 128  ;;  %p10202_p6 = scmp.lt.s32.totalorder %s21_s21, %s21_s21 }
  0x2e   :  { %p10198_p5 = scmp.ne.s32.totalorder %s21_s21, %s10197_s3  ;;  %p10203_p7 = scmp.lt.s32.totalorder %s10197_s3, %s10197_s3 }
  0x30   :  { %p10204_p8 = por %p10203_p7, %p10202_p6 }
  0x32   :  { %p10205_p9 = pnand %p10204_p8, %p10198_p5 }
  0x34   :  { %10208 = shalt.err (!%p10205_p9)
}
  0x35   :  { %23 = dma.hbm_to_vmem [thread:$0]  %s10625_s0, 128, %s21_s21, [#allocation3]  }
  0x36   :  { %s10209_s10 = scalar_lea.hbm %s10627_s2, 256 }
  0x37   :  { %p10210_p10 = scmp.ne.s32.totalorder %s10627_s2, %s10209_s10  ;;  %p10213_p11 = scmp.lt.u32.totalorder %s10209_s10, %s10627_s2 }
  0x39   :  { %p10215_p12 = pnand %p10213_p11, %p10210_p10 }
  0x3b   :  { %10218 = shalt.err (!%p10215_p12)
}
  0x3c   :  { %s10219_s15 = scalar_lea.vmem %s43_s23, 256  ;;  %p10224_p0 = scmp.lt.s32.totalorder %s43_s23, %s43_s23 }
  0x3d   :  { %p10220_p13 = scmp.ne.s32.totalorder %s43_s23, %s10219_s15  ;;  %p10225_p1 = scmp.lt.s32.totalorder %s10219_s15, %s10219_s15 }
  0x3f   :  { %p10226_p2 = por %p10225_p1, %p10224_p0 }
  0x41   :  { %p10227_p3 = pnand %p10226_p2, %p10220_p13 }
  0x43   :  { %10230 = shalt.err (!%p10227_p3)
}
  0x44   :  { %45 = dma.hbm_to_vmem [thread:$0]  %s10627_s2, 256, %s43_s23, [#allocation6]  }
  0x45   :  { %s10291_s1 = smov [#allocation10]   ;;  %s10231_s20 = scalar_lea.hbm %s10629_s4, 128 }
  0x46   :  { %s64_s17 = sshll.u32 %s10291_s1, 4  ;;  %p10232_p4 = scmp.ne.s32.totalorder %s10629_s4, %s10231_s20  ;;  %s65_s17 = int_to_ptr.vmem [resolvable:$true] %s64_s17 }
  0x47   :  { %p10235_p5 = scmp.lt.u32.totalorder %s10231_s20, %s10629_s4 }
  0x49   :  { %p10237_p6 = pnand %p10235_p5, %p10232_p4 }
  0x4b   :  { %10240 = shalt.err (!%p10237_p6)
}
  0x4c   :  { %s10241_s26 = scalar_lea.vmem %s65_s17, 128  ;;  %p10246_p8 = scmp.lt.s32.totalorder %s65_s17, %s65_s17 }
  0x4d   :  { %p10242_p7 = scmp.ne.s32.totalorder %s65_s17, %s10241_s26  ;;  %p10247_p9 = scmp.lt.s32.totalorder %s10241_s26, %s10241_s26 }
  0x4f   :  { %p10248_p10 = por %p10247_p9, %p10246_p8 }
  0x51   :  { %p10249_p11 = pnand %p10248_p10, %p10242_p7 }
  0x53   :  { %10252 = shalt.err (!%p10249_p11)
}
  0x54   :  { %67 = dma.hbm_to_vmem [thread:$0]  %s10629_s4, 128, %s65_s17, [#allocation9]  }
  0x55   :  { %10275 = dma.done.wait [#allocation3], 128  }
  0x56   :  { %10276 = vsyncadd [#allocation3], 4294967168 }
  0x57   :  { %10277 = dma.done.wait [#allocation6], 16640  }
  0x58   :  { %10278 = vsyncadd [#allocation6], 4294950656 }
  0x59   :  { %10279 = dma.done.wait [#allocation9], 131200  }
  0x5a   :  { %10280 = vsyncadd [#allocation9], 4294836096  ;;  %v10292_v0 = vmov 0   ;;  %v86_v1 = vld [vmem:[#allocation5] sm:$0xff]  ;;  %v87_v14 = vld [vmem:[#allocation5 + $0x8] sm:$0xff]  ;;  %s10293_s4 = smov [#allocation11]  }
  0x5b   :  { %970 = vmatprep.mubr.bf16.mxu0 %v10292_v0  ;;  %1011 = vmatprep.mubr.bf16.mxu1 %v10292_v0  ;;  %v94_v2 = vld [vmem:[#allocation5 + $0x40] sm:$0xff]  ;;  %v95_v15 = vld [vmem:[#allocation5 + $0x48] sm:$0xff]  ;;  %v88_v58 = vld [vmem:[#allocation5 + $0x10] sm:$0xff]  ;;  %s8838_s27 = sshll.u32 %s10293_s4, 4  ;;  %s8839_s27 = int_to_ptr.vmem [resolvable:$true] %s8838_s27 }
  0x5c   :  { %v102_v3 = vld [vmem:[#allocation5 + $0x80] sm:$0xff]  ;;  %v8850_v4 = vcombine.high %v86_v1, %v94_v2  ;;  %v8849_v5 = vcombine.low %v86_v1, %v94_v2  ;;  %v103_v16 = vld [vmem:[#allocation5 + $0x88] sm:$0xff]  ;;  %v8852_v18 = vcombine.high %v87_v14, %v95_v15  ;;  %v8851_v19 = vcombine.low %v87_v14, %v95_v15  ;;  %v96_v59 = vld [vmem:[#allocation5 + $0x50] sm:$0xff]  ;;  %s10253_s28 = scalar_lea.vmem %s8839_s27, 512  ;;  %p10258_p13 = scmp.lt.s32.totalorder %s8839_s27, %s8839_s27 }
  0x5d   :  { %v110_v6 = vld [vmem:[#allocation5 + $0xc0] sm:$0xff]  ;;  %v111_v17 = vld [vmem:[#allocation5 + $0xc8] sm:$0xff]  ;;  %v84_v62 = vld [vmem:[#allocation2] sm:$0xff]  ;;  %v8854_v2 = vcombine.high %v88_v58, %v96_v59  ;;  %p10254_p12 = scmp.ne.s32.totalorder %s8839_s27, %s10253_s28  ;;  %p10259_p0 = scmp.lt.s32.totalorder %s10253_s28, %s10253_s28 }
  0x5e   :  { %v8866_v7 = vcombine.high %v102_v3, %v110_v6  ;;  %v118_v8 = vld [vmem:[#allocation5 + $0x100] sm:$0xff]  ;;  %938 = vmatprep.subr.bf16.mxu0 %v8850_v4  ;;  %v8865_v10 = vcombine.low %v102_v3, %v110_v6  ;;  %v8868_v20 = vcombine.high %v103_v16, %v111_v17  ;;  %v119_v22 = vld [vmem:[#allocation5 + $0x108] sm:$0xff]  ;;  %979 = vmatprep.subr.bf16.mxu1 %v8852_v18  ;;  %v104_v4 = vld [vmem:[#allocation5 + $0x90] sm:$0xff] }
  0x5f   :  { %v126_v9 = vld [vmem:[#allocation5 + $0x140] sm:$0xff]  ;;  %939 = vmatpush1.bf16.msra.mxu0 %v8849_v5  ;;  %v127_v23 = vld [vmem:[#allocation5 + $0x148] sm:$0xff]  ;;  %980 = vmatpush1.bf16.msra.mxu1 %v8851_v19  ;;  %v8867_v27 = vcombine.low %v103_v16, %v111_v17  ;;  %v112_v5 = vld [vmem:[#allocation5 + $0xd0] sm:$0xff]  ;;  %v10386_v6 = vpack.c.bf16 %v84_v62, %v84_v62  ;;  %p10260_p1 = por %p10259_p0, %p10258_p13 }
  0x60   :  { %940 = vmatprep.subr.bf16.mxu0 %v8866_v7  ;;  %v8882_v11 = vcombine.high %v118_v8, %v126_v9  ;;  %v134_v12 = vld [vmem:[#allocation5 + $0x180] sm:$0xff]  ;;  %v8881_v21 = vcombine.low %v118_v8, %v126_v9  ;;  %981 = vmatprep.subr.bf16.mxu1 %v8868_v20  ;;  %v8884_v28 = vcombine.high %v119_v22, %v127_v23  ;;  %v135_v30 = vld [vmem:[#allocation5 + $0x188] sm:$0xff]  ;;  %v89_v9 = vld [vmem:[#allocation5 + $0x18] sm:$0xff] }
  0x61   :  { %v142_v13 = vld [vmem:[#allocation5 + $0x1c0] sm:$0xff]  ;;  %v143_v31 = vld [vmem:[#allocation5 + $0x1c8] sm:$0xff]  ;;  %v8883_v35 = vcombine.low %v119_v22, %v127_v23  ;;  %v8853_v8 = vcombine.low %v88_v58, %v96_v59  ;;  %v128_v14 = vld [vmem:[#allocation5 + $0x150] sm:$0xff]  ;;  %v8869_v16 = vcombine.low %v104_v4, %v112_v5  ;;  %p10261_p2 = pnand %p10260_p1, %p10254_p12 }
  0x62   :  { %v8898_v24 = vcombine.high %v134_v12, %v142_v13  ;;  %v150_v25 = vld [vmem:[#allocation5 + $0x200] sm:$0xff]  ;;  %v8897_v29 = vcombine.low %v134_v12, %v142_v13  ;;  %v8900_v36 = vcombine.high %v135_v30, %v143_v31  ;;  %v151_v38 = vld [vmem:[#allocation5 + $0x208] sm:$0xff]  ;;  %v8899_v43 = vcombine.low %v135_v30, %v143_v31  ;;  %v120_v13 = vld [vmem:[#allocation5 + $0x110] sm:$0xff] }
  0x63   :  { %941 = vmatpush1.bf16.msra.mxu0 %v8865_v10  ;;  %v158_v26 = vld [vmem:[#allocation5 + $0x240] sm:$0xff]  ;;  %982 = vmatpush1.bf16.msra.mxu1 %v8867_v27  ;;  %v159_v39 = vld [vmem:[#allocation5 + $0x248] sm:$0xff]  ;;  %v97_v10 = vld [vmem:[#allocation5 + $0x58] sm:$0xff]  ;;  %v8886_v19 = vcombine.high %v120_v13, %v128_v14 }
  0x64   :  { %942 = vmatprep.subr.bf16.mxu0 %v8882_v11  ;;  %v8914_v32 = vcombine.high %v150_v25, %v158_v26  ;;  %v166_v33 = vld [vmem:[#allocation5 + $0x280] sm:$0xff]  ;;  %983 = vmatprep.subr.bf16.mxu1 %v8884_v28  ;;  %v8913_v37 = vcombine.low %v150_v25, %v158_v26  ;;  %v8916_v44 = vcombine.high %v151_v38, %v159_v39  ;;  %v167_v46 = vld [vmem:[#allocation5 + $0x288] sm:$0xff]  ;;  %v105_v17 = vld [vmem:[#allocation5 + $0x98] sm:$0xff] }
  0x65   :  { %v174_v34 = vld [vmem:[#allocation5 + $0x2c0] sm:$0xff]  ;;  %v175_v47 = vld [vmem:[#allocation5 + $0x2c8] sm:$0xff]  ;;  %v8915_v51 = vcombine.low %v151_v38, %v159_v39  ;;  %v8870_v11 = vcombine.high %v104_v4, %v112_v5  ;;  %v8856_v15 = vcombine.high %v89_v9, %v97_v10  ;;  %v113_v18 = vld [vmem:[#allocation5 + $0xd8] sm:$0xff]  ;;  %v8855_v20 = vcombine.low %v89_v9, %v97_v10 }
  0x66   :  { %v8930_v40 = vcombine.high %v166_v33, %v174_v34  ;;  %v182_v41 = vld [vmem:[#allocation5 + $0x300] sm:$0xff]  ;;  %v8929_v45 = vcombine.low %v166_v33, %v174_v34  ;;  %v8932_v52 = vcombine.high %v167_v46, %v175_v47  ;;  %v183_v54 = vld [vmem:[#allocation5 + $0x308] sm:$0xff]  ;;  %v8931_v57 = vcombine.low %v167_v46, %v175_v47  ;;  %v144_v22 = vld [vmem:[#allocation5 + $0x1d0] sm:$0xff] }
  0x67   :  { %943 = vmatpush1.bf16.msra.mxu0 %v8881_v21  ;;  %v190_v42 = vld [vmem:[#allocation5 + $0x340] sm:$0xff]  ;;  %984 = vmatpush1.bf16.msra.mxu1 %v8883_v35  ;;  %v191_v55 = vld [vmem:[#allocation5 + $0x348] sm:$0xff]  ;;  %v136_v21 = vld [vmem:[#allocation5 + $0x190] sm:$0xff]  ;;  %v8872_v23 = vcombine.high %v105_v17, %v113_v18  ;;  %v8871_v28 = vcombine.low %v105_v17, %v113_v18 }
  0x68   :  { %944 = vmatprep.subr.bf16.mxu0 %v8898_v24  ;;  %985 = vmatprep.subr.bf16.mxu1 %v8900_v36  ;;  %v8946_v48 = vcombine.high %v182_v41, %v190_v42  ;;  %v198_v49 = vld [vmem:[#allocation5 + $0x380] sm:$0xff]  ;;  %v8945_v53 = vcombine.low %v182_v41, %v190_v42  ;;  %v8948_v60 = vcombine.high %v183_v54, %v191_v55  ;;  %v199_v63 = vld [vmem:[#allocation5 + $0x388] sm:$0xff]  ;;  %v121_v25 = vld [vmem:[#allocation5 + $0x118] sm:$0xff] }
  0x69   :  { %v206_v50 = vld [vmem:[#allocation5 + $0x3c0] sm:$0xff]  ;;  %v207_v1 = vld [vmem:[#allocation5 + $0x3c8] sm:$0xff]  ;;  %v8947_v3 = vcombine.low %v183_v54, %v191_v55  ;;  %v8885_v24 = vcombine.low %v120_v13, %v128_v14  ;;  %v129_v26 = vld [vmem:[#allocation5 + $0x158] sm:$0xff]  ;;  %v8902_v27 = vcombine.high %v136_v21, %v144_v22 }
  0x6a   :  { %v8962_v56 = vcombine.high %v198_v49, %v206_v50  ;;  %v8961_v61 = vcombine.low %v198_v49, %v206_v50  ;;  %v8964_v7 = vcombine.high %v199_v63, %v207_v1  ;;  %v8963_v12 = vcombine.low %v199_v63, %v207_v1  ;;  %v160_v30 = vld [vmem:[#allocation5 + $0x250] sm:$0xff]  ;;  %v137_v33 = vld [vmem:[#allocation5 + $0x198] sm:$0xff]  ;;  %v98_v62 = vld [vmem:[#allocation5 + $0x60] sm:$0xff] }
  0x6b   :  { %945 = vmatpush1.bf16.msra.mxu0 %v8897_v29  ;;  %986 = vmatpush1.bf16.msra.mxu1 %v8899_v43  ;;  %v152_v29 = vld [vmem:[#allocation5 + $0x210] sm:$0xff]  ;;  %v8888_v31 = vcombine.high %v121_v25, %v129_v26  ;;  %v145_v34 = vld [vmem:[#allocation5 + $0x1d8] sm:$0xff]  ;;  %v8887_v36 = vcombine.low %v121_v25, %v129_v26 }
  0x6c   :  { %946 = vmatprep.subr.bf16.mxu0 %v8914_v32  ;;  %987 = vmatprep.subr.bf16.mxu1 %v8916_v44  ;;  %v8901_v32 = vcombine.low %v136_v21, %v144_v22  ;;  %v8918_v35 = vcombine.high %v152_v29, %v160_v30  ;;  %v176_v38 = vld [vmem:[#allocation5 + $0x2d0] sm:$0xff]  ;;  %v8904_v39 = vcombine.high %v137_v33, %v145_v34  ;;  %v153_v41 = vld [vmem:[#allocation5 + $0x218] sm:$0xff] }
  0x6d   :  { %v161_v42 = vld [vmem:[#allocation5 + $0x258] sm:$0xff]  ;;  %v8903_v44 = vcombine.low %v137_v33, %v145_v34  ;;  %v192_v46 = vld [vmem:[#allocation5 + $0x350] sm:$0xff] }
  0x6e   :  { %v8920_v47 = vcombine.high %v153_v41, %v161_v42  ;;  %v169_v49 = vld [vmem:[#allocation5 + $0x298] sm:$0xff]  ;;  %v208_v54 = vld [vmem:[#allocation5 + $0x3d0] sm:$0xff] }
  0x6f   :  { %947 = vmatpush1.bf16.msra.mxu0 %v8913_v37  ;;  %988 = vmatpush1.bf16.msra.mxu1 %v8915_v51  ;;  %v168_v37 = vld [vmem:[#allocation5 + $0x290] sm:$0xff]  ;;  %v177_v50 = vld [vmem:[#allocation5 + $0x2d8] sm:$0xff] }
  0x70   :  { %948 = vmatprep.subr.bf16.mxu0 %v8930_v40  ;;  %989 = vmatprep.subr.bf16.mxu1 %v8932_v52  ;;  %v8917_v40 = vcombine.low %v152_v29, %v160_v30  ;;  %v8934_v43 = vcombine.high %v168_v37, %v176_v38  ;;  %v8919_v52 = vcombine.low %v153_v41, %v161_v42  ;;  %v193_v58 = vld [vmem:[#allocation5 + $0x358] sm:$0xff] }
  0x71   :  { %v8936_v55 = vcombine.high %v169_v49, %v177_v50 }
  0x73   :  { %949 = vmatpush1.bf16.msra.mxu0 %v8929_v45  ;;  %990 = vmatpush1.bf16.msra.mxu1 %v8931_v57  ;;  %v184_v45 = vld [vmem:[#allocation5 + $0x310] sm:$0xff]  ;;  %v185_v57 = vld [vmem:[#allocation5 + $0x318] sm:$0xff] }
  0x74   :  { %950 = vmatprep.subr.bf16.mxu0 %v8946_v48  ;;  %991 = vmatprep.subr.bf16.mxu1 %v8948_v60  ;;  %v8933_v48 = vcombine.low %v168_v37, %v176_v38  ;;  %v8950_v51 = vcombine.high %v184_v45, %v192_v46  ;;  %v8935_v60 = vcombine.low %v169_v49, %v177_v50 }
  0x75   :  { %v8952_v63 = vcombine.high %v185_v57, %v193_v58  ;;  %v8951_v5 = vcombine.low %v185_v57, %v193_v58 }
  0x77   :  { %951 = vmatpush1.bf16.msra.mxu0 %v8945_v53  ;;  %992 = vmatpush1.bf16.msra.mxu1 %v8947_v3  ;;  %v200_v53 = vld [vmem:[#allocation5 + $0x390] sm:$0xff]  ;;  %v209_v3 = vld [vmem:[#allocation5 + $0x3d8] sm:$0xff] }
  0x78   :  { %952 = vmatprep.subr.bf16.mxu0 %v8962_v56  ;;  %993 = vmatprep.subr.bf16.mxu1 %v8964_v7  ;;  %v8949_v56 = vcombine.low %v184_v45, %v192_v46  ;;  %v8966_v59 = vcombine.high %v200_v53, %v208_v54  ;;  %v8965_v1 = vcombine.low %v200_v53, %v208_v54  ;;  %v106_v7 = vld [vmem:[#allocation5 + $0xa0] sm:$0xff] }
  0x7b   :  { %953 = vmatpush1.bf16.msra.mxu0 %v8961_v61  ;;  %994 = vmatpush1.bf16.msra.mxu1 %v8963_v12  ;;  %v90_v61 = vld [vmem:[#allocation5 + $0x20] sm:$0xff]  ;;  %v99_v12 = vld [vmem:[#allocation5 + $0x68] sm:$0xff] }
  0x7c   :  { %1020 = vmatprep.subr.bf16.mxu0 %v8854_v2  ;;  %1061 = vmatprep.subr.bf16.mxu1 %v8856_v15  ;;  %v201_v2 = vld [vmem:[#allocation5 + $0x398] sm:$0xff]  ;;  %v8858_v4 = vcombine.high %v90_v61, %v98_v62  ;;  %v8857_v10 = vcombine.low %v90_v61, %v98_v62  ;;  %v122_v15 = vld [vmem:[#allocation5 + $0x120] sm:$0xff] }
  0x7d   :  { %v8968_v9 = vcombine.high %v201_v2, %v209_v3  ;;  %v8967_v14 = vcombine.low %v201_v2, %v209_v3 }
  0x7e   :  { %971 = vmatmul.mubr.bf16.vlgmr.msra.gmra.mrb[0].mxu0 %v10386_v6  ;;  %1012 = vmatmul.mubr.bf16.vlgmr.msra.gmra.mrb[0].mxu1 %v10386_v6 }
  0x7f   :  { %1021 = vmatpush1.bf16.msra.mxu0 %v8853_v8  ;;  %1052 = vmatprep.mubr.bf16.mxu0 %v10292_v0  ;;  %v114_v8 = vld [vmem:[#allocation5 + $0xe0] sm:$0xff] }
  0x80   :  { %1022 = vmatprep.subr.bf16.mxu0 %v8870_v11  ;;  %1062 = vmatpush1.bf16.msra.mxu1 %v8855_v20  ;;  %v91_v11 = vld [vmem:[#allocation5 + $0x28] sm:$0xff]  ;;  %v8874_v13 = vcombine.high %v106_v7, %v114_v8  ;;  %v8873_v18 = vcombine.low %v106_v7, %v114_v8 }
  0x81   :  { %1093 = vmatprep.mubr.bf16.mxu1 %v10292_v0  ;;  %1063 = vmatprep.subr.bf16.mxu1 %v8872_v23  ;;  %v8860_v17 = vcombine.high %v91_v11, %v99_v12  ;;  %v115_v20 = vld [vmem:[#allocation5 + $0xe8] sm:$0xff]  ;;  %v8859_v22 = vcombine.low %v91_v11, %v99_v12  ;;  %v138_v23 = vld [vmem:[#allocation5 + $0x1a0] sm:$0xff] }
  0x83   :  { %1023 = vmatpush1.bf16.msra.mxu0 %v8869_v16  ;;  %v130_v16 = vld [vmem:[#allocation5 + $0x160] sm:$0xff] }
  0x84   :  { %1024 = vmatprep.subr.bf16.mxu0 %v8886_v19  ;;  %1064 = vmatpush1.bf16.msra.mxu1 %v8871_v28  ;;  %v107_v19 = vld [vmem:[#allocation5 + $0xa8] sm:$0xff]  ;;  %v8890_v21 = vcombine.high %v122_v15, %v130_v16  ;;  %v8889_v26 = vcombine.low %v122_v15, %v130_v16 }
  0x85   :  { %1065 = vmatprep.subr.bf16.mxu1 %v8888_v31  ;;  %v8876_v25 = vcombine.high %v107_v19, %v115_v20  ;;  %v131_v28 = vld [vmem:[#allocation5 + $0x168] sm:$0xff]  ;;  %v8875_v30 = vcombine.low %v107_v19, %v115_v20  ;;  %v154_v31 = vld [vmem:[#allocation5 + $0x220] sm:$0xff] }
  0x87   :  { %1025 = vmatpush1.bf16.msra.mxu0 %v8885_v24  ;;  %v146_v24 = vld [vmem:[#allocation5 + $0x1e0] sm:$0xff] }
  0x88   :  { %1026 = vmatprep.subr.bf16.mxu0 %v8902_v27  ;;  %1066 = vmatpush1.bf16.msra.mxu1 %v8887_v36  ;;  %v123_v27 = vld [vmem:[#allocation5 + $0x128] sm:$0xff]  ;;  %v8906_v29 = vcombine.high %v138_v23, %v146_v24  ;;  %v8905_v34 = vcombine.low %v138_v23, %v146_v24 }
  0x89   :  { %1067 = vmatprep.subr.bf16.mxu1 %v8904_v39  ;;  %v8892_v33 = vcombine.high %v123_v27, %v131_v28  ;;  %v147_v36 = vld [vmem:[#allocation5 + $0x1e8] sm:$0xff]  ;;  %v8891_v38 = vcombine.low %v123_v27, %v131_v28  ;;  %v170_v39 = vld [vmem:[#allocation5 + $0x2a0] sm:$0xff] }
  0x8b   :  { %1027 = vmatpush1.bf16.msra.mxu0 %v8901_v32  ;;  %v162_v32 = vld [vmem:[#allocation5 + $0x260] sm:$0xff] }
  0x8c   :  { %1028 = vmatprep.subr.bf16.mxu0 %v8918_v35  ;;  %1068 = vmatpush1.bf16.msra.mxu1 %v8903_v44  ;;  %v139_v35 = vld [vmem:[#allocation5 + $0x1a8] sm:$0xff]  ;;  %v8922_v37 = vcombine.high %v154_v31, %v162_v32  ;;  %v8921_v42 = vcombine.low %v154_v31, %v162_v32 }
  0x8d   :  { %1069 = vmatprep.subr.bf16.mxu1 %v8920_v47  ;;  %v8908_v41 = vcombine.high %v139_v35, %v147_v36  ;;  %v163_v44 = vld [vmem:[#allocation5 + $0x268] sm:$0xff]  ;;  %v8907_v46 = vcombine.low %v139_v35, %v147_v36  ;;  %v186_v47 = vld [vmem:[#allocation5 + $0x320] sm:$0xff] }
  0x8f   :  { %1029 = vmatpush1.bf16.msra.mxu0 %v8917_v40  ;;  %v178_v40 = vld [vmem:[#allocation5 + $0x2e0] sm:$0xff] }
  0x90   :  { %1030 = vmatprep.subr.bf16.mxu0 %v8934_v43  ;;  %1070 = vmatpush1.bf16.msra.mxu1 %v8919_v52  ;;  %v155_v43 = vld [vmem:[#allocation5 + $0x228] sm:$0xff]  ;;  %v8938_v45 = vcombine.high %v170_v39, %v178_v40  ;;  %v8937_v50 = vcombine.low %v170_v39, %v178_v40 }
  0x91   :  { %1071 = vmatprep.subr.bf16.mxu1 %v8936_v55  ;;  %v8924_v49 = vcombine.high %v155_v43, %v163_v44  ;;  %v179_v52 = vld [vmem:[#allocation5 + $0x2e8] sm:$0xff]  ;;  %v8923_v54 = vcombine.low %v155_v43, %v163_v44  ;;  %v202_v55 = vld [vmem:[#allocation5 + $0x3a0] sm:$0xff] }
  0x93   :  { %1031 = vmatpush1.bf16.msra.mxu0 %v8933_v48  ;;  %v194_v48 = vld [vmem:[#allocation5 + $0x360] sm:$0xff] }
  0x94   :  { %1032 = vmatprep.subr.bf16.mxu0 %v8950_v51  ;;  %1072 = vmatpush1.bf16.msra.mxu1 %v8935_v60  ;;  %v171_v51 = vld [vmem:[#allocation5 + $0x2a8] sm:$0xff]  ;;  %v8954_v53 = vcombine.high %v186_v47, %v194_v48  ;;  %v8953_v58 = vcombine.low %v186_v47, %v194_v48  ;;  %v188_v48 = vld [vmem:[#allocation5 + $0x330] sm:$0xff] }
  0x95   :  { %1073 = vmatprep.subr.bf16.mxu1 %v8952_v63  ;;  %v8940_v57 = vcombine.high %v171_v51, %v179_v52  ;;  %v195_v60 = vld [vmem:[#allocation5 + $0x368] sm:$0xff]  ;;  %v8939_v62 = vcombine.low %v171_v51, %v179_v52  ;;  %v92_v63 = vld [vmem:[#allocation5 + $0x30] sm:$0xff]  ;;  %v173_v52 = vld [vmem:[#allocation5 + $0x2b8] sm:$0xff] }
  0x97   :  { %1033 = vmatpush1.bf16.msra.mxu0 %v8949_v56  ;;  %v210_v56 = vld [vmem:[#allocation5 + $0x3e0] sm:$0xff] }
  0x98   :  { %1034 = vmatprep.subr.bf16.mxu0 %v8966_v59  ;;  %1074 = vmatpush1.bf16.msra.mxu1 %v8951_v5  ;;  %v187_v59 = vld [vmem:[#allocation5 + $0x328] sm:$0xff]  ;;  %v8970_v61 = vcombine.high %v202_v55, %v210_v56  ;;  %v8969_v3 = vcombine.low %v202_v55, %v210_v56  ;;  %v204_v56 = vld [vmem:[#allocation5 + $0x3b0] sm:$0xff] }
  0x99   :  { %1075 = vmatprep.subr.bf16.mxu1 %v8968_v9  ;;  %v8956_v2 = vcombine.high %v187_v59, %v195_v60  ;;  %v211_v5 = vld [vmem:[#allocation5 + $0x3e8] sm:$0xff]  ;;  %v8955_v8 = vcombine.low %v187_v59, %v195_v60  ;;  %v108_v9 = vld [vmem:[#allocation5 + $0xb0] sm:$0xff]  ;;  %v189_v60 = vld [vmem:[#allocation5 + $0x338] sm:$0xff] }
  0x9b   :  { %1035 = vmatpush1.bf16.msra.mxu0 %v8965_v1  ;;  %v100_v1 = vld [vmem:[#allocation5 + $0x70] sm:$0xff] }
  0x9c   :  { %1102 = vmatprep.subr.bf16.mxu0 %v8858_v4  ;;  %1076 = vmatpush1.bf16.msra.mxu1 %v8967_v14  ;;  %v203_v4 = vld [vmem:[#allocation5 + $0x3a8] sm:$0xff]  ;;  %v8862_v7 = vcombine.high %v92_v63, %v100_v1  ;;  %v8861_v12 = vcombine.low %v92_v63, %v100_v1  ;;  %v101_v14 = vld [vmem:[#allocation5 + $0x78] sm:$0xff]  ;;  %v1298_v1 = vld [vmem:[#allocation8] sm:$0xff] }
  0x9d   :  { %1143 = vmatprep.subr.bf16.mxu1 %v8860_v17  ;;  %v8972_v11 = vcombine.high %v203_v4, %v211_v5  ;;  %v8971_v16 = vcombine.low %v203_v4, %v211_v5  ;;  %v124_v17 = vld [vmem:[#allocation5 + $0x130] sm:$0xff]  ;;  %v205_v5 = vld [vmem:[#allocation5 + $0x3b8] sm:$0xff] }
  0x9e   :  { %1053 = vmatmul.mubr.bf16.vlgmr.msra.gmra.mrb[4].mxu0 %v10386_v6 }
  0x9f   :  { %1103 = vmatpush1.bf16.msra.mxu0 %v8857_v10  ;;  %1134 = vmatprep.mubr.bf16.mxu0 %v10292_v0  ;;  %v116_v10 = vld [vmem:[#allocation5 + $0xf0] sm:$0xff] }
  0xa0   :  { %1104 = vmatprep.subr.bf16.mxu0 %v8874_v13  ;;  %1094 = vmatmul.mubr.bf16.vlgmr.msra.gmra.mrb[4].mxu1 %v10386_v6  ;;  %v93_v13 = vld [vmem:[#allocation5 + $0x38] sm:$0xff]  ;;  %v8878_v15 = vcombine.high %v108_v9, %v116_v10  ;;  %v8877_v20 = vcombine.low %v108_v9, %v116_v10  ;;  %v1306_v10 = vld [vmem:[#allocation8 + $0x40] sm:$0xff] }
  0xa1   :  { %1144 = vmatpush1.bf16.msra.mxu1 %v8859_v22  ;;  %1175 = vmatprep.mubr.bf16.mxu1 %v10292_v0  ;;  %v8864_v19 = vcombine.high %v93_v13, %v101_v14  ;;  %v117_v22 = vld [vmem:[#allocation5 + $0xf8] sm:$0xff]  ;;  %v8863_v24 = vcombine.low %v93_v13, %v101_v14 }
  0xa2   :  { %1145 = vmatprep.subr.bf16.mxu1 %v8876_v25  ;;  %v140_v25 = vld [vmem:[#allocation5 + $0x1b0] sm:$0xff]  ;;  %v1299_v14 = vld [vmem:[#allocation8 + $0x8] sm:$0xff] }
  0xa3   :  { %1105 = vmatpush1.bf16.msra.mxu0 %v8873_v18  ;;  %v132_v18 = vld [vmem:[#allocation5 + $0x170] sm:$0xff] }
  0xa4   :  { %1106 = vmatprep.subr.bf16.mxu0 %v8890_v21  ;;  %v109_v21 = vld [vmem:[#allocation5 + $0xb8] sm:$0xff]  ;;  %v8894_v23 = vcombine.high %v124_v17, %v132_v18  ;;  %v8893_v28 = vcombine.low %v124_v17, %v132_v18  ;;  %v1314_v18 = vld [vmem:[#allocation8 + $0x80] sm:$0xff] }
  0xa5   :  { %1146 = vmatpush1.bf16.msra.mxu1 %v8875_v30  ;;  %v8880_v27 = vcombine.high %v109_v21, %v117_v22  ;;  %v133_v30 = vld [vmem:[#allocation5 + $0x178] sm:$0xff]  ;;  %v8879_v32 = vcombine.low %v109_v21, %v117_v22 }
  0xa6   :  { %1147 = vmatprep.subr.bf16.mxu1 %v8892_v33  ;;  %v156_v33 = vld [vmem:[#allocation5 + $0x230] sm:$0xff]  ;;  %v1307_v22 = vld [vmem:[#allocation8 + $0x48] sm:$0xff] }
  0xa7   :  { %1107 = vmatpush1.bf16.msra.mxu0 %v8889_v26  ;;  %v148_v26 = vld [vmem:[#allocation5 + $0x1f0] sm:$0xff] }
  0xa8   :  { %1108 = vmatprep.subr.bf16.mxu0 %v8906_v29  ;;  %v125_v29 = vld [vmem:[#allocation5 + $0x138] sm:$0xff]  ;;  %v8910_v31 = vcombine.high %v140_v25, %v148_v26  ;;  %v8909_v36 = vcombine.low %v140_v25, %v148_v26  ;;  %v1322_v26 = vld [vmem:[#allocation8 + $0xc0] sm:$0xff] }
  0xa9   :  { %1148 = vmatpush1.bf16.msra.mxu1 %v8891_v38  ;;  %v8896_v35 = vcombine.high %v125_v29, %v133_v30  ;;  %v149_v38 = vld [vmem:[#allocation5 + $0x1f8] sm:$0xff]  ;;  %v8895_v40 = vcombine.low %v125_v29, %v133_v30 }
  0xaa   :  { %1149 = vmatprep.subr.bf16.mxu1 %v8908_v41  ;;  %v172_v41 = vld [vmem:[#allocation5 + $0x2b0] sm:$0xff]  ;;  %v1315_v30 = vld [vmem:[#allocation8 + $0x88] sm:$0xff] }
  0xab   :  { %1109 = vmatpush1.bf16.msra.mxu0 %v8905_v34  ;;  %v164_v34 = vld [vmem:[#allocation5 + $0x270] sm:$0xff] }
  0xac   :  { %1110 = vmatprep.subr.bf16.mxu0 %v8922_v37  ;;  %v141_v37 = vld [vmem:[#allocation5 + $0x1b8] sm:$0xff]  ;;  %v8926_v39 = vcombine.high %v156_v33, %v164_v34  ;;  %v8925_v44 = vcombine.low %v156_v33, %v164_v34  ;;  %v1330_v34 = vld [vmem:[#allocation8 + $0x100] sm:$0xff] }
  0xad   :  { %1150 = vmatpush1.bf16.msra.mxu1 %v8907_v46  ;;  %v8912_v43 = vcombine.high %v141_v37, %v149_v38  ;;  %v165_v46 = vld [vmem:[#allocation5 + $0x278] sm:$0xff]  ;;  %v8911_v47 = vcombine.low %v141_v37, %v149_v38 }
  0xae   :  { %1151 = vmatprep.subr.bf16.mxu1 %v8924_v49  ;;  %v196_v49 = vld [vmem:[#allocation5 + $0x370] sm:$0xff]  ;;  %v1323_v38 = vld [vmem:[#allocation8 + $0xc8] sm:$0xff] }
  0xaf   :  { %1111 = vmatpush1.bf16.msra.mxu0 %v8921_v42  ;;  %v180_v42 = vld [vmem:[#allocation5 + $0x2f0] sm:$0xff]  ;;  %v8957_v59 = vcombine.low %v188_v48, %v196_v49 }
  0xb0   :  { %1112 = vmatprep.subr.bf16.mxu0 %v8938_v45  ;;  %v157_v45 = vld [vmem:[#allocation5 + $0x238] sm:$0xff]  ;;  %v8941_v51 = vcombine.low %v172_v41, %v180_v42 }
  0xb1   :  { %1152 = vmatpush1.bf16.msra.mxu1 %v8923_v54  ;;  %v8958_v54 = vcombine.high %v188_v48, %v196_v49  ;;  %v8927_v55 = vcombine.low %v157_v45, %v165_v46  ;;  %v1346_v48 = vld [vmem:[#allocation8 + $0x180] sm:$0xff] }
  0xb2   :  { %1153 = vmatprep.subr.bf16.mxu1 %v8940_v57  ;;  %v212_v57 = vld [vmem:[#allocation5 + $0x3f0] sm:$0xff] }
  0xb3   :  { %1113 = vmatpush1.bf16.msra.mxu0 %v8937_v50  ;;  %v8928_v50 = vcombine.high %v157_v45, %v165_v46  ;;  %v8973_v4 = vcombine.low %v204_v56, %v212_v57  ;;  %v1331_v45 = vld [vmem:[#allocation8 + $0x108] sm:$0xff]  ;;  %v1350_v49 = vld [vmem:[#allocation8 + $0x1a0] sm:$0xff] }
  0xb4   :  { %1114 = vmatprep.subr.bf16.mxu0 %v8954_v53  ;;  %v181_v53 = vld [vmem:[#allocation5 + $0x2f8] sm:$0xff] }
  0xb5   :  { %1154 = vmatpush1.bf16.msra.mxu1 %v8939_v62  ;;  %v8974_v62 = vcombine.high %v204_v56, %v212_v57  ;;  %v8943_v63 = vcombine.low %v173_v52, %v181_v53  ;;  %v1335_v46 = vld [vmem:[#allocation8 + $0x128] sm:$0xff]  ;;  %v1354_v56 = vld [vmem:[#allocation8 + $0x1c0] sm:$0xff] }
  0xb6   :  { %1155 = vmatprep.subr.bf16.mxu1 %v8956_v2  ;;  %v1302_v2 = vld [vmem:[#allocation8 + $0x20] sm:$0xff] }
  0xb7   :  { %1115 = vmatpush1.bf16.msra.mxu0 %v8953_v58  ;;  %v8944_v58 = vcombine.high %v173_v52, %v181_v53  ;;  %v8977_v13 = vcombine.low %v1298_v1, %v1302_v2  ;;  %v1339_v52 = vld [vmem:[#allocation8 + $0x148] sm:$0xff]  ;;  %v1358_v57 = vld [vmem:[#allocation8 + $0x1e0] sm:$0xff] }
  0xb8   :  { %1116 = vmatprep.subr.bf16.mxu0 %v8970_v61  ;;  %v197_v61 = vld [vmem:[#allocation5 + $0x378] sm:$0xff] }
  0xb9   :  { %1156 = vmatpush1.bf16.msra.mxu1 %v8955_v8  ;;  %v8978_v8 = vcombine.high %v1298_v1, %v1302_v2  ;;  %v8959_v9 = vcombine.low %v189_v60, %v197_v61  ;;  %v1343_v53 = vld [vmem:[#allocation8 + $0x168] sm:$0xff]  ;;  %v1362_v1 = vld [vmem:[#allocation8 + $0x200] sm:$0xff] }
  0xba   :  { %1157 = vmatprep.subr.bf16.mxu1 %v8972_v11  ;;  %v1310_v11 = vld [vmem:[#allocation8 + $0x60] sm:$0xff] }
  0xbb   :  { %1117 = vmatpush1.bf16.msra.mxu0 %v8969_v3  ;;  %v8960_v3 = vcombine.high %v189_v60, %v197_v61  ;;  %v8985_v21 = vcombine.low %v1306_v10, %v1310_v11  ;;  %v1347_v60 = vld [vmem:[#allocation8 + $0x188] sm:$0xff]  ;;  %v1366_v2 = vld [vmem:[#allocation8 + $0x220] sm:$0xff] }
  0xbc   :  { %1184 = vmatprep.subr.bf16.mxu0 %v8862_v7  ;;  %v213_v7 = vld [vmem:[#allocation5 + $0x3f8] sm:$0xff] }
  0xbd   :  { %1158 = vmatpush1.bf16.msra.mxu1 %v8971_v16  ;;  %v8986_v16 = vcombine.high %v1306_v10, %v1310_v11  ;;  %v8975_v17 = vcombine.low %v205_v5, %v213_v7  ;;  %v1351_v61 = vld [vmem:[#allocation8 + $0x1a8] sm:$0xff]  ;;  %v1370_v10 = vld [vmem:[#allocation8 + $0x240] sm:$0xff] }
  0xbe   :  { %1135 = vmatmul.mubr.bf16.vlgmr.msra.gmra.mrb[8].mxu0 %v10386_v6  ;;  %1225 = vmatprep.subr.bf16.mxu1 %v8864_v19  ;;  %v1318_v19 = vld [vmem:[#allocation8 + $0xa0] sm:$0xff] }
  0xbf   :  { %1185 = vmatpush1.bf16.msra.mxu0 %v8861_v12  ;;  %1216 = vmatprep.mubr.bf16.mxu0 %v10292_v0  ;;  %v8976_v12 = vcombine.high %v205_v5, %v213_v7  ;;  %v8993_v29 = vcombine.low %v1314_v18, %v1318_v19  ;;  %v1355_v5 = vld [vmem:[#allocation8 + $0x1c8] sm:$0xff]  ;;  %v1374_v11 = vld [vmem:[#allocation8 + $0x260] sm:$0xff] }
  0xc0   :  { %1186 = vmatprep.subr.bf16.mxu0 %v8878_v15  ;;  %1176 = vmatmul.mubr.bf16.vlgmr.msra.gmra.mrb[8].mxu1 %v10386_v6  ;;  %v1303_v15 = vld [vmem:[#allocation8 + $0x28] sm:$0xff] }
  0xc1   :  { %1226 = vmatpush1.bf16.msra.mxu1 %v8863_v24  ;;  %1257 = vmatprep.mubr.bf16.mxu1 %v10292_v0  ;;  %v8942_v0 = vcombine.high %v172_v41, %v180_v42  ;;  %v8994_v24 = vcombine.high %v1314_v18, %v1318_v19  ;;  %v8979_v25 = vcombine.low %v1299_v14, %v1303_v15  ;;  %v1338_v42 = vld [vmem:[#allocation8 + $0x140] sm:$0xff]  ;;  %v1359_v7 = vld [vmem:[#allocation8 + $0x1e8] sm:$0xff] }
  0xc2   :  { %1227 = vmatprep.subr.bf16.mxu1 %v8880_v27  ;;  %v1326_v27 = vld [vmem:[#allocation8 + $0xe0] sm:$0xff] }
  0xc3   :  { %1187 = vmatpush1.bf16.msra.mxu0 %v8877_v20  ;;  %v8980_v20 = vcombine.high %v1299_v14, %v1303_v15  ;;  %v9001_v37 = vcombine.low %v1322_v26, %v1326_v27  ;;  %v1363_v14 = vld [vmem:[#allocation8 + $0x208] sm:$0xff]  ;;  %v1378_v18 = vld [vmem:[#allocation8 + $0x280] sm:$0xff] }
  0xc4   :  { %1188 = vmatprep.subr.bf16.mxu0 %v8894_v23  ;;  %v1311_v23 = vld [vmem:[#allocation8 + $0x68] sm:$0xff]  ;;  %v1382_v19 = vld [vmem:[#allocation8 + $0x2a0] sm:$0xff] }
  0xc5   :  { %1228 = vmatpush1.bf16.msra.mxu1 %v8879_v32  ;;  %v9002_v32 = vcombine.high %v1322_v26, %v1326_v27  ;;  %v8987_v33 = vcombine.low %v1307_v22, %v1311_v23  ;;  %v1367_v15 = vld [vmem:[#allocation8 + $0x228] sm:$0xff]  ;;  %v1386_v26 = vld [vmem:[#allocation8 + $0x2c0] sm:$0xff] }
  0xc6   :  { %1229 = vmatprep.subr.bf16.mxu1 %v8896_v35  ;;  %v1334_v35 = vld [vmem:[#allocation8 + $0x120] sm:$0xff] }
  0xc7   :  { %1189 = vmatpush1.bf16.msra.mxu0 %v8893_v28  ;;  %v8988_v28 = vcombine.high %v1307_v22, %v1311_v23  ;;  %v1371_v22 = vld [vmem:[#allocation8 + $0x248] sm:$0xff]  ;;  %v1390_v27 = vld [vmem:[#allocation8 + $0x2e0] sm:$0xff] }
  0xc8   :  { %1190 = vmatprep.subr.bf16.mxu0 %v8910_v31  ;;  %v1319_v31 = vld [vmem:[#allocation8 + $0xa8] sm:$0xff] }
  0xc9   :  { %1230 = vmatpush1.bf16.msra.mxu1 %v8895_v40  ;;  %v9010_v40 = vcombine.high %v1330_v34, %v1334_v35  ;;  %v8995_v41 = vcombine.low %v1315_v30, %v1319_v31  ;;  %v1375_v23 = vld [vmem:[#allocation8 + $0x268] sm:$0xff] }
  0xca   :  { %1231 = vmatprep.subr.bf16.mxu1 %v8912_v43  ;;  %v1342_v43 = vld [vmem:[#allocation8 + $0x160] sm:$0xff] }
  0xcb   :  { %1191 = vmatpush1.bf16.msra.mxu0 %v8909_v36  ;;  %v8996_v36 = vcombine.high %v1315_v30, %v1319_v31  ;;  %v1379_v30 = vld [vmem:[#allocation8 + $0x288] sm:$0xff] }
  0xcc   :  { %1192 = vmatprep.subr.bf16.mxu0 %v8926_v39  ;;  %v1327_v39 = vld [vmem:[#allocation8 + $0xe8] sm:$0xff] }
  0xcd   :  { %1232 = vmatpush1.bf16.msra.mxu1 %v8911_v47  ;;  %v9003_v47 = vcombine.low %v1323_v38, %v1327_v39  ;;  %v1383_v31 = vld [vmem:[#allocation8 + $0x2a8] sm:$0xff] }
  0xce   :  { %1233 = vmatprep.subr.bf16.mxu1 %v8928_v50  ;;  %v9012_v50 = vcombine.high %v1331_v45, %v1335_v46 }
  0xcf   :  { %1193 = vmatpush1.bf16.msra.mxu0 %v8925_v44  ;;  %v9009_v44 = vcombine.low %v1330_v34, %v1334_v35  ;;  %v1394_v34 = vld [vmem:[#allocation8 + $0x300] sm:$0xff] }
  0xd0   :  { %1194 = vmatprep.subr.bf16.mxu0 %v8942_v0  ;;  %v9018_v0 = vcombine.high %v1338_v42, %v1342_v43  ;;  %v1398_v35 = vld [vmem:[#allocation8 + $0x320] sm:$0xff] }
  0xd1   :  { %1234 = vmatpush1.bf16.msra.mxu1 %v8927_v55  ;;  %v9011_v55 = vcombine.low %v1331_v45, %v1335_v46  ;;  %v1395_v45 = vld [vmem:[#allocation8 + $0x308] sm:$0xff] }
  0xd2   :  { %1235 = vmatprep.subr.bf16.mxu1 %v8944_v58  ;;  %v9020_v58 = vcombine.high %v1339_v52, %v1343_v53  ;;  %v1399_v46 = vld [vmem:[#allocation8 + $0x328] sm:$0xff] }
  0xd3   :  { %1195 = vmatpush1.bf16.msra.mxu0 %v8941_v51  ;;  %v9017_v51 = vcombine.low %v1338_v42, %v1342_v43  ;;  %v1402_v42 = vld [vmem:[#allocation8 + $0x340] sm:$0xff] }
  0xd4   :  { %1196 = vmatprep.subr.bf16.mxu0 %v8958_v54  ;;  %v9026_v54 = vcombine.high %v1346_v48, %v1350_v49  ;;  %v1406_v43 = vld [vmem:[#allocation8 + $0x360] sm:$0xff] }
  0xd5   :  { %1236 = vmatpush1.bf16.msra.mxu1 %v8943_v63  ;;  %v9019_v63 = vcombine.low %v1339_v52, %v1343_v53  ;;  %v1403_v52 = vld [vmem:[#allocation8 + $0x348] sm:$0xff] }
  0xd6   :  { %1237 = vmatprep.subr.bf16.mxu1 %v8960_v3  ;;  %v9028_v3 = vcombine.high %v1347_v60, %v1351_v61  ;;  %v1407_v53 = vld [vmem:[#allocation8 + $0x368] sm:$0xff] }
  0xd7   :  { %1197 = vmatpush1.bf16.msra.mxu0 %v8957_v59  ;;  %v9025_v59 = vcombine.low %v1346_v48, %v1350_v49  ;;  %v1410_v48 = vld [vmem:[#allocation8 + $0x380] sm:$0xff] }
  0xd8   :  { %1198 = vmatprep.subr.bf16.mxu0 %v8974_v62  ;;  %v9034_v62 = vcombine.high %v1354_v56, %v1358_v57  ;;  %v1414_v49 = vld [vmem:[#allocation8 + $0x3a0] sm:$0xff] }
  0xd9   :  { %1238 = vmatpush1.bf16.msra.mxu1 %v8959_v9  ;;  %v9027_v9 = vcombine.low %v1347_v60, %v1351_v61  ;;  %v1411_v60 = vld [vmem:[#allocation8 + $0x388] sm:$0xff] }
  0xda   :  { %1239 = vmatprep.subr.bf16.mxu1 %v8976_v12  ;;  %v9036_v12 = vcombine.high %v1355_v5, %v1359_v7  ;;  %v1415_v61 = vld [vmem:[#allocation8 + $0x3a8] sm:$0xff] }
  0xdb   :  { %1199 = vmatpush1.bf16.msra.mxu0 %v8973_v4  ;;  %v9033_v4 = vcombine.low %v1354_v56, %v1358_v57  ;;  %v1418_v56 = vld [vmem:[#allocation8 + $0x3c0] sm:$0xff] }
  0xdc   :  { %7484 = vmatprep.subr.bf16.mxu0 %v8978_v8  ;;  %v9042_v8 = vcombine.high %v1362_v1, %v1366_v2  ;;  %v1422_v57 = vld [vmem:[#allocation8 + $0x3e0] sm:$0xff] }
  0xdd   :  { %1240 = vmatpush1.bf16.msra.mxu1 %v8975_v17  ;;  %v9035_v17 = vcombine.low %v1355_v5, %v1359_v7  ;;  %v1419_v5 = vld [vmem:[#allocation8 + $0x3c8] sm:$0xff] }
  0xde   :  { %1217 = vmatmul.mubr.bf16.vlgmr.msra.gmra.mrb[12].mxu0 %v10386_v6  ;;  %7812 = vmatprep.subr.bf16.mxu1 %v8980_v20  ;;  %v9044_v20 = vcombine.high %v1363_v14, %v1367_v15  ;;  %v1423_v7 = vld [vmem:[#allocation8 + $0x3e8] sm:$0xff] }
  0xdf   :  { %7485 = vmatpush1.bf16.msra.mxu0 %v8977_v13  ;;  %v9041_v13 = vcombine.low %v1362_v1, %v1366_v2  ;;  %v10402_v1 = vld [vmem:[#allocation8 + $0x400] sm:$0xff] }
  0xe0   :  { %7486 = vmatprep.subr.bf16.mxu0 %v8986_v16  ;;  %1258 = vmatmul.mubr.bf16.vlgmr.msra.gmra.mrb[12].mxu1 %v10386_v6  ;;  %v9004_v6 = vcombine.high %v1323_v38, %v1327_v39  ;;  %v9050_v16 = vcombine.high %v1370_v10, %v1374_v11  ;;  %v1387_v38 = vld [vmem:[#allocation8 + $0x2c8] sm:$0xff]  ;;  %v10404_v2 = vld [vmem:[#allocation8 + $0x420] sm:$0xff] }
  0xe1   :  { %7813 = vmatpush1.bf16.msra.mxu1 %v8979_v25  ;;  %v9043_v25 = vcombine.low %v1363_v14, %v1367_v15  ;;  %v1391_v39 = vld [vmem:[#allocation8 + $0x2e8] sm:$0xff]  ;;  %v218_v15 = vlaneseq }
  0xe2   :  { %7814 = vmatprep.subr.bf16.mxu1 %v8988_v28  ;;  %v9052_v28 = vcombine.high %v1371_v22, %v1375_v23 }
  0xe3   :  { %7487 = vmatpush1.bf16.msra.mxu0 %v8985_v21  ;;  %v9049_v21 = vcombine.low %v1370_v10, %v1374_v11  ;;  %v9100_v10 = vcombine.high %v1419_v5, %v1423_v7  ;;  %v1427_v11 = vld [vmem:[#allocation8 + $0x408] sm:$0xff] }
  0xe4   :  { %7488 = vmatprep.subr.bf16.mxu0 %v8994_v24  ;;  %v9058_v24 = vcombine.high %v1378_v18, %v1382_v19 }
  0xe5   :  { %7815 = vmatpush1.bf16.msra.mxu1 %v8987_v33  ;;  %v9051_v33 = vcombine.low %v1371_v22, %v1375_v23 }
  0xe6   :  { %7816 = vmatprep.subr.bf16.mxu1 %v8996_v36  ;;  %v9060_v36 = vcombine.high %v1379_v30, %v1383_v31 }
  0xe7   :  { %7489 = vmatpush1.bf16.msra.mxu0 %v8993_v29  ;;  %v9057_v29 = vcombine.low %v1378_v18, %v1382_v19  ;;  %v10413_v18 = vld [vmem:[#allocation7] sm:$0xff] }
  0xe8   :  { %7490 = vmatprep.subr.bf16.mxu0 %v9002_v32  ;;  %v9066_v32 = vcombine.high %v1386_v26, %v1390_v27 }
  0xe9   :  { %7817 = vmatpush1.bf16.msra.mxu1 %v8995_v41  ;;  %v9059_v41 = vcombine.low %v1379_v30, %v1383_v31  ;;  %v1434_v30 = vld [vmem:[#allocation8 + $0x440] sm:$0xff] }
  0xea   :  { %7818 = vmatprep.subr.bf16.mxu1 %v9004_v6  ;;  %v9068_v6 = vcombine.high %v1387_v38, %v1391_v39 }
  0xeb   :  { %7491 = vmatpush1.bf16.msra.mxu0 %v9001_v37  ;;  %v9065_v37 = vcombine.low %v1386_v26, %v1390_v27 }
  0xec   :  { %7492 = vmatprep.subr.bf16.mxu0 %v9010_v40  ;;  %v9074_v40 = vcombine.high %v1394_v34, %v1398_v35 }
  0xed   :  { %7819 = vmatpush1.bf16.msra.mxu1 %v9003_v47  ;;  %v9067_v47 = vcombine.low %v1387_v38, %v1391_v39 }
  0xee   :  { %7820 = vmatprep.subr.bf16.mxu1 %v9012_v50  ;;  %v9076_v50 = vcombine.high %v1395_v45, %v1399_v46 }
  0xef   :  { %7493 = vmatpush1.bf16.msra.mxu0 %v9009_v44  ;;  %v9073_v44 = vcombine.low %v1394_v34, %v1398_v35  ;;  %v1439_v34 = vld [vmem:[#allocation8 + $0x468] sm:$0xff] }
  0xf0   :  { %7494 = vmatprep.subr.bf16.mxu0 %v9018_v0  ;;  %v9082_v0 = vcombine.high %v1402_v42, %v1406_v43 }
  0xf1   :  { %7821 = vmatpush1.bf16.msra.mxu1 %v9011_v55  ;;  %v9075_v55 = vcombine.low %v1395_v45, %v1399_v46  ;;  %v1443_v45 = vld [vmem:[#allocation8 + $0x488] sm:$0xff] }
  0xf2   :  { %7822 = vmatprep.subr.bf16.mxu1 %v9020_v58  ;;  %v9084_v58 = vcombine.high %v1403_v52, %v1407_v53  ;;  %v1447_v46 = vld [vmem:[#allocation8 + $0x4a8] sm:$0xff] }
  0xf3   :  { %7495 = vmatpush1.bf16.msra.mxu0 %v9017_v51  ;;  %v9081_v51 = vcombine.low %v1402_v42, %v1406_v43  ;;  %v1442_v43 = vld [vmem:[#allocation8 + $0x480] sm:$0xff] }
  0xf4   :  { %7496 = vmatprep.subr.bf16.mxu0 %v9026_v54  ;;  %v9090_v54 = vcombine.high %v1410_v48, %v1414_v49 }
  0xf5   :  { %7823 = vmatpush1.bf16.msra.mxu1 %v9019_v63  ;;  %v9083_v63 = vcombine.low %v1403_v52, %v1407_v53  ;;  %v9124_v53 = vcombine.high %v1443_v45, %v1447_v46 }
  0xf6   :  { %7824 = vmatprep.subr.bf16.mxu1 %v9028_v3  ;;  %v9092_v3 = vcombine.high %v1411_v60, %v1415_v61 }
  0xf7   :  { %7497 = vmatpush1.bf16.msra.mxu0 %v9025_v59  ;;  %v9089_v59 = vcombine.low %v1410_v48, %v1414_v49 }
  0xf8   :  { %7498 = vmatprep.subr.bf16.mxu0 %v9034_v62  ;;  %v9098_v62 = vcombine.high %v1418_v56, %v1422_v57 }
  0xf9   :  { %7825 = vmatpush1.bf16.msra.mxu1 %v9027_v9  ;;  %v9091_v9 = vcombine.low %v1411_v60, %v1415_v61  ;;  %v9123_v60 = vcombine.low %v1443_v45, %v1447_v46 }
  0xfa   :  { %7826 = vmatprep.subr.bf16.mxu1 %v9036_v12  ;;  %v1431_v12 = vld [vmem:[#allocation8 + $0x428] sm:$0xff] }
  0xfb   :  { %7499 = vmatpush1.bf16.msra.mxu0 %v9033_v4  ;;  %v9097_v4 = vcombine.low %v1418_v56, %v1422_v57  ;;  %v9108_v14 = vcombine.high %v1427_v11, %v1431_v12  ;;  %v9107_v38 = vcombine.low %v1427_v11, %v1431_v12  ;;  %v1451_v56 = vld [vmem:[#allocation8 + $0x4c8] sm:$0xff] }
  0xfc   :  { %7500 = vmatprep.subr.bf16.mxu0 %v9042_v8  ;;  %v9106_v8 = vcombine.high %v10402_v1, %v10404_v2  ;;  %v1455_v57 = vld [vmem:[#allocation8 + $0x4e8] sm:$0xff] }
  0xfd   :  { %7827 = vmatpush1.bf16.msra.mxu1 %v9035_v17  ;;  %v1467_v11 = vld [vmem:[#allocation8 + $0x548] sm:$0xff] }
  0xfe   :  { %7828 = vmatprep.subr.bf16.mxu1 %v9044_v20  ;;  %v1471_v12 = vld [vmem:[#allocation8 + $0x568] sm:$0xff] }
  0xff   :  { %7501 = vmatpush1.bf16.msra.mxu0 %v9041_v13  ;;  %v9099_v13 = vcombine.low %v1419_v5, %v1423_v7  ;;  %v9131_v5 = vcombine.low %v1451_v56, %v1455_v57 }
 0x100   :  { %7502 = vmatprep.subr.bf16.mxu0 %v9050_v16  ;;  %v10408_v16 = vshrl.u32 %v218_v15, 7 }
 0x101   :  { %7829 = vmatpush1.bf16.msra.mxu1 %v9043_v25 }
 0x102   :  { %7830 = vmatprep.subr.bf16.mxu1 %v9052_v28  ;;  %v10411_v17 = vsub.s32 0, %v10408_v16  ;;  %v10416_v19 = vsub.s32 1, %v10408_v16  ;;  %v10423_v23 = vsub.s32 3, %v10408_v16 }
 0x103   :  { %7503 = vmatpush1.bf16.msra.mxu0 %v9049_v21 }
 0x104   :  { %7504 = vmatprep.subr.bf16.mxu0 %v9058_v24  ;;  %v221_v20 = vrot.slane %v10413_v18, %v10411_v17  ;;  %v225_v21 = vrot.slane %v10413_v18, %v10416_v19  ;;  %v233_v35 = vrot.slane %v10413_v18, %v10423_v23 }
 0x105   :  { %7831 = vmatpush1.bf16.msra.mxu1 %v9051_v33  ;;  %v1435_v33 = vld [vmem:[#allocation8 + $0x448] sm:$0xff] }
 0x106   :  { %7832 = vmatprep.subr.bf16.mxu1 %v9060_v36  ;;  %v9116_v42 = vcombine.high %v1435_v33, %v1439_v34 }
 0x107   :  { %7505 = vmatpush1.bf16.msra.mxu0 %v9057_v29 }
 0x108   :  { %7506 = vmatprep.subr.bf16.mxu0 %v9066_v32  ;;  %v1438_v32 = vld [vmem:[#allocation8 + $0x460] sm:$0xff] }
 0x109   :  { %7833 = vmatpush1.bf16.msra.mxu1 %v9059_v41  ;;  %v9114_v41 = vcombine.high %v1434_v30, %v1438_v32  ;;  %v9113_v49 = vcombine.low %v1434_v30, %v1438_v32  ;;  %v1482_v30 = vld [vmem:[#allocation8 + $0x5c0] sm:$0xff]  ;;  %v1483_v32 = vld [vmem:[#allocation8 + $0x5c8] sm:$0xff] }
 0x10a   :  { %7834 = vmatprep.subr.bf16.mxu1 %v9068_v6 }
 0x10b   :  { %7507 = vmatpush1.bf16.msra.mxu0 %v9065_v37  ;;  %v9105_v37 = vcombine.low %v10402_v1, %v10404_v2  ;;  %v1462_v1 = vld [vmem:[#allocation8 + $0x520] sm:$0xff]  ;;  %v1459_v2 = vld [vmem:[#allocation8 + $0x508] sm:$0xff] }
 0x10c   :  { %7508 = vmatprep.subr.bf16.mxu0 %v9074_v40 }
 0x10d   :  { %7835 = vmatpush1.bf16.msra.mxu1 %v9067_v47 }
 0x10e   :  { %7836 = vmatprep.subr.bf16.mxu1 %v9076_v50  ;;  %v9115_v50 = vcombine.low %v1435_v33, %v1439_v34  ;;  %v1487_v33 = vld [vmem:[#allocation8 + $0x5e8] sm:$0xff] }
 0x10f   :  { %7509 = vmatpush1.bf16.msra.mxu0 %v9073_v44  ;;  %v1446_v44 = vld [vmem:[#allocation8 + $0x4a0] sm:$0xff] }
 0x110   :  { %7510 = vmatprep.subr.bf16.mxu0 %v9082_v0  ;;  %v9122_v52 = vcombine.high %v1442_v43, %v1446_v44 }
 0x111   :  { %7837 = vmatpush1.bf16.msra.mxu1 %v9075_v55  ;;  %v1454_v55 = vld [vmem:[#allocation8 + $0x4e0] sm:$0xff] }
 0x112   :  { %7838 = vmatprep.subr.bf16.mxu1 %v9084_v58 }
 0x113   :  { %7511 = vmatpush1.bf16.msra.mxu0 %v9081_v51 }
 0x114   :  { %7512 = vmatprep.subr.bf16.mxu0 %v9090_v54  ;;  %v1450_v54 = vld [vmem:[#allocation8 + $0x4c0] sm:$0xff] }
 0x115   :  { %7839 = vmatpush1.bf16.msra.mxu1 %v9083_v63  ;;  %v9130_v61 = vcombine.high %v1450_v54, %v1454_v55  ;;  %v1458_v63 = vld [vmem:[#allocation8 + $0x500] sm:$0xff] }
 0x116   :  { %7840 = vmatprep.subr.bf16.mxu1 %v9092_v3  ;;  %v1463_v3 = vld [vmem:[#allocation8 + $0x528] sm:$0xff]  ;;  %v9138_v7 = vcombine.high %v1458_v63, %v1462_v1 }
 0x117   :  { %7513 = vmatpush1.bf16.msra.mxu0 %v9089_v59  ;;  %v9121_v59 = vcombine.low %v1442_v43, %v1446_v44  ;;  %v1491_v43 = vld [vmem:[#allocation8 + $0x608] sm:$0xff] }
 0x118   :  { %7514 = vmatprep.subr.bf16.mxu0 %v9098_v62  ;;  %v9132_v62 = vcombine.high %v1451_v56, %v1455_v57 }
 0x119   :  { %7841 = vmatpush1.bf16.msra.mxu1 %v9091_v9  ;;  %v1466_v9 = vld [vmem:[#allocation8 + $0x540] sm:$0xff] }
 0x11a   :  { %7842 = vmatprep.subr.bf16.mxu1 %v9100_v10  ;;  %v1470_v10 = vld [vmem:[#allocation8 + $0x560] sm:$0xff] }
 0x11b   :  { %7515 = vmatpush1.bf16.msra.mxu0 %v9097_v4  ;;  %v9129_v4 = vcombine.low %v1450_v54, %v1454_v55  ;;  %v9146_v15 = vcombine.high %v1466_v9, %v1470_v10  ;;  %v1503_v54 = vld [vmem:[#allocation8 + $0x668] sm:$0xff] }
 0x11c   :  { %7525 = vmatprep.subr.bf16.mxu0 %v9106_v8  ;;  %v9140_v8 = vcombine.high %v1459_v2, %v1463_v3 }
 0x11d   :  { %7843 = vmatpush1.bf16.msra.mxu1 %v9099_v13  ;;  %v9137_v13 = vcombine.low %v1458_v63, %v1462_v1  ;;  %v1510_v63 = vld [vmem:[#allocation8 + $0x6a0] sm:$0xff]  ;;  %v1507_v1 = vld [vmem:[#allocation8 + $0x688] sm:$0xff] }
 0x11e   :  { %7853 = vmatprep.subr.bf16.mxu1 %v9108_v14  ;;  %v9139_v14 = vcombine.low %v1459_v2, %v1463_v3  ;;  %v1511_v2 = vld [vmem:[#allocation8 + $0x6a8] sm:$0xff] }
 0x151   :  { %v972_v22 = vpop.f32.mrb[0].mxu0  ;;  %v10431_v39 = vpop.f32.mrb[0].mxu1 }
 0x152   :  { %v973_v24 = vadd.f32 %v972_v22, %v221_v20  ;;  %v974_v25 = vpop.f32.mrb[1].mxu0  ;;  %v1015_v6 = vpop.f32.mrb[1].mxu1  ;;  %v9148_v20 = vcombine.high %v1467_v11, %v1471_v12  ;;  %v1478_v22 = vld [vmem:[#allocation8 + $0x5a0] sm:$0xff] }
 0x153   :  { %v975_v26 = vadd.f32 %v974_v25, %v225_v21  ;;  %v976_v27 = vpop.f32.mrb[2].mxu0  ;;  %v1016_v0 = vadd.f32 %v1015_v6, %v233_v35  ;;  %v1017_v47 = vpop.f32.mrb[2].mxu1  ;;  %v1474_v21 = vld [vmem:[#allocation8 + $0x580] sm:$0xff]  ;;  %v1479_v25 = vld [vmem:[#allocation8 + $0x5a8] sm:$0xff] }
 0x154   :  { %v1266_v28 = vmax.f32 %v973_v24, 0.0  ;;  %v977_v29 = vpop.f32.mrb[3].mxu0  ;;  %v1018_v48 = vpop.f32.mrb[3].mxu1  ;;  %v1475_v24 = vld [vmem:[#allocation8 + $0x588] sm:$0xff]  ;;  %v9147_v27 = vcombine.low %v1467_v11, %v1471_v12  ;;  %v9153_v34 = vcombine.low %v1474_v21, %v1478_v22  ;;  %v1518_v11 = vld [vmem:[#allocation8 + $0x6e0] sm:$0xff] }
 0x155   :  { %v1267_v31 = vmax.f32 %v975_v26, 0.0  ;;  %v1269_v51 = vmax.f32 %v1016_v0, 0.0  ;;  %v9145_v26 = vcombine.low %v1466_v9, %v1470_v10  ;;  %v9156_v29 = vcombine.high %v1475_v24, %v1479_v25  ;;  %v1495_v6 = vld [vmem:[#allocation8 + $0x628] sm:$0xff]  ;;  %v1514_v10 = vld [vmem:[#allocation8 + $0x6c0] sm:$0xff] }
 0x156   :  { %v10433_v40 = vpack.c.bf16 %v1266_v28, %v1266_v28  ;;  %v9154_v28 = vcombine.high %v1474_v21, %v1478_v22  ;;  %v9155_v35 = vcombine.low %v1475_v24, %v1479_v25  ;;  %v9163_v0 = vcombine.low %v1483_v32, %v1487_v33  ;;  %v1515_v12 = vld [vmem:[#allocation8 + $0x6c8] sm:$0xff]  ;;  %v1522_v22 = vld [vmem:[#allocation8 + $0x700] sm:$0xff] }
 0x157   :  { %v10427_v36 = vpack.c.bf16 %v1267_v31, %v1267_v31  ;;  %v10439_v58 = vpack.c.bf16 %v1269_v51, %v1269_v51  ;;  %v1486_v31 = vld [vmem:[#allocation8 + $0x5e0] sm:$0xff]  ;;  %v9171_v56 = vcombine.low %v1491_v43, %v1495_v6  ;;  %v9188_v9 = vcombine.high %v1507_v1, %v1511_v2  ;;  %v1523_v25 = vld [vmem:[#allocation8 + $0x708] sm:$0xff] }
 0x158   :  { %v9161_v46 = vcombine.low %v1482_v30, %v1486_v31  ;;  %v1526_v24 = vld [vmem:[#allocation8 + $0x720] sm:$0xff] }
 0x159   :  { %7516 = vmatprep.mubr.bf16.mxu0 %v10427_v36  ;;  %7844 = vmatprep.mubr.bf16.mxu1 %v10427_v36 }
 0x15a   :  { %7517 = vmatmul.mubr.bf16.vlgmr.msra.gmra.mrb[16].mxu0 %v10433_v40  ;;  %7845 = vmatmul.mubr.bf16.vlgmr.msra.gmra.mrb[16].mxu1 %v10433_v40 }
 0x15b   :  { %7526 = vmatpush1.bf16.msra.mxu0 %v9105_v37  ;;  %7854 = vmatpush1.bf16.msra.mxu1 %v9107_v38  ;;  %v9162_v37 = vcombine.high %v1482_v30, %v1486_v31  ;;  %v9164_v38 = vcombine.high %v1483_v32, %v1487_v33  ;;  %v1530_v31 = vld [vmem:[#allocation8 + $0x740] sm:$0xff]  ;;  %v1531_v33 = vld [vmem:[#allocation8 + $0x748] sm:$0xff] }
 0x15c   :  { %7527 = vmatprep.subr.bf16.mxu0 %v9114_v41  ;;  %7855 = vmatprep.subr.bf16.mxu1 %v9116_v42  ;;  %v1490_v41 = vld [vmem:[#allocation8 + $0x600] sm:$0xff] }
 0x15d   :  { %7557 = vmatprep.mubr.bf16.mxu0 %v10439_v58  ;;  %7885 = vmatprep.mubr.bf16.mxu1 %v10439_v58  ;;  %v1494_v42 = vld [vmem:[#allocation8 + $0x620] sm:$0xff] }
 0x15e   :  { %v9170_v48 = vcombine.high %v1490_v41, %v1494_v42  ;;  %v9169_v55 = vcombine.low %v1490_v41, %v1494_v42  ;;  %v1534_v32 = vld [vmem:[#allocation8 + $0x760] sm:$0xff] }
 0x15f   :  { %7528 = vmatpush1.bf16.msra.mxu0 %v9113_v49  ;;  %7856 = vmatpush1.bf16.msra.mxu1 %v9115_v50  ;;  %v9172_v49 = vcombine.high %v1491_v43, %v1495_v6  ;;  %v1498_v50 = vld [vmem:[#allocation8 + $0x640] sm:$0xff]  ;;  %v9210_v41 = vcombine.high %v1530_v31, %v1534_v32 }
 0x160   :  { %7529 = vmatprep.subr.bf16.mxu0 %v9122_v52  ;;  %7857 = vmatprep.subr.bf16.mxu1 %v9124_v53  ;;  %v1502_v52 = vld [vmem:[#allocation8 + $0x660] sm:$0xff]  ;;  %v1499_v53 = vld [vmem:[#allocation8 + $0x648] sm:$0xff] }
 0x161   :  { %v1538_v43 = vld [vmem:[#allocation8 + $0x780] sm:$0xff] }
 0x162   :  { %v1542_v6 = vld [vmem:[#allocation8 + $0x7a0] sm:$0xff] }
 0x163   :  { %7530 = vmatpush1.bf16.msra.mxu0 %v9121_v59  ;;  %7858 = vmatpush1.bf16.msra.mxu1 %v9123_v60  ;;  %v9178_v59 = vcombine.high %v1498_v50, %v1502_v52  ;;  %v9180_v60 = vcombine.high %v1499_v53, %v1503_v54 }
 0x164   :  { %7531 = vmatprep.subr.bf16.mxu0 %v9130_v61  ;;  %7859 = vmatprep.subr.bf16.mxu1 %v9132_v62  ;;  %v1506_v61 = vld [vmem:[#allocation8 + $0x680] sm:$0xff] }
 0x167   :  { %7532 = vmatpush1.bf16.msra.mxu0 %v9129_v4  ;;  %7860 = vmatpush1.bf16.msra.mxu1 %v9131_v5  ;;  %v9177_v5 = vcombine.low %v1498_v50, %v1502_v52 }
 0x168   :  { %7533 = vmatprep.subr.bf16.mxu0 %v9138_v7  ;;  %7861 = vmatprep.subr.bf16.mxu1 %v9140_v8  ;;  %v9179_v7 = vcombine.low %v1499_v53, %v1503_v54  ;;  %v9186_v8 = vcombine.high %v1506_v61, %v1510_v63  ;;  %v1546_v53 = vld [vmem:[#allocation8 + $0x7c0] sm:$0xff] }
 0x169   :  { %v1550_v54 = vld [vmem:[#allocation8 + $0x7e0] sm:$0xff] }
 0x16b   :  { %7534 = vmatpush1.bf16.msra.mxu0 %v9137_v13  ;;  %7862 = vmatpush1.bf16.msra.mxu1 %v9139_v14  ;;  %v1519_v13 = vld [vmem:[#allocation8 + $0x6e8] sm:$0xff]  ;;  %v9185_v14 = vcombine.low %v1506_v61, %v1510_v63 }
 0x16c   :  { %7535 = vmatprep.subr.bf16.mxu0 %v9146_v15  ;;  %7863 = vmatprep.subr.bf16.mxu1 %v9148_v20  ;;  %v9187_v15 = vcombine.low %v1507_v1, %v1511_v2  ;;  %v9194_v20 = vcombine.high %v1514_v10, %v1518_v11  ;;  %v9196_v21 = vcombine.high %v1515_v12, %v1519_v13 }
 0x16d   :  { %v9226_v1 = vcombine.high %v1546_v53, %v1550_v54 }
 0x16f   :  { %7536 = vmatpush1.bf16.msra.mxu0 %v9145_v26  ;;  %7864 = vmatpush1.bf16.msra.mxu1 %v9147_v27  ;;  %v1527_v26 = vld [vmem:[#allocation8 + $0x728] sm:$0xff]  ;;  %v9193_v27 = vcombine.low %v1514_v10, %v1518_v11 }
 0x170   :  { %7537 = vmatprep.subr.bf16.mxu0 %v9154_v28  ;;  %7865 = vmatprep.subr.bf16.mxu1 %v9156_v29  ;;  %v9195_v28 = vcombine.low %v1515_v12, %v1519_v13  ;;  %v9202_v29 = vcombine.high %v1522_v22, %v1526_v24  ;;  %v9204_v30 = vcombine.high %v1523_v25, %v1527_v26 }
 0x171   :  { %v10443_v44 = vpop.f32.mrb[4].mxu0  ;;  %v9225_v12 = vcombine.low %v1546_v53, %v1550_v54  ;;  %v1578_v54 = vld [vmem:[#allocation8 + $0x8c0] sm:$0xff] }
 0x172   :  { %v10445_v45 = vpop.f32.mrb[5].mxu0 }
 0x173   :  { %7538 = vmatpush1.bf16.msra.mxu0 %v9153_v34  ;;  %7866 = vmatpush1.bf16.msra.mxu1 %v9155_v35  ;;  %v1058_v47 = vpop.f32.mrb[6].mxu0  ;;  %v10447_v57 = vpop.f32.mrb[4].mxu1  ;;  %v1535_v34 = vld [vmem:[#allocation8 + $0x768] sm:$0xff]  ;;  %v9201_v35 = vcombine.low %v1522_v22, %v1526_v24  ;;  %v1566_v22 = vld [vmem:[#allocation8 + $0x860] sm:$0xff] }
 0x174   :  { %7539 = vmatprep.subr.bf16.mxu0 %v9162_v37  ;;  %7867 = vmatprep.subr.bf16.mxu1 %v9164_v38  ;;  %v1059_v51 = vpop.f32.mrb[7].mxu0  ;;  %v10449_v62 = vpop.f32.mrb[5].mxu1  ;;  %v9203_v37 = vcombine.low %v1523_v25, %v1527_v26  ;;  %v10452_v38 = vsub.s32 2, %v10408_v16  ;;  %v9212_v42 = vcombine.high %v1531_v33, %v1535_v34  ;;  %v10455_v47 = vsub.s32 5, %v10408_v16  ;;  %v1563_v25 = vld [vmem:[#allocation8 + $0x848] sm:$0xff] }
 0x175   :  { %v1099_v3 = vpop.f32.mrb[6].mxu1  ;;  %v9218_v51 = vcombine.high %v1538_v43, %v1542_v6  ;;  %v1567_v26 = vld [vmem:[#allocation8 + $0x868] sm:$0xff] }
 0x176   :  { %v1100_v4 = vpop.f32.mrb[7].mxu1  ;;  %v229_v50 = vrot.slane %v10413_v18, %v10452_v38  ;;  %v1554_v3 = vld [vmem:[#allocation8 + $0x800] sm:$0xff] }
 0x177   :  { %7540 = vmatpush1.bf16.msra.mxu0 %v9161_v46  ;;  %7868 = vmatpush1.bf16.msra.mxu1 %v9163_v0  ;;  %v1539_v46 = vld [vmem:[#allocation8 + $0x788] sm:$0xff]  ;;  %v1558_v4 = vld [vmem:[#allocation8 + $0x820] sm:$0xff] }
 0x178   :  { %7541 = vmatprep.subr.bf16.mxu0 %v9170_v48  ;;  %7869 = vmatprep.subr.bf16.mxu1 %v9172_v49  ;;  %v1543_v0 = vld [vmem:[#allocation8 + $0x7a8] sm:$0xff]  ;;  %v9209_v48 = vcombine.low %v1530_v31, %v1534_v32  ;;  %v9211_v49 = vcombine.low %v1531_v33, %v1535_v34  ;;  %v1014_v63 = vadd.f32 %v10431_v39, %v229_v50 }
 0x179   :  { %v9220_v52 = vcombine.high %v1539_v46, %v1543_v0  ;;  %v9219_v61 = vcombine.low %v1539_v46, %v1543_v0  ;;  %v9244_v34 = vcombine.high %v1563_v25, %v1567_v26 }
 0x17b   :  { %7542 = vmatpush1.bf16.msra.mxu0 %v9169_v55  ;;  %7870 = vmatpush1.bf16.msra.mxu1 %v9171_v56  ;;  %v1547_v55 = vld [vmem:[#allocation8 + $0x7c8] sm:$0xff] }
 0x17c   :  { %7543 = vmatprep.subr.bf16.mxu0 %v9178_v59  ;;  %7871 = vmatprep.subr.bf16.mxu1 %v9180_v60  ;;  %v1551_v56 = vld [vmem:[#allocation8 + $0x7e8] sm:$0xff]  ;;  %v241_v59 = vrot.slane %v10413_v18, %v10455_v47  ;;  %v9217_v60 = vcombine.low %v1538_v43, %v1542_v6 }
 0x17d   :  { %v9228_v2 = vcombine.high %v1547_v55, %v1551_v56  ;;  %v9227_v39 = vcombine.low %v1547_v55, %v1551_v56  ;;  %v1571_v43 = vld [vmem:[#allocation8 + $0x888] sm:$0xff]  ;;  %v1582_v55 = vld [vmem:[#allocation8 + $0x8e0] sm:$0xff] }
 0x17e   :  { %v1575_v6 = vld [vmem:[#allocation8 + $0x8a8] sm:$0xff] }
 0x17f   :  { %7544 = vmatpush1.bf16.msra.mxu0 %v9177_v5  ;;  %7872 = vmatpush1.bf16.msra.mxu1 %v9179_v7  ;;  %v1555_v5 = vld [vmem:[#allocation8 + $0x808] sm:$0xff]  ;;  %v9252_v53 = vcombine.high %v1571_v43, %v1575_v6 }
 0x180   :  { %7545 = vmatprep.subr.bf16.mxu0 %v9186_v8  ;;  %7873 = vmatprep.subr.bf16.mxu1 %v9188_v9  ;;  %v1559_v7 = vld [vmem:[#allocation8 + $0x828] sm:$0xff]  ;;  %v1057_v8 = vadd.f32 %v10445_v45, %v241_v59  ;;  %v10463_v9 = vld [vmem:[#allocation7 + $0x8] sm:$0xff] }
 0x181   :  { %v261_v45 = vrot.slane %v10463_v9, %v10452_v38  ;;  %v1579_v56 = vld [vmem:[#allocation8 + $0x8c8] sm:$0xff] }
 0x182   :  { %v1583_v59 = vld [vmem:[#allocation8 + $0x8e8] sm:$0xff] }
 0x183   :  { %7546 = vmatpush1.bf16.msra.mxu0 %v9185_v14  ;;  %7874 = vmatpush1.bf16.msra.mxu1 %v9187_v15  ;;  %v1268_v14 = vmax.f32 %v1014_v63, 0.0  ;;  %v9234_v15 = vcombine.high %v1554_v3, %v1558_v4  ;;  %v9258_v63 = vcombine.high %v1578_v54, %v1582_v55 }
 0x184   :  { %7547 = vmatprep.subr.bf16.mxu0 %v9194_v20  ;;  %7875 = vmatprep.subr.bf16.mxu1 %v9196_v21  ;;  %v9236_v20 = vcombine.high %v1555_v5, %v1559_v7  ;;  %v1562_v21 = vld [vmem:[#allocation8 + $0x840] sm:$0xff] }
 0x185   :  { %v9242_v31 = vcombine.high %v1562_v21, %v1566_v22  ;;  %v10473_v33 = vpack.c.bf16 %v1268_v14, %v1268_v14  ;;  %v9241_v50 = vcombine.low %v1562_v21, %v1566_v22  ;;  %v1598_v14 = vld [vmem:[#allocation8 + $0x960] sm:$0xff] }
 0x187   :  { %7548 = vmatpush1.bf16.msra.mxu0 %v9193_v27  ;;  %7876 = vmatpush1.bf16.msra.mxu1 %v9195_v28  ;;  %v1271_v27 = vmax.f32 %v1057_v8, 0.0  ;;  %v265_v28 = vrot.slane %v10463_v9, %v10423_v23  ;;  %v9259_v8 = vcombine.low %v1579_v56, %v1583_v59 }
 0x188   :  { %7549 = vmatprep.subr.bf16.mxu0 %v9202_v29  ;;  %7877 = vmatprep.subr.bf16.mxu1 %v9204_v30  ;;  %v9233_v29 = vcombine.low %v1554_v3, %v1558_v4  ;;  %v9235_v30 = vcombine.low %v1555_v5, %v1559_v7  ;;  %v1590_v3 = vld [vmem:[#allocation8 + $0x920] sm:$0xff]  ;;  %v1587_v4 = vld [vmem:[#allocation8 + $0x908] sm:$0xff]  ;;  %v9257_v7 = vcombine.low %v1578_v54, %v1582_v55 }
 0x189   :  { %v10477_v46 = vpack.c.bf16 %v1271_v27, %v1271_v27  ;;  %v1591_v5 = vld [vmem:[#allocation8 + $0x928] sm:$0xff]  ;;  %v1622_v54 = vld [vmem:[#allocation8 + $0xa20] sm:$0xff] }
 0x18a   :  { %v9267_v22 = vcombine.low %v1587_v4, %v1591_v5  ;;  %v1603_v27 = vld [vmem:[#allocation8 + $0x988] sm:$0xff] }
 0x18b   :  { %7550 = vmatpush1.bf16.msra.mxu0 %v9201_v35  ;;  %7878 = vmatpush1.bf16.msra.mxu1 %v9203_v37  ;;  %v1570_v35 = vld [vmem:[#allocation8 + $0x880] sm:$0xff]  ;;  %v1619_v55 = vld [vmem:[#allocation8 + $0xa08] sm:$0xff] }
 0x18c   :  { %7551 = vmatprep.subr.bf16.mxu0 %v9210_v41  ;;  %7879 = vmatprep.subr.bf16.mxu1 %v9212_v42  ;;  %v1574_v42 = vld [vmem:[#allocation8 + $0x8a0] sm:$0xff] }
 0x18f   :  { %7552 = vmatpush1.bf16.msra.mxu0 %v9209_v48  ;;  %7880 = vmatpush1.bf16.msra.mxu1 %v9211_v49 }
 0x190   :  { %7553 = vmatprep.subr.bf16.mxu0 %v9218_v51  ;;  %7881 = vmatprep.subr.bf16.mxu1 %v9220_v52  ;;  %v9243_v51 = vcombine.low %v1563_v25, %v1567_v26  ;;  %v9250_v52 = vcombine.high %v1570_v35, %v1574_v42  ;;  %v1602_v25 = vld [vmem:[#allocation8 + $0x980] sm:$0xff] }
 0x191   :  { %v10465_v10 = vpop.f32.mrb[8].mxu0  ;;  %v1606_v26 = vld [vmem:[#allocation8 + $0x9a0] sm:$0xff] }
 0x192   :  { %v10467_v11 = vpop.f32.mrb[9].mxu0 }
 0x193   :  { %7554 = vmatpush1.bf16.msra.mxu0 %v9217_v60  ;;  %7882 = vmatpush1.bf16.msra.mxu1 %v9219_v61  ;;  %v1140_v13 = vpop.f32.mrb[10].mxu0  ;;  %v1177_v32 = vpop.f32.mrb[8].mxu1  ;;  %v9249_v60 = vcombine.low %v1570_v35, %v1574_v42  ;;  %v9251_v61 = vcombine.low %v1571_v43, %v1575_v6  ;;  %v1610_v35 = vld [vmem:[#allocation8 + $0x9c0] sm:$0xff]  ;;  %v1611_v42 = vld [vmem:[#allocation8 + $0x9c8] sm:$0xff] }
 0x194   :  { %7555 = vmatprep.subr.bf16.mxu0 %v9226_v1  ;;  %7883 = vmatprep.subr.bf16.mxu1 %v9228_v2  ;;  %v1141_v24 = vpop.f32.mrb[11].mxu0  ;;  %v10475_v37 = vadd.f32 %v1177_v32, %v261_v45  ;;  %v1179_v41 = vpop.f32.mrb[9].mxu1  ;;  %v9260_v1 = vcombine.high %v1579_v56, %v1583_v59  ;;  %v1586_v2 = vld [vmem:[#allocation8 + $0x900] sm:$0xff]  ;;  %v9282_v32 = vcombine.high %v1602_v25, %v1606_v26  ;;  %v1615_v43 = vld [vmem:[#allocation8 + $0x9e8] sm:$0xff] }
 0x195   :  { %v10479_v0 = vadd.f32 %v1179_v41, %v265_v28  ;;  %v1181_v48 = vpop.f32.mrb[10].mxu1  ;;  %v1594_v13 = vld [vmem:[#allocation8 + $0x940] sm:$0xff]  ;;  %v9265_v21 = vcombine.low %v1586_v2, %v1590_v3  ;;  %v1607_v28 = vld [vmem:[#allocation8 + $0x9a8] sm:$0xff] }
 0x196   :  { %v1182_v49 = vpop.f32.mrb[11].mxu1  ;;  %v9274_v45 = vcombine.high %v1594_v13, %v1598_v14  ;;  %v1614_v41 = vld [vmem:[#allocation8 + $0x9e0] sm:$0xff]  ;;  %v9281_v48 = vcombine.low %v1602_v25, %v1606_v26  ;;  %v1623_v56 = vld [vmem:[#allocation8 + $0xa28] sm:$0xff] }
 0x197   :  { %7556 = vmatpush1.bf16.msra.mxu0 %v9225_v12  ;;  %7884 = vmatpush1.bf16.msra.mxu1 %v9227_v39  ;;  %v9266_v12 = vcombine.high %v1586_v2, %v1590_v3  ;;  %v9268_v39 = vcombine.high %v1587_v4, %v1591_v5  ;;  %v9283_v49 = vcombine.low %v1603_v27, %v1607_v28  ;;  %v1634_v26 = vld [vmem:[#allocation8 + $0xa80] sm:$0xff] }
 0x198   :  { %7566 = vmatprep.subr.bf16.mxu0 %v9234_v15  ;;  %7894 = vmatprep.subr.bf16.mxu1 %v9236_v20  ;;  %v1595_v15 = vld [vmem:[#allocation8 + $0x948] sm:$0xff]  ;;  %v9289_v2 = vcombine.low %v1610_v35, %v1614_v41  ;;  %v9291_v3 = vcombine.low %v1611_v42, %v1615_v43 }
 0x199   :  { %v1599_v20 = vld [vmem:[#allocation8 + $0x968] sm:$0xff] }
 0x19a   :  { %7558 = vmatmul.mubr.bf16.vlgmr.msra.gmra.mrb[16].mxu0 %v10473_v33  ;;  %7886 = vmatmul.mubr.bf16.vlgmr.msra.gmra.mrb[16].mxu1 %v10473_v33  ;;  %v9276_v24 = vcombine.high %v1595_v15, %v1599_v20 }
 0x19b   :  { %7567 = vmatpush1.bf16.msra.mxu0 %v9233_v29  ;;  %7895 = vmatpush1.bf16.msra.mxu1 %v9235_v30  ;;  %v9273_v29 = vcombine.low %v1594_v13, %v1598_v14  ;;  %v9275_v30 = vcombine.low %v1595_v15, %v1599_v20  ;;  %v1630_v14 = vld [vmem:[#allocation8 + $0xa60] sm:$0xff]  ;;  %v1627_v15 = vld [vmem:[#allocation8 + $0xa48] sm:$0xff] }
 0x19c   :  { %7568 = vmatprep.subr.bf16.mxu0 %v9242_v31  ;;  %7896 = vmatprep.subr.bf16.mxu1 %v9244_v34  ;;  %v10486_v31 = vsub.s32 4, %v10408_v16  ;;  %v9284_v34 = vcombine.high %v1603_v27, %v1607_v28 }
 0x19d   :  { %7598 = vmatprep.mubr.bf16.mxu0 %v10477_v46  ;;  %7926 = vmatprep.mubr.bf16.mxu1 %v10477_v46 }
 0x19e   :  { %v269_v6 = vrot.slane %v10463_v9, %v10486_v31 }
 0x19f   :  { %7569 = vmatpush1.bf16.msra.mxu0 %v9241_v50  ;;  %7897 = vmatpush1.bf16.msra.mxu1 %v9243_v51  ;;  %v273_v50 = vrot.slane %v10463_v9, %v10455_v47  ;;  %v9290_v51 = vcombine.high %v1610_v35, %v1614_v41 }
 0x1a0   :  { %7570 = vmatprep.subr.bf16.mxu0 %v9250_v52  ;;  %7898 = vmatprep.subr.bf16.mxu1 %v9252_v53  ;;  %v9292_v52 = vcombine.high %v1611_v42, %v1615_v43  ;;  %v1618_v53 = vld [vmem:[#allocation8 + $0xa00] sm:$0xff] }
 0x1a3   :  { %7571 = vmatpush1.bf16.msra.mxu0 %v9249_v60  ;;  %7899 = vmatpush1.bf16.msra.mxu1 %v9251_v61  ;;  %v10493_v60 = vsub.s32 6, %v10408_v16 }
 0x1a4   :  { %7572 = vmatprep.subr.bf16.mxu0 %v9258_v63  ;;  %7900 = vmatprep.subr.bf16.mxu1 %v9260_v1  ;;  %v10498_v1 = vsub.s32 7, %v10408_v16  ;;  %v1631_v16 = vld [vmem:[#allocation8 + $0xa68] sm:$0xff] }
 0x1a5   :  { %v9308_v25 = vcombine.high %v1627_v15, %v1631_v16  ;;  %v9307_v43 = vcombine.low %v1627_v15, %v1631_v16  ;;  %v1663_v15 = vld [vmem:[#allocation8 + $0xb68] sm:$0xff] }
 0x1a6   :  { %v281_v20 = vrot.slane %v10463_v9, %v10498_v1 }
 0x1a7   :  { %7573 = vmatpush1.bf16.msra.mxu0 %v9257_v7  ;;  %7901 = vmatpush1.bf16.msra.mxu1 %v9259_v8  ;;  %v9298_v7 = vcombine.high %v1618_v53, %v1622_v54  ;;  %v9300_v8 = vcombine.high %v1619_v55, %v1623_v56 }
 0x1a8   :  { %7574 = vmatprep.subr.bf16.mxu0 %v9266_v12  ;;  %7902 = vmatprep.subr.bf16.mxu1 %v9268_v39  ;;  %v1626_v12 = vld [vmem:[#allocation8 + $0xa40] sm:$0xff]  ;;  %v277_v39 = vrot.slane %v10463_v9, %v10493_v60 }
 0x1a9   :  { %v9305_v42 = vcombine.low %v1626_v12, %v1630_v14 }
 0x1ab   :  { %7575 = vmatpush1.bf16.msra.mxu0 %v9265_v21  ;;  %7903 = vmatpush1.bf16.msra.mxu1 %v9267_v22  ;;  %v9297_v21 = vcombine.low %v1618_v53, %v1622_v54  ;;  %v9299_v22 = vcombine.low %v1619_v55, %v1623_v56 }
 0x1ac   :  { %7576 = vmatprep.subr.bf16.mxu0 %v9274_v45  ;;  %7904 = vmatprep.subr.bf16.mxu1 %v9276_v24  ;;  %v9306_v24 = vcombine.high %v1626_v12, %v1630_v14  ;;  %v1659_v14 = vld [vmem:[#allocation8 + $0xb48] sm:$0xff] }
 0x1af   :  { %7577 = vmatpush1.bf16.msra.mxu0 %v9273_v29  ;;  %7905 = vmatpush1.bf16.msra.mxu1 %v9275_v30  ;;  %v1638_v29 = vld [vmem:[#allocation8 + $0xaa0] sm:$0xff]  ;;  %v1635_v30 = vld [vmem:[#allocation8 + $0xa88] sm:$0xff] }
 0x1b0   :  { %7578 = vmatprep.subr.bf16.mxu0 %v9282_v32  ;;  %7906 = vmatprep.subr.bf16.mxu1 %v9284_v34  ;;  %v1639_v32 = vld [vmem:[#allocation8 + $0xaa8] sm:$0xff]  ;;  %v9313_v53 = vcombine.low %v1634_v26, %v1638_v29 }
 0x1b1   :  { %v1218_v59 = vpop.f32.mrb[12].mxu0  ;;  %v9315_v54 = vcombine.low %v1635_v30, %v1639_v32 }
 0x1b2   :  { %v10495_v61 = vadd.f32 %v1218_v59, %v269_v6  ;;  %v1220_v63 = vpop.f32.mrb[13].mxu0  ;;  %v9314_v6 = vcombine.high %v1634_v26, %v1638_v29  ;;  %v1650_v59 = vld [vmem:[#allocation8 + $0xb00] sm:$0xff]  ;;  %v1671_v26 = vld [vmem:[#allocation8 + $0xba8] sm:$0xff]  ;;  %v9339_v29 = vcombine.low %v1659_v14, %v1663_v15 }
 0x1b3   :  { %7579 = vmatpush1.bf16.msra.mxu0 %v9281_v48  ;;  %7907 = vmatpush1.bf16.msra.mxu1 %v9283_v49  ;;  %v10500_v4 = vadd.f32 %v1220_v63, %v273_v50  ;;  %v1222_v5 = vpop.f32.mrb[14].mxu0  ;;  %v1259_v45 = vpop.f32.mrb[12].mxu1  ;;  %v9316_v48 = vcombine.high %v1635_v30, %v1639_v32  ;;  %v1642_v49 = vld [vmem:[#allocation8 + $0xac0] sm:$0xff]  ;;  %v237_v30 = vrot.slane %v10413_v18, %v10486_v31 }
 0x1b4   :  { %7580 = vmatprep.subr.bf16.mxu0 %v9290_v51  ;;  %7908 = vmatprep.subr.bf16.mxu1 %v9292_v52  ;;  %v1223_v13 = vpop.f32.mrb[15].mxu0  ;;  %v10506_v27 = vadd.f32 %v1259_v45, %v277_v39  ;;  %v1261_v28 = vpop.f32.mrb[13].mxu1  ;;  %v1646_v50 = vld [vmem:[#allocation8 + $0xae0] sm:$0xff]  ;;  %v1643_v51 = vld [vmem:[#allocation8 + $0xac8] sm:$0xff] }
 0x1b5   :  { %v10508_v34 = vadd.f32 %v1261_v28, %v281_v20  ;;  %v1263_v35 = vpop.f32.mrb[14].mxu1  ;;  %v1647_v52 = vld [vmem:[#allocation8 + $0xae8] sm:$0xff]  ;;  %v9322_v55 = vcombine.high %v1642_v49, %v1646_v50  ;;  %v1654_v63 = vld [vmem:[#allocation8 + $0xb20] sm:$0xff]  ;;  %v9321_v5 = vcombine.low %v1642_v49, %v1646_v50 }
 0x1b6   :  { %v1264_v41 = vpop.f32.mrb[15].mxu1  ;;  %v9324_v56 = vcombine.high %v1643_v51, %v1647_v52  ;;  %v1658_v39 = vld [vmem:[#allocation8 + $0xb40] sm:$0xff]  ;;  %v9329_v16 = vcombine.low %v1650_v59, %v1654_v63 }
 0x1b7   :  { %7581 = vmatpush1.bf16.msra.mxu0 %v9289_v2  ;;  %7909 = vmatpush1.bf16.msra.mxu1 %v9291_v3  ;;  %v1651_v2 = vld [vmem:[#allocation8 + $0xb08] sm:$0xff]  ;;  %v1662_v13 = vld [vmem:[#allocation8 + $0xb60] sm:$0xff] }
 0x1b8   :  { %7582 = vmatprep.subr.bf16.mxu0 %v9298_v7  ;;  %7910 = vmatprep.subr.bf16.mxu1 %v9300_v8  ;;  %v1655_v3 = vld [vmem:[#allocation8 + $0xb28] sm:$0xff]  ;;  %v9323_v7 = vcombine.low %v1643_v51, %v1647_v52  ;;  %v9330_v8 = vcombine.high %v1650_v59, %v1654_v63  ;;  %v1666_v45 = vld [vmem:[#allocation8 + $0xb80] sm:$0xff]  ;;  %v9337_v28 = vcombine.low %v1658_v39, %v1662_v13 }
 0x1b9   :  { %v9332_v12 = vcombine.high %v1651_v2, %v1655_v3  ;;  %v9331_v20 = vcombine.low %v1651_v2, %v1655_v3  ;;  %v1674_v41 = vld [vmem:[#allocation8 + $0xbc0] sm:$0xff]  ;;  %v1055_v51 = vadd.f32 %v10443_v44, %v237_v30  ;;  %v1683_v59 = vld [vmem:[#allocation8 + $0xc08] sm:$0xff] }
 0x1ba   :  { %v1687_v63 = vld [vmem:[#allocation8 + $0xc28] sm:$0xff] }
 0x1bb   :  { %7583 = vmatpush1.bf16.msra.mxu0 %v9297_v21  ;;  %7911 = vmatpush1.bf16.msra.mxu1 %v9299_v22  ;;  %v9338_v21 = vcombine.high %v1658_v39, %v1662_v13  ;;  %v9340_v22 = vcombine.high %v1659_v14, %v1663_v15  ;;  %v1270_v3 = vmax.f32 %v1055_v51, 0.0  ;;  %v1691_v39 = vld [vmem:[#allocation8 + $0xc48] sm:$0xff]  ;;  %v9363_v15 = vcombine.low %v1683_v59, %v1687_v63  ;;  %v1718_v51 = vld [vmem:[#allocation8 + $0xd20] sm:$0xff] }
 0x1bc   :  { %7584 = vmatprep.subr.bf16.mxu0 %v9306_v24  ;;  %7912 = vmatprep.subr.bf16.mxu1 %v9308_v25  ;;  %v1670_v24 = vld [vmem:[#allocation8 + $0xba0] sm:$0xff]  ;;  %v1667_v25 = vld [vmem:[#allocation8 + $0xb88] sm:$0xff] }
 0x1bd   :  { %v9346_v32 = vcombine.high %v1666_v45, %v1670_v24  ;;  %v9348_v35 = vcombine.high %v1667_v25, %v1671_v26  ;;  %v9345_v49 = vcombine.low %v1666_v45, %v1670_v24  ;;  %v9347_v50 = vcombine.low %v1667_v25, %v1671_v26  ;;  %v1695_v13 = vld [vmem:[#allocation8 + $0xc68] sm:$0xff]  ;;  %v1702_v45 = vld [vmem:[#allocation8 + $0xca0] sm:$0xff] }
 0x1be   :  { %v10516_v14 = vpack.c.bf16 %v1270_v3, %v1270_v3  ;;  %v1699_v24 = vld [vmem:[#allocation8 + $0xc88] sm:$0xff] }
 0x1bf   :  { %7585 = vmatpush1.bf16.msra.mxu0 %v9305_v42  ;;  %7913 = vmatpush1.bf16.msra.mxu1 %v9307_v43  ;;  %v249_v42 = vrot.slane %v10413_v18, %v10498_v1  ;;  %v1678_v43 = vld [vmem:[#allocation8 + $0xbe0] sm:$0xff]  ;;  %v1703_v25 = vld [vmem:[#allocation8 + $0xca8] sm:$0xff] }
 0x1c0   :  { %7586 = vmatprep.subr.bf16.mxu0 %v9314_v6  ;;  %7914 = vmatprep.subr.bf16.mxu1 %v9316_v48  ;;  %v1675_v6 = vld [vmem:[#allocation8 + $0xbc8] sm:$0xff]  ;;  %v9354_v52 = vcombine.high %v1674_v41, %v1678_v43  ;;  %v9353_v18 = vcombine.low %v1674_v41, %v1678_v43  ;;  %v9380_v30 = vcombine.high %v1699_v24, %v1703_v25 }
 0x1c1   :  { %v1679_v48 = vld [vmem:[#allocation8 + $0xbe8] sm:$0xff] }
 0x1c2   :  { %v9355_v2 = vcombine.low %v1675_v6, %v1679_v48  ;;  %v1707_v41 = vld [vmem:[#allocation8 + $0xcc8] sm:$0xff] }
 0x1c3   :  { %7587 = vmatpush1.bf16.msra.mxu0 %v9313_v53  ;;  %7915 = vmatpush1.bf16.msra.mxu1 %v9315_v54  ;;  %v9356_v53 = vcombine.high %v1675_v6, %v1679_v48  ;;  %v1682_v54 = vld [vmem:[#allocation8 + $0xc00] sm:$0xff]  ;;  %v9379_v6 = vcombine.low %v1699_v24, %v1703_v25  ;;  %v1727_v3 = vld [vmem:[#allocation8 + $0xd68] sm:$0xff] }
 0x1c4   :  { %7588 = vmatprep.subr.bf16.mxu0 %v9322_v55  ;;  %7916 = vmatprep.subr.bf16.mxu1 %v9324_v56  ;;  %v1098_v55 = vadd.f32 %v10449_v62, %v249_v42  ;;  %v1686_v56 = vld [vmem:[#allocation8 + $0xc20] sm:$0xff]  ;;  %v1711_v42 = vld [vmem:[#allocation8 + $0xce8] sm:$0xff] }
 0x1c5   :  { %v9361_v62 = vcombine.low %v1682_v54, %v1686_v56  ;;  %v1742_v24 = vld [vmem:[#allocation8 + $0xde0] sm:$0xff]  ;;  %v1739_v25 = vld [vmem:[#allocation8 + $0xdc8] sm:$0xff] }
 0x1c6   :  { %v1273_v44 = vmax.f32 %v1098_v55, 0.0  ;;  %v9387_v55 = vcombine.low %v1707_v41, %v1711_v42 }
 0x1c7   :  { %7589 = vmatpush1.bf16.msra.mxu0 %v9321_v5  ;;  %7917 = vmatpush1.bf16.msra.mxu1 %v9323_v7  ;;  %v9362_v5 = vcombine.high %v1682_v54, %v1686_v56  ;;  %v9364_v7 = vcombine.high %v1683_v59, %v1687_v63  ;;  %v1722_v63 = vld [vmem:[#allocation8 + $0xd40] sm:$0xff] }
 0x1c8   :  { %7590 = vmatprep.subr.bf16.mxu0 %v9330_v8  ;;  %7918 = vmatprep.subr.bf16.mxu1 %v9332_v12  ;;  %v1690_v8 = vld [vmem:[#allocation8 + $0xc40] sm:$0xff] }
 0x1c9   :  { %v1694_v12 = vld [vmem:[#allocation8 + $0xc60] sm:$0xff] }
 0x1ca   :  { %v9369_v26 = vcombine.low %v1690_v8, %v1694_v12 }
 0x1cb   :  { %7591 = vmatpush1.bf16.msra.mxu0 %v9329_v16  ;;  %7919 = vmatpush1.bf16.msra.mxu1 %v9331_v20  ;;  %v10518_v16 = vpack.c.bf16 %v1273_v44, %v1273_v44  ;;  %v9370_v20 = vcombine.high %v1690_v8, %v1694_v12  ;;  %v1730_v12 = vld [vmem:[#allocation8 + $0xd80] sm:$0xff] }
 0x1cc   :  { %7592 = vmatprep.subr.bf16.mxu0 %v9338_v21  ;;  %7920 = vmatprep.subr.bf16.mxu1 %v9340_v22  ;;  %v9372_v21 = vcombine.high %v1691_v39, %v1695_v13  ;;  %v1698_v22 = vld [vmem:[#allocation8 + $0xc80] sm:$0xff] }
 0x1cd   :  { %v9377_v43 = vcombine.low %v1698_v22, %v1702_v45 }
 0x1cf   :  { %7593 = vmatpush1.bf16.msra.mxu0 %v9337_v28  ;;  %7921 = vmatpush1.bf16.msra.mxu1 %v9339_v29  ;;  %v9371_v28 = vcombine.low %v1691_v39, %v1695_v13  ;;  %v9378_v29 = vcombine.high %v1698_v22, %v1702_v45  ;;  %v1734_v39 = vld [vmem:[#allocation8 + $0xda0] sm:$0xff]  ;;  %v1731_v13 = vld [vmem:[#allocation8 + $0xd88] sm:$0xff] }
 0x1d0   :  { %7594 = vmatprep.subr.bf16.mxu0 %v9346_v32  ;;  %7922 = vmatprep.subr.bf16.mxu1 %v9348_v35  ;;  %v1706_v32 = vld [vmem:[#allocation8 + $0xcc0] sm:$0xff] }
 0x1d1   :  { %v1710_v35 = vld [vmem:[#allocation8 + $0xce0] sm:$0xff] }
 0x1d2   :  { %v9386_v48 = vcombine.high %v1706_v32, %v1710_v35  ;;  %v9385_v54 = vcombine.low %v1706_v32, %v1710_v35  ;;  %v1738_v45 = vld [vmem:[#allocation8 + $0xdc0] sm:$0xff] }
 0x1d3   :  { %7595 = vmatpush1.bf16.msra.mxu0 %v9345_v49  ;;  %7923 = vmatpush1.bf16.msra.mxu1 %v9347_v50  ;;  %v9388_v49 = vcombine.high %v1707_v41, %v1711_v42  ;;  %v1714_v50 = vld [vmem:[#allocation8 + $0xd00] sm:$0xff]  ;;  %v1747_v42 = vld [vmem:[#allocation8 + $0xe08] sm:$0xff] }
 0x1d4   :  { %7596 = vmatprep.subr.bf16.mxu0 %v9354_v52  ;;  %7924 = vmatprep.subr.bf16.mxu1 %v9356_v53  ;;  %v1715_v52 = vld [vmem:[#allocation8 + $0xd08] sm:$0xff]  ;;  %v9394_v56 = vcombine.high %v1714_v50, %v1718_v51  ;;  %v1746_v35 = vld [vmem:[#allocation8 + $0xe00] sm:$0xff] }
 0x1d5   :  { %v1719_v53 = vld [vmem:[#allocation8 + $0xd28] sm:$0xff]  ;;  %v1750_v41 = vld [vmem:[#allocation8 + $0xe20] sm:$0xff] }
 0x1d6   :  { %v9396_v59 = vcombine.high %v1715_v52, %v1719_v53 }
 0x1d7   :  { %7597 = vmatpush1.bf16.msra.mxu0 %v9353_v18  ;;  %7925 = vmatpush1.bf16.msra.mxu1 %v9355_v2  ;;  %v1726_v18 = vld [vmem:[#allocation8 + $0xd60] sm:$0xff]  ;;  %v1723_v2 = vld [vmem:[#allocation8 + $0xd48] sm:$0xff] }
 0x1d8   :  { %7607 = vmatprep.subr.bf16.mxu0 %v9362_v5  ;;  %7935 = vmatprep.subr.bf16.mxu1 %v9364_v7  ;;  %v9393_v5 = vcombine.low %v1714_v50, %v1718_v51  ;;  %v9395_v7 = vcombine.low %v1715_v52, %v1719_v53  ;;  %v9402_v44 = vcombine.high %v1722_v63, %v1726_v18  ;;  %v1754_v51 = vld [vmem:[#allocation8 + $0xe40] sm:$0xff]  ;;  %v1755_v53 = vld [vmem:[#allocation8 + $0xe48] sm:$0xff] }
 0x1d9   :  { %v9404_v8 = vcombine.high %v1723_v2, %v1727_v3  ;;  %v1758_v52 = vld [vmem:[#allocation8 + $0xe60] sm:$0xff] }
 0x1da   :  { %7599 = vmatmul.mubr.bf16.vlgmr.msra.gmra.mrb[16].mxu0 %v10516_v14  ;;  %7927 = vmatmul.mubr.bf16.vlgmr.msra.gmra.mrb[16].mxu1 %v10516_v14 }
 0x1db   :  { %7608 = vmatpush1.bf16.msra.mxu0 %v9361_v62  ;;  %7639 = vmatprep.mubr.bf16.mxu0 %v10518_v16  ;;  %v1735_v62 = vld [vmem:[#allocation8 + $0xda8] sm:$0xff] }
 0x1dc   :  { %7936 = vmatpush1.bf16.msra.mxu1 %v9363_v15  ;;  %7967 = vmatprep.mubr.bf16.mxu1 %v10518_v16  ;;  %v9401_v15 = vcombine.low %v1722_v63, %v1726_v18  ;;  %v9412_v22 = vcombine.high %v1731_v13, %v1735_v62  ;;  %v1762_v18 = vld [vmem:[#allocation8 + $0xe80] sm:$0xff] }
 0x1dd   :  { %7609 = vmatprep.subr.bf16.mxu0 %v9370_v20  ;;  %7937 = vmatprep.subr.bf16.mxu1 %v9372_v21  ;;  %v9403_v20 = vcombine.low %v1723_v2, %v1727_v3  ;;  %v9410_v21 = vcombine.high %v1730_v12, %v1734_v39  ;;  %v1766_v2 = vld [vmem:[#allocation8 + $0xea0] sm:$0xff]  ;;  %v1763_v3 = vld [vmem:[#allocation8 + $0xe88] sm:$0xff] }
 0x1df   :  { %7610 = vmatpush1.bf16.msra.mxu0 %v9369_v26  ;;  %v1743_v26 = vld [vmem:[#allocation8 + $0xde8] sm:$0xff] }
 0x1e0   :  { %7938 = vmatpush1.bf16.msra.mxu1 %v9371_v28  ;;  %7611 = vmatprep.subr.bf16.mxu0 %v9378_v29  ;;  %v9409_v28 = vcombine.low %v1730_v12, %v1734_v39  ;;  %v9411_v29 = vcombine.low %v1731_v13, %v1735_v62  ;;  %v9420_v32 = vcombine.high %v1739_v25, %v1743_v26  ;;  %v1770_v39 = vld [vmem:[#allocation8 + $0xec0] sm:$0xff]  ;;  %v1771_v62 = vld [vmem:[#allocation8 + $0xec8] sm:$0xff] }
 0x1e1   :  { %7939 = vmatprep.subr.bf16.mxu1 %v9380_v30  ;;  %v9418_v30 = vcombine.high %v1738_v45, %v1742_v24  ;;  %v1774_v13 = vld [vmem:[#allocation8 + $0xee0] sm:$0xff] }
 0x1e3   :  { %7612 = vmatpush1.bf16.msra.mxu0 %v9377_v43  ;;  %v1751_v43 = vld [vmem:[#allocation8 + $0xe28] sm:$0xff] }
 0x1e4   :  { %7940 = vmatpush1.bf16.msra.mxu1 %v9379_v6  ;;  %7613 = vmatprep.subr.bf16.mxu0 %v9386_v48  ;;  %v9417_v6 = vcombine.low %v1738_v45, %v1742_v24  ;;  %v9419_v48 = vcombine.low %v1739_v25, %v1743_v26  ;;  %v9428_v50 = vcombine.high %v1747_v42, %v1751_v43  ;;  %v1778_v24 = vld [vmem:[#allocation8 + $0xf00] sm:$0xff]  ;;  %v1779_v26 = vld [vmem:[#allocation8 + $0xf08] sm:$0xff] }
 0x1e5   :  { %7941 = vmatprep.subr.bf16.mxu1 %v9388_v49  ;;  %v9426_v49 = vcombine.high %v1746_v35, %v1750_v41  ;;  %v1782_v25 = vld [vmem:[#allocation8 + $0xf20] sm:$0xff] }
 0x1e7   :  { %7614 = vmatpush1.bf16.msra.mxu0 %v9385_v54  ;;  %v1759_v54 = vld [vmem:[#allocation8 + $0xe68] sm:$0xff] }
 0x1e8   :  { %7942 = vmatpush1.bf16.msra.mxu1 %v9387_v55  ;;  %7615 = vmatprep.subr.bf16.mxu0 %v9394_v56  ;;  %v9425_v55 = vcombine.low %v1746_v35, %v1750_v41  ;;  %v9427_v56 = vcombine.low %v1747_v42, %v1751_v43  ;;  %v9436_v63 = vcombine.high %v1755_v53, %v1759_v54  ;;  %v1786_v41 = vld [vmem:[#allocation8 + $0xf40] sm:$0xff]  ;;  %v1787_v43 = vld [vmem:[#allocation8 + $0xf48] sm:$0xff] }
 0x1e9   :  { %7943 = vmatprep.subr.bf16.mxu1 %v9396_v59  ;;  %v9434_v59 = vcombine.high %v1754_v51, %v1758_v52  ;;  %v1790_v42 = vld [vmem:[#allocation8 + $0xf60] sm:$0xff] }
 0x1eb   :  { %7616 = vmatpush1.bf16.msra.mxu0 %v9393_v5  ;;  %v1767_v5 = vld [vmem:[#allocation8 + $0xea8] sm:$0xff] }
 0x1ec   :  { %7944 = vmatpush1.bf16.msra.mxu1 %v9395_v7  ;;  %7617 = vmatprep.subr.bf16.mxu0 %v9402_v44  ;;  %v9433_v7 = vcombine.low %v1754_v51, %v1758_v52  ;;  %v9435_v44 = vcombine.low %v1755_v53, %v1759_v54  ;;  %v9444_v12 = vcombine.high %v1763_v3, %v1767_v5  ;;  %v1794_v52 = vld [vmem:[#allocation8 + $0xf80] sm:$0xff]  ;;  %v1795_v54 = vld [vmem:[#allocation8 + $0xf88] sm:$0xff] }
 0x1ed   :  { %7945 = vmatprep.subr.bf16.mxu1 %v9404_v8  ;;  %v9442_v8 = vcombine.high %v1762_v18, %v1766_v2  ;;  %v1798_v53 = vld [vmem:[#allocation8 + $0xfa0] sm:$0xff] }
 0x1ef   :  { %7618 = vmatpush1.bf16.msra.mxu0 %v9401_v15  ;;  %v1775_v15 = vld [vmem:[#allocation8 + $0xee8] sm:$0xff] }
 0x1f0   :  { %7946 = vmatpush1.bf16.msra.mxu1 %v9403_v20  ;;  %7619 = vmatprep.subr.bf16.mxu0 %v9410_v21  ;;  %v9441_v20 = vcombine.low %v1762_v18, %v1766_v2  ;;  %v9443_v21 = vcombine.low %v1763_v3, %v1767_v5  ;;  %v9452_v45 = vcombine.high %v1771_v62, %v1775_v15  ;;  %v1802_v5 = vld [vmem:[#allocation8 + $0xfc0] sm:$0xff] }
 0x1f1   :  { %7947 = vmatprep.subr.bf16.mxu1 %v9412_v22  ;;  %v9450_v22 = vcombine.high %v1770_v39, %v1774_v13  ;;  %v9474_v2 = vcombine.high %v1794_v52, %v1798_v53 }
 0x1f3   :  { %7620 = vmatpush1.bf16.msra.mxu0 %v9409_v28  ;;  %v1783_v28 = vld [vmem:[#allocation8 + $0xf28] sm:$0xff] }
 0x1f4   :  { %7948 = vmatpush1.bf16.msra.mxu1 %v9411_v29  ;;  %7621 = vmatprep.subr.bf16.mxu0 %v9418_v30  ;;  %v9449_v29 = vcombine.low %v1770_v39, %v1774_v13  ;;  %v9451_v30 = vcombine.low %v1771_v62, %v1775_v15  ;;  %v9460_v35 = vcombine.high %v1779_v26, %v1783_v28 }
 0x1f5   :  { %7949 = vmatprep.subr.bf16.mxu1 %v9420_v32  ;;  %v9458_v32 = vcombine.high %v1778_v24, %v1782_v25  ;;  %v9473_v39 = vcombine.low %v1794_v52, %v1798_v53  ;;  %v1827_v53 = vld [vmem:[#allocation8 + $0x1088] sm:$0xff] }
 0x1f7   :  { %7622 = vmatpush1.bf16.msra.mxu0 %v9417_v6  ;;  %v1791_v6 = vld [vmem:[#allocation8 + $0xf68] sm:$0xff] }
 0x1f8   :  { %7950 = vmatpush1.bf16.msra.mxu1 %v9419_v48  ;;  %7623 = vmatprep.subr.bf16.mxu0 %v9426_v49  ;;  %v9457_v48 = vcombine.low %v1778_v24, %v1782_v25  ;;  %v9459_v49 = vcombine.low %v1779_v26, %v1783_v28  ;;  %v9468_v51 = vcombine.high %v1787_v43, %v1791_v6  ;;  %v1811_v24 = vld [vmem:[#allocation8 + $0x1008] sm:$0xff] }
 0x1f9   :  { %7951 = vmatprep.subr.bf16.mxu1 %v9428_v50  ;;  %v9466_v50 = vcombine.high %v1786_v41, %v1790_v42  ;;  %v9467_v18 = vcombine.low %v1787_v43, %v1791_v6  ;;  %v1815_v25 = vld [vmem:[#allocation8 + $0x1028] sm:$0xff] }
 0x1fa   :  { %v1823_v43 = vld [vmem:[#allocation8 + $0x1068] sm:$0xff] }
 0x1fb   :  { %7624 = vmatpush1.bf16.msra.mxu0 %v9425_v55  ;;  %v1799_v55 = vld [vmem:[#allocation8 + $0xfa8] sm:$0xff] }
 0x1fc   :  { %7952 = vmatpush1.bf16.msra.mxu1 %v9427_v56  ;;  %7625 = vmatprep.subr.bf16.mxu0 %v9434_v59  ;;  %v9465_v56 = vcombine.low %v1786_v41, %v1790_v42  ;;  %v10140_v59 = vld [vmem:[#allocation7] sm:$0xff]  ;;  %v9476_v3 = vcombine.high %v1795_v54, %v1799_v55  ;;  %v9475_v62 = vcombine.low %v1795_v54, %v1799_v55  ;;  %v1819_v42 = vld [vmem:[#allocation8 + $0x1048] sm:$0xff] }
 0x1fd   :  { %7953 = vmatprep.subr.bf16.mxu1 %v9436_v63  ;;  %v245_v63 = vrot.slane %v10140_v59, %v10493_v60  ;;  %v9500_v52 = vcombine.high %v1819_v42, %v1823_v43  ;;  %v1831_v54 = vld [vmem:[#allocation8 + $0x10a8] sm:$0xff] }
 0x1ff   :  { %7626 = vmatpush1.bf16.msra.mxu0 %v9433_v7  ;;  %v1806_v7 = vld [vmem:[#allocation8 + $0xfe0] sm:$0xff]  ;;  %v1096_v13 = vadd.f32 %v10447_v57, %v245_v63  ;;  %v9492_v57 = vcombine.high %v1811_v24, %v1815_v25  ;;  %v9508_v63 = vcombine.high %v1827_v53, %v1831_v54 }
 0x200   :  { %7954 = vmatpush1.bf16.msra.mxu1 %v9435_v44  ;;  %7627 = vmatprep.subr.bf16.mxu0 %v9442_v8  ;;  %v257_v44 = vrot.slane %v10463_v9, %v10416_v19  ;;  %v1803_v8 = vld [vmem:[#allocation8 + $0xfc8] sm:$0xff]  ;;  %v9482_v15 = vcombine.high %v1802_v5, %v1806_v7  ;;  %v9481_v9 = vcombine.low %v1802_v5, %v1806_v7 }
 0x201   :  { %7955 = vmatprep.subr.bf16.mxu1 %v9444_v12  ;;  %v1807_v12 = vld [vmem:[#allocation8 + $0xfe8] sm:$0xff]  ;;  %v1272_v26 = vmax.f32 %v1096_v13, 0.0  ;;  %v1846_v13 = vld [vmem:[#allocation8 + $0x1120] sm:$0xff] }
 0x202   :  { %v9483_v28 = vcombine.low %v1803_v8, %v1807_v12  ;;  %v1839_v5 = vld [vmem:[#allocation8 + $0x10e8] sm:$0xff] }
 0x203   :  { %7628 = vmatpush1.bf16.msra.mxu0 %v9441_v20  ;;  %v9484_v20 = vcombine.high %v1803_v8, %v1807_v12  ;;  %v10529_v6 = vpack.c.bf16 %v1272_v26, %v1272_v26  ;;  %v1855_v26 = vld [vmem:[#allocation8 + $0x1168] sm:$0xff] }
 0x204   :  { %7956 = vmatpush1.bf16.msra.mxu1 %v9443_v21  ;;  %7629 = vmatprep.subr.bf16.mxu0 %v9450_v22  ;;  %v1810_v21 = vld [vmem:[#allocation8 + $0x1000] sm:$0xff] }
 0x205   :  { %7957 = vmatprep.subr.bf16.mxu1 %v9452_v45  ;;  %v1814_v22 = vld [vmem:[#allocation8 + $0x1020] sm:$0xff]  ;;  %v1139_v45 = vadd.f32 %v10467_v11, %v257_v44  ;;  %v9491_v11 = vcombine.low %v1811_v24, %v1815_v25  ;;  %v9507_v44 = vcombine.low %v1827_v53, %v1831_v54  ;;  %v1867_v53 = vld [vmem:[#allocation8 + $0x11c8] sm:$0xff] }
 0x206   :  { %v9489_v41 = vcombine.low %v1810_v21, %v1814_v22  ;;  %v1850_v24 = vld [vmem:[#allocation8 + $0x1140] sm:$0xff]  ;;  %v1871_v54 = vld [vmem:[#allocation8 + $0x11e8] sm:$0xff] }
 0x207   :  { %7630 = vmatpush1.bf16.msra.mxu0 %v9449_v29  ;;  %v9490_v29 = vcombine.high %v1810_v21, %v1814_v22  ;;  %v1854_v25 = vld [vmem:[#allocation8 + $0x1160] sm:$0xff] }
 0x208   :  { %7958 = vmatpush1.bf16.msra.mxu1 %v9451_v30  ;;  %7631 = vmatprep.subr.bf16.mxu0 %v9458_v32  ;;  %v1275_v30 = vmax.f32 %v1139_v45, 0.0  ;;  %v1818_v32 = vld [vmem:[#allocation8 + $0x1040] sm:$0xff] }
 0x209   :  { %7959 = vmatprep.subr.bf16.mxu1 %v9460_v35  ;;  %v1822_v35 = vld [vmem:[#allocation8 + $0x1060] sm:$0xff] }
 0x20a   :  { %v9497_v55 = vcombine.low %v1818_v32, %v1822_v35 }
 0x20b   :  { %7632 = vmatpush1.bf16.msra.mxu0 %v9457_v48  ;;  %v9498_v48 = vcombine.high %v1818_v32, %v1822_v35  ;;  %v1858_v32 = vld [vmem:[#allocation8 + $0x1180] sm:$0xff] }
 0x20c   :  { %7960 = vmatpush1.bf16.msra.mxu1 %v9459_v49  ;;  %7633 = vmatprep.subr.bf16.mxu0 %v9466_v50  ;;  %v1826_v49 = vld [vmem:[#allocation8 + $0x1080] sm:$0xff] }
 0x20d   :  { %7961 = vmatprep.subr.bf16.mxu1 %v9468_v51  ;;  %v1830_v50 = vld [vmem:[#allocation8 + $0x10a0] sm:$0xff]  ;;  %v10531_v51 = vpack.c.bf16 %v1275_v30, %v1275_v30 }
 0x20e   :  { %v9506_v59 = vcombine.high %v1826_v49, %v1830_v50  ;;  %v9505_v7 = vcombine.low %v1826_v49, %v1830_v50  ;;  %v1862_v35 = vld [vmem:[#allocation8 + $0x11a0] sm:$0xff] }
 0x20f   :  { %7634 = vmatpush1.bf16.msra.mxu0 %v9465_v56  ;;  %v9499_v56 = vcombine.low %v1819_v42, %v1823_v43  ;;  %v1863_v42 = vld [vmem:[#allocation8 + $0x11a8] sm:$0xff]  ;;  %v9529_v43 = vcombine.low %v1850_v24, %v1854_v25  ;;  %v1866_v50 = vld [vmem:[#allocation8 + $0x11c0] sm:$0xff] }
 0x210   :  { %7962 = vmatpush1.bf16.msra.mxu1 %v9467_v18  ;;  %7635 = vmatprep.subr.bf16.mxu0 %v9474_v2  ;;  %v1834_v18 = vld [vmem:[#allocation8 + $0x10c0] sm:$0xff] }
 0x211   :  { %7963 = vmatprep.subr.bf16.mxu1 %v9476_v3  ;;  %v1838_v2 = vld [vmem:[#allocation8 + $0x10e0] sm:$0xff]  ;;  %v1835_v3 = vld [vmem:[#allocation8 + $0x10c8] sm:$0xff] }
 0x212   :  { %v9514_v8 = vcombine.high %v1834_v18, %v1838_v2  ;;  %v9516_v12 = vcombine.high %v1835_v3, %v1839_v5  ;;  %v9515_v21 = vcombine.low %v1835_v3, %v1839_v5  ;;  %v1875_v3 = vld [vmem:[#allocation8 + $0x1208] sm:$0xff] }
 0x213   :  { %7636 = vmatpush1.bf16.msra.mxu0 %v9473_v39  ;;  %v1842_v39 = vld [vmem:[#allocation8 + $0x1100] sm:$0xff]  ;;  %v1879_v5 = vld [vmem:[#allocation8 + $0x1228] sm:$0xff] }
 0x214   :  { %7964 = vmatpush1.bf16.msra.mxu1 %v9475_v62  ;;  %7637 = vmatprep.subr.bf16.mxu0 %v9482_v15  ;;  %v1843_v62 = vld [vmem:[#allocation8 + $0x1108] sm:$0xff]  ;;  %v9522_v22 = vcombine.high %v1842_v39, %v1846_v13 }
 0x215   :  { %7965 = vmatprep.subr.bf16.mxu1 %v9484_v20  ;;  %v1847_v15 = vld [vmem:[#allocation8 + $0x1128] sm:$0xff]  ;;  %v9513_v20 = vcombine.low %v1834_v18, %v1838_v2  ;;  %v1874_v18 = vld [vmem:[#allocation8 + $0x1200] sm:$0xff] }
 0x216   :  { %v9524_v45 = vcombine.high %v1843_v62, %v1847_v15  ;;  %v1878_v2 = vld [vmem:[#allocation8 + $0x1220] sm:$0xff] }
 0x217   :  { %7638 = vmatpush1.bf16.msra.mxu0 %v9481_v9  ;;  %v1851_v9 = vld [vmem:[#allocation8 + $0x1148] sm:$0xff] }
 0x218   :  { %7966 = vmatpush1.bf16.msra.mxu1 %v9483_v28  ;;  %7648 = vmatprep.subr.bf16.mxu0 %v9490_v29  ;;  %v9521_v28 = vcombine.low %v1842_v39, %v1846_v13  ;;  %v9523_v29 = vcombine.low %v1843_v62, %v1847_v15  ;;  %v9532_v30 = vcombine.high %v1851_v9, %v1855_v26  ;;  %v1882_v39 = vld [vmem:[#allocation8 + $0x1240] sm:$0xff]  ;;  %v1883_v62 = vld [vmem:[#allocation8 + $0x1248] sm:$0xff] }
 0x219   :  { %7976 = vmatprep.subr.bf16.mxu1 %v9492_v57  ;;  %v9530_v57 = vcombine.high %v1850_v24, %v1854_v25  ;;  %v1886_v13 = vld [vmem:[#allocation8 + $0x1260] sm:$0xff]  ;;  %v1887_v15 = vld [vmem:[#allocation8 + $0x1268] sm:$0xff] }
 0x21a   :  { %7640 = vmatmul.mubr.bf16.vlgmr.msra.gmra.mrb[16].mxu0 %v10529_v6  ;;  %v1890_v24 = vld [vmem:[#allocation8 + $0x1280] sm:$0xff] }
 0x21b   :  { %7968 = vmatmul.mubr.bf16.vlgmr.msra.gmra.mrb[16].mxu1 %v10529_v6  ;;  %7649 = vmatpush1.bf16.msra.mxu0 %v9489_v41  ;;  %v1859_v41 = vld [vmem:[#allocation8 + $0x1188] sm:$0xff]  ;;  %v1894_v25 = vld [vmem:[#allocation8 + $0x12a0] sm:$0xff] }
 0x21c   :  { %7680 = vmatprep.mubr.bf16.mxu0 %v10531_v51  ;;  %7977 = vmatpush1.bf16.msra.mxu1 %v9491_v11  ;;  %v9531_v11 = vcombine.low %v1851_v9, %v1855_v26  ;;  %v9540_v49 = vcombine.high %v1859_v41, %v1863_v42  ;;  %v1891_v9 = vld [vmem:[#allocation8 + $0x1288] sm:$0xff] }
 0x21d   :  { %8008 = vmatprep.mubr.bf16.mxu1 %v10531_v51  ;;  %7650 = vmatprep.subr.bf16.mxu0 %v9498_v48  ;;  %v9538_v48 = vcombine.high %v1858_v32, %v1862_v35  ;;  %v1895_v26 = vld [vmem:[#allocation8 + $0x12a8] sm:$0xff] }
 0x21e   :  { %7978 = vmatprep.subr.bf16.mxu1 %v9500_v52  ;;  %v1870_v52 = vld [vmem:[#allocation8 + $0x11e0] sm:$0xff] }
 0x21f   :  { %7651 = vmatpush1.bf16.msra.mxu0 %v9497_v55  ;;  %v9537_v55 = vcombine.low %v1858_v32, %v1862_v35  ;;  %v1898_v32 = vld [vmem:[#allocation8 + $0x12c0] sm:$0xff] }
 0x220   :  { %7979 = vmatpush1.bf16.msra.mxu1 %v9499_v56  ;;  %7652 = vmatprep.subr.bf16.mxu0 %v9506_v59  ;;  %v9539_v56 = vcombine.low %v1859_v41, %v1863_v42  ;;  %v9546_v59 = vcombine.high %v1866_v50, %v1870_v52  ;;  %v1902_v35 = vld [vmem:[#allocation8 + $0x12e0] sm:$0xff]  ;;  %v1899_v41 = vld [vmem:[#allocation8 + $0x12c8] sm:$0xff] }
 0x221   :  { %7980 = vmatprep.subr.bf16.mxu1 %v9508_v63  ;;  %v9548_v63 = vcombine.high %v1867_v53, %v1871_v54  ;;  %v1903_v42 = vld [vmem:[#allocation8 + $0x12e8] sm:$0xff] }
 0x223   :  { %7653 = vmatpush1.bf16.msra.mxu0 %v9505_v7  ;;  %v9545_v7 = vcombine.low %v1866_v50, %v1870_v52  ;;  %v1906_v50 = vld [vmem:[#allocation8 + $0x1300] sm:$0xff] }
 0x224   :  { %7981 = vmatpush1.bf16.msra.mxu1 %v9507_v44  ;;  %7654 = vmatprep.subr.bf16.mxu0 %v9514_v8  ;;  %v9547_v44 = vcombine.low %v1867_v53, %v1871_v54  ;;  %v9554_v8 = vcombine.high %v1874_v18, %v1878_v2  ;;  %v1910_v52 = vld [vmem:[#allocation8 + $0x1320] sm:$0xff]  ;;  %v1907_v53 = vld [vmem:[#allocation8 + $0x1308] sm:$0xff] }
 0x225   :  { %7982 = vmatprep.subr.bf16.mxu1 %v9516_v12  ;;  %v9556_v12 = vcombine.high %v1875_v3, %v1879_v5  ;;  %v1911_v54 = vld [vmem:[#allocation8 + $0x1328] sm:$0xff] }
 0x227   :  { %7655 = vmatpush1.bf16.msra.mxu0 %v9513_v20  ;;  %v9553_v20 = vcombine.low %v1874_v18, %v1878_v2  ;;  %v1914_v18 = vld [vmem:[#allocation8 + $0x1340] sm:$0xff] }
 0x228   :  { %7983 = vmatpush1.bf16.msra.mxu1 %v9515_v21  ;;  %7656 = vmatprep.subr.bf16.mxu0 %v9522_v22  ;;  %v9555_v21 = vcombine.low %v1875_v3, %v1879_v5  ;;  %v9562_v22 = vcombine.high %v1882_v39, %v1886_v13  ;;  %v1918_v2 = vld [vmem:[#allocation8 + $0x1360] sm:$0xff]  ;;  %v1915_v3 = vld [vmem:[#allocation8 + $0x1348] sm:$0xff] }
 0x229   :  { %7984 = vmatprep.subr.bf16.mxu1 %v9524_v45  ;;  %v9564_v45 = vcombine.high %v1883_v62, %v1887_v15  ;;  %v1919_v5 = vld [vmem:[#allocation8 + $0x1368] sm:$0xff] }
 0x22b   :  { %7657 = vmatpush1.bf16.msra.mxu0 %v9521_v28  ;;  %v9561_v28 = vcombine.low %v1882_v39, %v1886_v13  ;;  %v1922_v39 = vld [vmem:[#allocation8 + $0x1380] sm:$0xff] }
 0x22c   :  { %7985 = vmatpush1.bf16.msra.mxu1 %v9523_v29  ;;  %7658 = vmatprep.subr.bf16.mxu0 %v9530_v57  ;;  %v9563_v29 = vcombine.low %v1883_v62, %v1887_v15  ;;  %v9570_v57 = vcombine.high %v1890_v24, %v1894_v25  ;;  %v1926_v13 = vld [vmem:[#allocation8 + $0x13a0] sm:$0xff]  ;;  %v1923_v62 = vld [vmem:[#allocation8 + $0x1388] sm:$0xff] }
 0x22d   :  { %7986 = vmatprep.subr.bf16.mxu1 %v9532_v30  ;;  %v9572_v30 = vcombine.high %v1891_v9, %v1895_v26  ;;  %v1927_v15 = vld [vmem:[#allocation8 + $0x13a8] sm:$0xff] }
 0x22f   :  { %7659 = vmatpush1.bf16.msra.mxu0 %v9529_v43  ;;  %v9569_v43 = vcombine.low %v1890_v24, %v1894_v25  ;;  %v9602_v24 = vcombine.high %v1922_v39, %v1926_v13  ;;  %v9604_v25 = vcombine.high %v1923_v62, %v1927_v15 }
 0x230   :  { %7987 = vmatpush1.bf16.msra.mxu1 %v9531_v11  ;;  %7660 = vmatprep.subr.bf16.mxu0 %v9538_v48  ;;  %v9571_v11 = vcombine.low %v1891_v9, %v1895_v26  ;;  %v9578_v48 = vcombine.high %v1898_v32, %v1902_v35  ;;  %v1930_v9 = vld [vmem:[#allocation8 + $0x13c0] sm:$0xff] }
 0x231   :  { %7988 = vmatprep.subr.bf16.mxu1 %v9540_v49  ;;  %v9580_v49 = vcombine.high %v1899_v41, %v1903_v42  ;;  %v1934_v26 = vld [vmem:[#allocation8 + $0x13e0] sm:$0xff] }
 0x233   :  { %7661 = vmatpush1.bf16.msra.mxu0 %v9537_v55  ;;  %v9577_v55 = vcombine.low %v1898_v32, %v1902_v35  ;;  %v9603_v32 = vcombine.low %v1923_v62, %v1927_v15  ;;  %v9610_v35 = vcombine.high %v1930_v9, %v1934_v26 }
 0x234   :  { %7989 = vmatpush1.bf16.msra.mxu1 %v9539_v56  ;;  %7662 = vmatprep.subr.bf16.mxu0 %v9546_v59  ;;  %v9579_v56 = vcombine.low %v1899_v41, %v1903_v42  ;;  %v9586_v59 = vcombine.high %v1906_v50, %v1910_v52  ;;  %v1938_v42 = vld [vmem:[#allocation8 + $0x1400] sm:$0xff] }
 0x235   :  { %7990 = vmatprep.subr.bf16.mxu1 %v9548_v63  ;;  %v9588_v63 = vcombine.high %v1907_v53, %v1911_v54 }
 0x237   :  { %7663 = vmatpush1.bf16.msra.mxu0 %v9545_v7  ;;  %v9585_v7 = vcombine.low %v1906_v50, %v1910_v52 }
 0x238   :  { %7991 = vmatpush1.bf16.msra.mxu1 %v9547_v44  ;;  %7664 = vmatprep.subr.bf16.mxu0 %v9554_v8  ;;  %v9587_v44 = vcombine.low %v1907_v53, %v1911_v54  ;;  %v9594_v8 = vcombine.high %v1914_v18, %v1918_v2 }
 0x239   :  { %7992 = vmatprep.subr.bf16.mxu1 %v9556_v12  ;;  %v9596_v12 = vcombine.high %v1915_v3, %v1919_v5 }
 0x23b   :  { %7665 = vmatpush1.bf16.msra.mxu0 %v9553_v20  ;;  %v9593_v20 = vcombine.low %v1914_v18, %v1918_v2  ;;  %v1951_v18 = vld [vmem:[#allocation8 + $0x1468] sm:$0xff] }
 0x23c   :  { %7993 = vmatpush1.bf16.msra.mxu1 %v9555_v21  ;;  %7666 = vmatprep.subr.bf16.mxu0 %v9562_v22  ;;  %v10141_v21 = vld [vmem:[#allocation7 + $0x8] sm:$0xff] }
 0x23d   :  { %7994 = vmatprep.subr.bf16.mxu1 %v9564_v45  ;;  %v253_v22 = vrot.slane %v10141_v21, %v10411_v17  ;;  %v9595_v45 = vcombine.low %v1915_v3, %v1919_v5  ;;  %v1962_v21 = vld [vmem:[#allocation8 + $0x14c0] sm:$0xff] }
 0x23f   :  { %7667 = vmatpush1.bf16.msra.mxu0 %v9561_v28  ;;  %v1931_v28 = vld [vmem:[#allocation8 + $0x13c8] sm:$0xff] }
 0x240   :  { %7995 = vmatpush1.bf16.msra.mxu1 %v9563_v29  ;;  %7668 = vmatprep.subr.bf16.mxu0 %v9570_v57  ;;  %v1935_v29 = vld [vmem:[#allocation8 + $0x13e8] sm:$0xff]  ;;  %v9601_v57 = vcombine.low %v1922_v39, %v1926_v13 }
 0x241   :  { %7996 = vmatprep.subr.bf16.mxu1 %v9572_v30  ;;  %v1137_v30 = vadd.f32 %v10465_v10, %v253_v22  ;;  %v9612_v41 = vcombine.high %v1931_v28, %v1935_v29  ;;  %v9611_v52 = vcombine.low %v1931_v28, %v1935_v29  ;;  %v1277_v10 = vmax.f32 %v10479_v0, 0.0  ;;  %v1959_v39 = vld [vmem:[#allocation8 + $0x14a8] sm:$0xff]  ;;  %v1966_v22 = vld [vmem:[#allocation8 + $0x14e0] sm:$0xff] }
 0x242   :  { %v1970_v29 = vld [vmem:[#allocation8 + $0x1500] sm:$0xff] }
 0x243   :  { %7669 = vmatpush1.bf16.msra.mxu0 %v9569_v43  ;;  %v1942_v43 = vld [vmem:[#allocation8 + $0x1420] sm:$0xff]  ;;  %v1274_v50 = vmax.f32 %v1137_v30, 0.0  ;;  %v1971_v30 = vld [vmem:[#allocation8 + $0x1508] sm:$0xff] }
 0x244   :  { %7997 = vmatpush1.bf16.msra.mxu1 %v9571_v11  ;;  %7670 = vmatprep.subr.bf16.mxu0 %v9578_v48  ;;  %v1939_v11 = vld [vmem:[#allocation8 + $0x1408] sm:$0xff]  ;;  %v9618_v53 = vcombine.high %v1938_v42, %v1942_v43 }
 0x245   :  { %7998 = vmatprep.subr.bf16.mxu1 %v9580_v49  ;;  %v1943_v48 = vld [vmem:[#allocation8 + $0x1428] sm:$0xff]  ;;  %v9609_v49 = vcombine.low %v1930_v9, %v1934_v26  ;;  %v10540_v2 = vpack.c.bf16 %v1274_v50, %v1274_v50  ;;  %v9642_v26 = vcombine.high %v1962_v21, %v1966_v22 }
 0x246   :  { %v9620_v54 = vcombine.high %v1939_v11, %v1943_v48  ;;  %v9619_v3 = vcombine.low %v1939_v11, %v1943_v48  ;;  %v1978_v11 = vld [vmem:[#allocation8 + $0x1540] sm:$0xff]  ;;  %v1983_v50 = vld [vmem:[#allocation8 + $0x1568] sm:$0xff] }
 0x247   :  { %7671 = vmatpush1.bf16.msra.mxu0 %v9577_v55  ;;  %v1946_v55 = vld [vmem:[#allocation8 + $0x1440] sm:$0xff] }
 0x248   :  { %7999 = vmatpush1.bf16.msra.mxu1 %v9579_v56  ;;  %7672 = vmatprep.subr.bf16.mxu0 %v9586_v59  ;;  %v1950_v56 = vld [vmem:[#allocation8 + $0x1460] sm:$0xff]  ;;  %v9617_v59 = vcombine.low %v1938_v42, %v1942_v43 }
 0x249   :  { %8000 = vmatprep.subr.bf16.mxu1 %v9588_v63  ;;  %v1947_v63 = vld [vmem:[#allocation8 + $0x1448] sm:$0xff]  ;;  %v9626_v5 = vcombine.high %v1946_v55, %v1950_v56  ;;  %v9625_v13 = vcombine.low %v1946_v55, %v1950_v56  ;;  %v1982_v48 = vld [vmem:[#allocation8 + $0x1560] sm:$0xff] }
 0x24a   :  { %v9628_v0 = vcombine.high %v1947_v63, %v1951_v18  ;;  %v9627_v62 = vcombine.low %v1947_v63, %v1951_v18  ;;  %v1986_v55 = vld [vmem:[#allocation8 + $0x1580] sm:$0xff]  ;;  %v1991_v63 = vld [vmem:[#allocation8 + $0x15a8] sm:$0xff]  ;;  %v9657_v18 = vcombine.low %v1978_v11, %v1982_v48 }
 0x24b   :  { %7673 = vmatpush1.bf16.msra.mxu0 %v9585_v7  ;;  %v1954_v7 = vld [vmem:[#allocation8 + $0x1480] sm:$0xff] }
 0x24c   :  { %8001 = vmatpush1.bf16.msra.mxu1 %v9587_v44  ;;  %7674 = vmatprep.subr.bf16.mxu0 %v9594_v8  ;;  %v1958_v44 = vld [vmem:[#allocation8 + $0x14a0] sm:$0xff]  ;;  %v10542_v8 = vpack.c.bf16 %v1277_v10, %v1277_v10 }
 0x24d   :  { %8002 = vmatprep.subr.bf16.mxu1 %v9596_v12  ;;  %v1955_v12 = vld [vmem:[#allocation8 + $0x1488] sm:$0xff]  ;;  %v9634_v15 = vcombine.high %v1954_v7, %v1958_v44  ;;  %v1990_v56 = vld [vmem:[#allocation8 + $0x15a0] sm:$0xff] }
 0x24e   :  { %v9635_v9 = vcombine.low %v1955_v12, %v1959_v39 }
 0x24f   :  { %7675 = vmatpush1.bf16.msra.mxu0 %v9593_v20  ;;  %v9636_v20 = vcombine.high %v1955_v12, %v1959_v39  ;;  %v1995_v12 = vld [vmem:[#allocation8 + $0x15c8] sm:$0xff] }
 0x250   :  { %8003 = vmatpush1.bf16.msra.mxu1 %v9595_v45  ;;  %7676 = vmatprep.subr.bf16.mxu0 %v9602_v24  ;;  %v1963_v45 = vld [vmem:[#allocation8 + $0x14c8] sm:$0xff] }
 0x251   :  { %8004 = vmatprep.subr.bf16.mxu1 %v9604_v25  ;;  %v1967_v24 = vld [vmem:[#allocation8 + $0x14e8] sm:$0xff]  ;;  %v9633_v25 = vcombine.low %v1954_v7, %v1958_v44  ;;  %v1994_v44 = vld [vmem:[#allocation8 + $0x15c0] sm:$0xff] }
 0x252   :  { %v9644_v28 = vcombine.high %v1963_v45, %v1967_v24  ;;  %v1999_v39 = vld [vmem:[#allocation8 + $0x15e8] sm:$0xff] }
 0x253   :  { %7677 = vmatpush1.bf16.msra.mxu0 %v9601_v57  ;;  %v1974_v57 = vld [vmem:[#allocation8 + $0x1520] sm:$0xff] }
 0x254   :  { %8005 = vmatpush1.bf16.msra.mxu1 %v9603_v32  ;;  %7678 = vmatprep.subr.bf16.mxu0 %v9610_v35  ;;  %v1975_v32 = vld [vmem:[#allocation8 + $0x1528] sm:$0xff]  ;;  %v9641_v35 = vcombine.low %v1962_v21, %v1966_v22  ;;  %v9650_v42 = vcombine.high %v1970_v29, %v1974_v57  ;;  %v2002_v21 = vld [vmem:[#allocation8 + $0x1600] sm:$0xff] }
 0x255   :  { %8006 = vmatprep.subr.bf16.mxu1 %v9612_v41  ;;  %v9643_v41 = vcombine.low %v1963_v45, %v1967_v24  ;;  %v9652_v43 = vcombine.high %v1971_v30, %v1975_v32  ;;  %v2006_v22 = vld [vmem:[#allocation8 + $0x1620] sm:$0xff]  ;;  %v2003_v45 = vld [vmem:[#allocation8 + $0x1608] sm:$0xff] }
 0x256   :  { %v2007_v24 = vld [vmem:[#allocation8 + $0x1628] sm:$0xff] }
 0x257   :  { %7679 = vmatpush1.bf16.msra.mxu0 %v9609_v49  ;;  %v1979_v49 = vld [vmem:[#allocation8 + $0x1548] sm:$0xff] }
 0x258   :  { %8007 = vmatpush1.bf16.msra.mxu1 %v9611_v52  ;;  %7689 = vmatprep.subr.bf16.mxu0 %v9618_v53  ;;  %v9649_v52 = vcombine.low %v1970_v29, %v1974_v57  ;;  %v9651_v53 = vcombine.low %v1971_v30, %v1975_v32  ;;  %v9660_v10 = vcombine.high %v1979_v49, %v1983_v50  ;;  %v2010_v29 = vld [vmem:[#allocation8 + $0x1640] sm:$0xff]  ;;  %v2011_v30 = vld [vmem:[#allocation8 + $0x1648] sm:$0xff] }
 0x259   :  { %8017 = vmatprep.subr.bf16.mxu1 %v9620_v54  ;;  %v9658_v54 = vcombine.high %v1978_v11, %v1982_v48  ;;  %v2014_v57 = vld [vmem:[#allocation8 + $0x1660] sm:$0xff]  ;;  %v2015_v32 = vld [vmem:[#allocation8 + $0x1668] sm:$0xff] }
 0x25a   :  { %7681 = vmatmul.mubr.bf16.vlgmr.msra.gmra.mrb[16].mxu0 %v10540_v2  ;;  %v2018_v11 = vld [vmem:[#allocation8 + $0x1680] sm:$0xff] }
 0x25b   :  { %8009 = vmatmul.mubr.bf16.vlgmr.msra.gmra.mrb[16].mxu1 %v10540_v2  ;;  %7690 = vmatpush1.bf16.msra.mxu0 %v9617_v59  ;;  %v1987_v59 = vld [vmem:[#allocation8 + $0x1588] sm:$0xff]  ;;  %v2022_v48 = vld [vmem:[#allocation8 + $0x16a0] sm:$0xff] }
 0x25c   :  { %7721 = vmatprep.mubr.bf16.mxu0 %v10542_v8  ;;  %8018 = vmatpush1.bf16.msra.mxu1 %v9619_v3  ;;  %v9659_v3 = vcombine.low %v1979_v49, %v1983_v50  ;;  %v9668_v7 = vcombine.high %v1987_v59, %v1991_v63  ;;  %v2019_v49 = vld [vmem:[#allocation8 + $0x1688] sm:$0xff] }
 0x25d   :  { %8049 = vmatprep.mubr.bf16.mxu1 %v10542_v8  ;;  %7691 = vmatprep.subr.bf16.mxu0 %v9626_v5  ;;  %v9666_v5 = vcombine.high %v1986_v55, %v1990_v56  ;;  %v2023_v50 = vld [vmem:[#allocation8 + $0x16a8] sm:$0xff] }
 0x25e   :  { %8019 = vmatprep.subr.bf16.mxu1 %v9628_v0  ;;  %v1998_v0 = vld [vmem:[#allocation8 + $0x15e0] sm:$0xff] }
 0x25f   :  { %7692 = vmatpush1.bf16.msra.mxu0 %v9625_v13  ;;  %v9665_v13 = vcombine.low %v1986_v55, %v1990_v56  ;;  %v2026_v55 = vld [vmem:[#allocation8 + $0x16c0] sm:$0xff] }
 0x260   :  { %8020 = vmatpush1.bf16.msra.mxu1 %v9627_v62  ;;  %7693 = vmatprep.subr.bf16.mxu0 %v9634_v15  ;;  %v9667_v62 = vcombine.low %v1987_v59, %v1991_v63  ;;  %v9674_v15 = vcombine.high %v1994_v44, %v1998_v0  ;;  %v2030_v56 = vld [vmem:[#allocation8 + $0x16e0] sm:$0xff]  ;;  %v2027_v59 = vld [vmem:[#allocation8 + $0x16c8] sm:$0xff] }
 0x261   :  { %8021 = vmatprep.subr.bf16.mxu1 %v9636_v20  ;;  %v9676_v20 = vcombine.high %v1995_v12, %v1999_v39  ;;  %v2031_v63 = vld [vmem:[#allocation8 + $0x16e8] sm:$0xff] }
 0x263   :  { %7694 = vmatpush1.bf16.msra.mxu0 %v9633_v25  ;;  %v9673_v25 = vcombine.low %v1994_v44, %v1998_v0  ;;  %v2034_v44 = vld [vmem:[#allocation8 + $0x1700] sm:$0xff] }
 0x264   :  { %8022 = vmatpush1.bf16.msra.mxu1 %v9635_v9  ;;  %7695 = vmatprep.subr.bf16.mxu0 %v9642_v26  ;;  %v9675_v9 = vcombine.low %v1995_v12, %v1999_v39  ;;  %v9682_v26 = vcombine.high %v2002_v21, %v2006_v22  ;;  %v2038_v0 = vld [vmem:[#allocation8 + $0x1720] sm:$0xff]  ;;  %v2035_v12 = vld [vmem:[#allocation8 + $0x1708] sm:$0xff] }
 0x265   :  { %8023 = vmatprep.subr.bf16.mxu1 %v9644_v28  ;;  %v9684_v28 = vcombine.high %v2003_v45, %v2007_v24  ;;  %v2039_v39 = vld [vmem:[#allocation8 + $0x1728] sm:$0xff] }
 0x267   :  { %7696 = vmatpush1.bf16.msra.mxu0 %v9641_v35  ;;  %v9681_v35 = vcombine.low %v2002_v21, %v2006_v22  ;;  %v2042_v21 = vld [vmem:[#allocation8 + $0x1740] sm:$0xff] }
 0x268   :  { %8024 = vmatpush1.bf16.msra.mxu1 %v9643_v41  ;;  %7697 = vmatprep.subr.bf16.mxu0 %v9650_v42  ;;  %v9683_v41 = vcombine.low %v2003_v45, %v2007_v24  ;;  %v9690_v42 = vcombine.high %v2010_v29, %v2014_v57  ;;  %v2046_v22 = vld [vmem:[#allocation8 + $0x1760] sm:$0xff]  ;;  %v2043_v45 = vld [vmem:[#allocation8 + $0x1748] sm:$0xff] }
 0x269   :  { %8025 = vmatprep.subr.bf16.mxu1 %v9652_v43  ;;  %v9692_v43 = vcombine.high %v2011_v30, %v2015_v32  ;;  %v2047_v24 = vld [vmem:[#allocation8 + $0x1768] sm:$0xff] }
 0x26b   :  { %7698 = vmatpush1.bf16.msra.mxu0 %v9649_v52  ;;  %v9689_v52 = vcombine.low %v2010_v29, %v2014_v57  ;;  %v2050_v29 = vld [vmem:[#allocation8 + $0x1780] sm:$0xff] }
 0x26c   :  { %8026 = vmatpush1.bf16.msra.mxu1 %v9651_v53  ;;  %7699 = vmatprep.subr.bf16.mxu0 %v9658_v54  ;;  %v9691_v53 = vcombine.low %v2011_v30, %v2015_v32  ;;  %v9698_v54 = vcombine.high %v2018_v11, %v2022_v48  ;;  %v2054_v57 = vld [vmem:[#allocation8 + $0x17a0] sm:$0xff]  ;;  %v2051_v30 = vld [vmem:[#allocation8 + $0x1788] sm:$0xff] }
 0x26d   :  { %8027 = vmatprep.subr.bf16.mxu1 %v9660_v10  ;;  %v9700_v10 = vcombine.high %v2019_v49, %v2023_v50  ;;  %v2055_v32 = vld [vmem:[#allocation8 + $0x17a8] sm:$0xff] }
 0x26f   :  { %7700 = vmatpush1.bf16.msra.mxu0 %v9657_v18  ;;  %v9697_v18 = vcombine.low %v2018_v11, %v2022_v48  ;;  %v2058_v11 = vld [vmem:[#allocation8 + $0x17c0] sm:$0xff] }
 0x270   :  { %8028 = vmatpush1.bf16.msra.mxu1 %v9659_v3  ;;  %7701 = vmatprep.subr.bf16.mxu0 %v9666_v5  ;;  %v9699_v3 = vcombine.low %v2019_v49, %v2023_v50  ;;  %v9706_v5 = vcombine.high %v2026_v55, %v2030_v56  ;;  %v2062_v48 = vld [vmem:[#allocation8 + $0x17e0] sm:$0xff]  ;;  %v2059_v49 = vld [vmem:[#allocation8 + $0x17c8] sm:$0xff] }
 0x271   :  { %8029 = vmatprep.subr.bf16.mxu1 %v9668_v7  ;;  %v9708_v7 = vcombine.high %v2027_v59, %v2031_v63  ;;  %v2063_v50 = vld [vmem:[#allocation8 + $0x17e8] sm:$0xff] }
 0x273   :  { %7702 = vmatpush1.bf16.msra.mxu0 %v9665_v13  ;;  %v9705_v13 = vcombine.low %v2026_v55, %v2030_v56  ;;  %v2066_v55 = vld [vmem:[#allocation8 + $0x1800] sm:$0xff] }
 0x274   :  { %8030 = vmatpush1.bf16.msra.mxu1 %v9667_v62  ;;  %7703 = vmatprep.subr.bf16.mxu0 %v9674_v15  ;;  %v9707_v62 = vcombine.low %v2027_v59, %v2031_v63  ;;  %v9714_v15 = vcombine.high %v2034_v44, %v2038_v0  ;;  %v2070_v56 = vld [vmem:[#allocation8 + $0x1820] sm:$0xff]  ;;  %v2067_v59 = vld [vmem:[#allocation8 + $0x1808] sm:$0xff] }
 0x275   :  { %8031 = vmatprep.subr.bf16.mxu1 %v9676_v20  ;;  %v9716_v20 = vcombine.high %v2035_v12, %v2039_v39  ;;  %v2071_v63 = vld [vmem:[#allocation8 + $0x1828] sm:$0xff] }
 0x277   :  { %7704 = vmatpush1.bf16.msra.mxu0 %v9673_v25  ;;  %v9713_v25 = vcombine.low %v2034_v44, %v2038_v0  ;;  %v9748_v44 = vcombine.high %v2067_v59, %v2071_v63  ;;  %v1279_v0 = vmax.f32 %v10500_v4, 0.0 }
 0x278   :  { %8032 = vmatpush1.bf16.msra.mxu1 %v9675_v9  ;;  %7705 = vmatprep.subr.bf16.mxu0 %v9682_v26  ;;  %v9715_v9 = vcombine.low %v2035_v12, %v2039_v39  ;;  %v9722_v26 = vcombine.high %v2042_v21, %v2046_v22  ;;  %v2074_v12 = vld [vmem:[#allocation8 + $0x1840] sm:$0xff] }
 0x279   :  { %8033 = vmatprep.subr.bf16.mxu1 %v9684_v28  ;;  %v9724_v28 = vcombine.high %v2043_v45, %v2047_v24  ;;  %v2078_v39 = vld [vmem:[#allocation8 + $0x1860] sm:$0xff] }
 0x27b   :  { %7706 = vmatpush1.bf16.msra.mxu0 %v9681_v35  ;;  %v9721_v35 = vcombine.low %v2042_v21, %v2046_v22  ;;  %v9747_v21 = vcombine.low %v2067_v59, %v2071_v63  ;;  %v2082_v22 = vld [vmem:[#allocation8 + $0x1880] sm:$0xff] }
 0x27c   :  { %8034 = vmatpush1.bf16.msra.mxu1 %v9683_v41  ;;  %7707 = vmatprep.subr.bf16.mxu0 %v9690_v42  ;;  %v9723_v41 = vcombine.low %v2043_v45, %v2047_v24  ;;  %v9730_v42 = vcombine.high %v2050_v29, %v2054_v57  ;;  %v2086_v45 = vld [vmem:[#allocation8 + $0x18a0] sm:$0xff]  ;;  %v10552_v24 = vpack.c.bf16 %v1279_v0, %v1279_v0 }
 0x27d   :  { %8035 = vmatprep.subr.bf16.mxu1 %v9692_v43  ;;  %v9732_v43 = vcombine.high %v2051_v30, %v2055_v32  ;;  %v2106_v59 = vld [vmem:[#allocation8 + $0x1940] sm:$0xff] }
 0x27e   :  { %v2110_v63 = vld [vmem:[#allocation8 + $0x1960] sm:$0xff] }
 0x27f   :  { %7708 = vmatpush1.bf16.msra.mxu0 %v9689_v52  ;;  %v9729_v52 = vcombine.low %v2050_v29, %v2054_v57  ;;  %v9762_v29 = vcombine.high %v2082_v22, %v2086_v45 }
 0x280   :  { %8036 = vmatpush1.bf16.msra.mxu1 %v9691_v53  ;;  %7709 = vmatprep.subr.bf16.mxu0 %v9698_v54  ;;  %v9731_v53 = vcombine.low %v2051_v30, %v2055_v32  ;;  %v9738_v54 = vcombine.high %v2058_v11, %v2062_v48  ;;  %v2090_v30 = vld [vmem:[#allocation8 + $0x18c0] sm:$0xff] }
 0x281   :  { %8037 = vmatprep.subr.bf16.mxu1 %v9700_v10  ;;  %v9740_v10 = vcombine.high %v2059_v49, %v2063_v50  ;;  %v2094_v32 = vld [vmem:[#allocation8 + $0x18e0] sm:$0xff] }
 0x283   :  { %7710 = vmatpush1.bf16.msra.mxu0 %v9697_v18  ;;  %v9737_v18 = vcombine.low %v2058_v11, %v2062_v48  ;;  %v9770_v11 = vcombine.high %v2090_v30, %v2094_v32 }
 0x284   :  { %8038 = vmatpush1.bf16.msra.mxu1 %v9699_v3  ;;  %7711 = vmatprep.subr.bf16.mxu0 %v9706_v5  ;;  %v1276_v3 = vmax.f32 %v10475_v37, 0.0  ;;  %v9739_v5 = vcombine.low %v2059_v49, %v2063_v50  ;;  %v9754_v37 = vcombine.high %v2074_v12, %v2078_v39  ;;  %v2098_v49 = vld [vmem:[#allocation8 + $0x1900] sm:$0xff] }
 0x285   :  { %8039 = vmatprep.subr.bf16.mxu1 %v9708_v7  ;;  %v9746_v7 = vcombine.high %v2066_v55, %v2070_v56  ;;  %v2102_v50 = vld [vmem:[#allocation8 + $0x1920] sm:$0xff] }
 0x287   :  { %7712 = vmatpush1.bf16.msra.mxu0 %v9705_v13  ;;  %v9745_v13 = vcombine.low %v2066_v55, %v2070_v56  ;;  %v9778_v55 = vcombine.high %v2098_v49, %v2102_v50 }
 0x288   :  { %8040 = vmatpush1.bf16.msra.mxu1 %v9707_v62  ;;  %7713 = vmatprep.subr.bf16.mxu0 %v9714_v15  ;;  %v2075_v62 = vld [vmem:[#allocation8 + $0x1848] sm:$0xff] }
 0x289   :  { %8041 = vmatprep.subr.bf16.mxu1 %v9716_v20  ;;  %v2079_v15 = vld [vmem:[#allocation8 + $0x1868] sm:$0xff]  ;;  %v10550_v20 = vpack.c.bf16 %v1276_v3, %v1276_v3 }
 0x28a   :  { %v9756_v4 = vcombine.high %v2075_v62, %v2079_v15  ;;  %v2111_v3 = vld [vmem:[#allocation8 + $0x1968] sm:$0xff] }
 0x28b   :  { %7714 = vmatpush1.bf16.msra.mxu0 %v9713_v25  ;;  %v2083_v25 = vld [vmem:[#allocation8 + $0x1888] sm:$0xff] }
 0x28c   :  { %8042 = vmatpush1.bf16.msra.mxu1 %v9715_v9  ;;  %7715 = vmatprep.subr.bf16.mxu0 %v9722_v26  ;;  %v2087_v9 = vld [vmem:[#allocation8 + $0x18a8] sm:$0xff]  ;;  %v9753_v26 = vcombine.low %v2074_v12, %v2078_v39  ;;  %v2114_v12 = vld [vmem:[#allocation8 + $0x1980] sm:$0xff] }
 0x28d   :  { %8043 = vmatprep.subr.bf16.mxu1 %v9724_v28  ;;  %v9755_v28 = vcombine.low %v2075_v62, %v2079_v15  ;;  %v9764_v57 = vcombine.high %v2083_v25, %v2087_v9  ;;  %v2118_v39 = vld [vmem:[#allocation8 + $0x19a0] sm:$0xff]  ;;  %v2119_v62 = vld [vmem:[#allocation8 + $0x19a8] sm:$0xff]  ;;  %v9785_v15 = vcombine.low %v2106_v59, %v2110_v63 }
 0x28f   :  { %7716 = vmatpush1.bf16.msra.mxu0 %v9721_v35  ;;  %v2091_v35 = vld [vmem:[#allocation8 + $0x18c8] sm:$0xff] }
 0x290   :  { %8044 = vmatpush1.bf16.msra.mxu1 %v9723_v41  ;;  %7717 = vmatprep.subr.bf16.mxu0 %v9730_v42  ;;  %v2095_v41 = vld [vmem:[#allocation8 + $0x18e8] sm:$0xff]  ;;  %v9761_v42 = vcombine.low %v2082_v22, %v2086_v45  ;;  %v2122_v45 = vld [vmem:[#allocation8 + $0x19c0] sm:$0xff] }
 0x291   :  { %8045 = vmatprep.subr.bf16.mxu1 %v9732_v43  ;;  %v9763_v43 = vcombine.low %v2083_v25, %v2087_v9  ;;  %v9772_v48 = vcombine.high %v2091_v35, %v2095_v41  ;;  %v2123_v25 = vld [vmem:[#allocation8 + $0x19c8] sm:$0xff] }
 0x292   :  { %v2127_v9 = vld [vmem:[#allocation8 + $0x19e8] sm:$0xff] }
 0x293   :  { %7718 = vmatpush1.bf16.msra.mxu0 %v9729_v52  ;;  %v2099_v52 = vld [vmem:[#allocation8 + $0x1908] sm:$0xff] }
 0x294   :  { %8046 = vmatpush1.bf16.msra.mxu1 %v9731_v53  ;;  %7719 = vmatprep.subr.bf16.mxu0 %v9738_v54  ;;  %v2103_v53 = vld [vmem:[#allocation8 + $0x1928] sm:$0xff]  ;;  %v9769_v54 = vcombine.low %v2090_v30, %v2094_v32  ;;  %v2130_v30 = vld [vmem:[#allocation8 + $0x1a00] sm:$0xff] }
 0x295   :  { %8047 = vmatprep.subr.bf16.mxu1 %v9740_v10  ;;  %v9771_v10 = vcombine.low %v2091_v35, %v2095_v41  ;;  %v9780_v56 = vcombine.high %v2099_v52, %v2103_v53  ;;  %v2134_v32 = vld [vmem:[#allocation8 + $0x1a20] sm:$0xff]  ;;  %v2131_v35 = vld [vmem:[#allocation8 + $0x1a08] sm:$0xff] }
 0x296   :  { %v2135_v41 = vld [vmem:[#allocation8 + $0x1a28] sm:$0xff] }
 0x297   :  { %7720 = vmatpush1.bf16.msra.mxu0 %v9737_v18  ;;  %v2107_v18 = vld [vmem:[#allocation8 + $0x1948] sm:$0xff] }
 0x298   :  { %8048 = vmatpush1.bf16.msra.mxu1 %v9739_v5  ;;  %7730 = vmatprep.subr.bf16.mxu0 %v9746_v7  ;;  %v9777_v5 = vcombine.low %v2098_v49, %v2102_v50  ;;  %v9779_v7 = vcombine.low %v2099_v52, %v2103_v53  ;;  %v9788_v0 = vcombine.high %v2107_v18, %v2111_v3  ;;  %v2138_v49 = vld [vmem:[#allocation8 + $0x1a40] sm:$0xff]  ;;  %v2139_v52 = vld [vmem:[#allocation8 + $0x1a48] sm:$0xff] }
 0x299   :  { %8058 = vmatprep.subr.bf16.mxu1 %v9748_v44  ;;  %v9786_v44 = vcombine.high %v2106_v59, %v2110_v63  ;;  %v2142_v50 = vld [vmem:[#allocation8 + $0x1a60] sm:$0xff]  ;;  %v2143_v53 = vld [vmem:[#allocation8 + $0x1a68] sm:$0xff] }
 0x29a   :  { %7722 = vmatmul.mubr.bf16.vlgmr.msra.gmra.mrb[16].mxu0 %v10550_v20  ;;  %v2146_v59 = vld [vmem:[#allocation8 + $0x1a80] sm:$0xff] }
 0x29b   :  { %8050 = vmatmul.mubr.bf16.vlgmr.msra.gmra.mrb[16].mxu1 %v10550_v20  ;;  %7731 = vmatpush1.bf16.msra.mxu0 %v9745_v13  ;;  %v2115_v13 = vld [vmem:[#allocation8 + $0x1988] sm:$0xff]  ;;  %v2150_v63 = vld [vmem:[#allocation8 + $0x1aa0] sm:$0xff] }
 0x29c   :  { %7762 = vmatprep.mubr.bf16.mxu0 %v10552_v24  ;;  %8059 = vmatpush1.bf16.msra.mxu1 %v9747_v21  ;;  %v9787_v21 = vcombine.low %v2107_v18, %v2111_v3  ;;  %v9796_v22 = vcombine.high %v2115_v13, %v2119_v62  ;;  %v2147_v18 = vld [vmem:[#allocation8 + $0x1a88] sm:$0xff] }
 0x29d   :  { %8090 = vmatprep.mubr.bf16.mxu1 %v10552_v24  ;;  %7732 = vmatprep.subr.bf16.mxu0 %v9754_v37  ;;  %v9794_v37 = vcombine.high %v2114_v12, %v2118_v39  ;;  %v2151_v3 = vld [vmem:[#allocation8 + $0x1aa8] sm:$0xff] }
 0x29e   :  { %8060 = vmatprep.subr.bf16.mxu1 %v9756_v4  ;;  %v2126_v4 = vld [vmem:[#allocation8 + $0x19e0] sm:$0xff] }
 0x29f   :  { %7733 = vmatpush1.bf16.msra.mxu0 %v9753_v26  ;;  %v9793_v26 = vcombine.low %v2114_v12, %v2118_v39  ;;  %v2154_v12 = vld [vmem:[#allocation8 + $0x1ac0] sm:$0xff] }
 0x2a0   :  { %8061 = vmatpush1.bf16.msra.mxu1 %v9755_v28  ;;  %7734 = vmatprep.subr.bf16.mxu0 %v9762_v29  ;;  %v9795_v28 = vcombine.low %v2115_v13, %v2119_v62  ;;  %v9802_v29 = vcombine.high %v2122_v45, %v2126_v4  ;;  %v2158_v39 = vld [vmem:[#allocation8 + $0x1ae0] sm:$0xff]  ;;  %v2155_v13 = vld [vmem:[#allocation8 + $0x1ac8] sm:$0xff] }
 0x2a1   :  { %8062 = vmatprep.subr.bf16.mxu1 %v9764_v57  ;;  %v9804_v57 = vcombine.high %v2123_v25, %v2127_v9  ;;  %v2159_v62 = vld [vmem:[#allocation8 + $0x1ae8] sm:$0xff] }
 0x2a3   :  { %7735 = vmatpush1.bf16.msra.mxu0 %v9761_v42  ;;  %v9801_v42 = vcombine.low %v2122_v45, %v2126_v4  ;;  %v2162_v45 = vld [vmem:[#allocation8 + $0x1b00] sm:$0xff] }
 0x2a4   :  { %8063 = vmatpush1.bf16.msra.mxu1 %v9763_v43  ;;  %7736 = vmatprep.subr.bf16.mxu0 %v9770_v11  ;;  %v9803_v43 = vcombine.low %v2123_v25, %v2127_v9  ;;  %v9810_v11 = vcombine.high %v2130_v30, %v2134_v32  ;;  %v2166_v4 = vld [vmem:[#allocation8 + $0x1b20] sm:$0xff]  ;;  %v2163_v25 = vld [vmem:[#allocation8 + $0x1b08] sm:$0xff] }
 0x2a5   :  { %8064 = vmatprep.subr.bf16.mxu1 %v9772_v48  ;;  %v9812_v48 = vcombine.high %v2131_v35, %v2135_v41  ;;  %v2167_v9 = vld [vmem:[#allocation8 + $0x1b28] sm:$0xff] }
 0x2a7   :  { %7737 = vmatpush1.bf16.msra.mxu0 %v9769_v54  ;;  %v9809_v54 = vcombine.low %v2130_v30, %v2134_v32  ;;  %v2170_v30 = vld [vmem:[#allocation8 + $0x1b40] sm:$0xff] }
 0x2a8   :  { %8065 = vmatpush1.bf16.msra.mxu1 %v9771_v10  ;;  %7738 = vmatprep.subr.bf16.mxu0 %v9778_v55  ;;  %v9811_v10 = vcombine.low %v2131_v35, %v2135_v41  ;;  %v9818_v55 = vcombine.high %v2138_v49, %v2142_v50  ;;  %v2174_v32 = vld [vmem:[#allocation8 + $0x1b60] sm:$0xff]  ;;  %v2171_v35 = vld [vmem:[#allocation8 + $0x1b48] sm:$0xff] }
 0x2a9   :  { %8066 = vmatprep.subr.bf16.mxu1 %v9780_v56  ;;  %v9820_v56 = vcombine.high %v2139_v52, %v2143_v53  ;;  %v2175_v41 = vld [vmem:[#allocation8 + $0x1b68] sm:$0xff] }
 0x2ab   :  { %7739 = vmatpush1.bf16.msra.mxu0 %v9777_v5  ;;  %v9817_v5 = vcombine.low %v2138_v49, %v2142_v50  ;;  %v2178_v49 = vld [vmem:[#allocation8 + $0x1b80] sm:$0xff] }
 0x2ac   :  { %8067 = vmatpush1.bf16.msra.mxu1 %v9779_v7  ;;  %7740 = vmatprep.subr.bf16.mxu0 %v9786_v44  ;;  %v9819_v7 = vcombine.low %v2139_v52, %v2143_v53  ;;  %v9826_v44 = vcombine.high %v2146_v59, %v2150_v63  ;;  %v2182_v50 = vld [vmem:[#allocation8 + $0x1ba0] sm:$0xff]  ;;  %v2179_v52 = vld [vmem:[#allocation8 + $0x1b88] sm:$0xff] }
 0x2ad   :  { %8068 = vmatprep.subr.bf16.mxu1 %v9788_v0  ;;  %v9828_v0 = vcombine.high %v2147_v18, %v2151_v3  ;;  %v2183_v53 = vld [vmem:[#allocation8 + $0x1ba8] sm:$0xff] }
 0x2af   :  { %7741 = vmatpush1.bf16.msra.mxu0 %v9785_v15  ;;  %v9825_v15 = vcombine.low %v2146_v59, %v2150_v63  ;;  %v2186_v59 = vld [vmem:[#allocation8 + $0x1bc0] sm:$0xff] }
 0x2b0   :  { %8069 = vmatpush1.bf16.msra.mxu1 %v9787_v21  ;;  %7742 = vmatprep.subr.bf16.mxu0 %v9794_v37  ;;  %v9827_v21 = vcombine.low %v2147_v18, %v2151_v3  ;;  %v9834_v37 = vcombine.high %v2154_v12, %v2158_v39  ;;  %v2190_v63 = vld [vmem:[#allocation8 + $0x1be0] sm:$0xff]  ;;  %v2187_v18 = vld [vmem:[#allocation8 + $0x1bc8] sm:$0xff] }
 0x2b1   :  { %8070 = vmatprep.subr.bf16.mxu1 %v9796_v22  ;;  %v9836_v22 = vcombine.high %v2155_v13, %v2159_v62  ;;  %v2191_v3 = vld [vmem:[#allocation8 + $0x1be8] sm:$0xff] }
 0x2b3   :  { %7743 = vmatpush1.bf16.msra.mxu0 %v9793_v26  ;;  %v9833_v26 = vcombine.low %v2154_v12, %v2158_v39  ;;  %v2194_v12 = vld [vmem:[#allocation8 + $0x1c00] sm:$0xff] }
 0x2b4   :  { %8071 = vmatpush1.bf16.msra.mxu1 %v9795_v28  ;;  %7744 = vmatprep.subr.bf16.mxu0 %v9802_v29  ;;  %v9835_v28 = vcombine.low %v2155_v13, %v2159_v62  ;;  %v9842_v29 = vcombine.high %v2162_v45, %v2166_v4  ;;  %v2198_v39 = vld [vmem:[#allocation8 + $0x1c20] sm:$0xff]  ;;  %v2195_v13 = vld [vmem:[#allocation8 + $0x1c08] sm:$0xff] }
 0x2b5   :  { %8072 = vmatprep.subr.bf16.mxu1 %v9804_v57  ;;  %v9844_v57 = vcombine.high %v2163_v25, %v2167_v9  ;;  %v2199_v62 = vld [vmem:[#allocation8 + $0x1c28] sm:$0xff] }
 0x2b7   :  { %7745 = vmatpush1.bf16.msra.mxu0 %v9801_v42  ;;  %v9841_v42 = vcombine.low %v2162_v45, %v2166_v4  ;;  %v9876_v45 = vcombine.high %v2195_v13, %v2199_v62  ;;  %v1281_v4 = vmax.f32 %v10508_v34, 0.0 }
 0x2b8   :  { %8073 = vmatpush1.bf16.msra.mxu1 %v9803_v43  ;;  %7746 = vmatprep.subr.bf16.mxu0 %v9810_v11  ;;  %v9843_v43 = vcombine.low %v2163_v25, %v2167_v9  ;;  %v9850_v11 = vcombine.high %v2170_v30, %v2174_v32  ;;  %v2202_v25 = vld [vmem:[#allocation8 + $0x1c40] sm:$0xff] }
 0x2b9   :  { %8074 = vmatprep.subr.bf16.mxu1 %v9812_v48  ;;  %v9852_v48 = vcombine.high %v2171_v35, %v2175_v41  ;;  %v2206_v9 = vld [vmem:[#allocation8 + $0x1c60] sm:$0xff] }
 0x2bb   :  { %7747 = vmatpush1.bf16.msra.mxu0 %v9809_v54  ;;  %v9849_v54 = vcombine.low %v2170_v30, %v2174_v32  ;;  %v9875_v30 = vcombine.low %v2195_v13, %v2199_v62  ;;  %v2210_v32 = vld [vmem:[#allocation8 + $0x1c80] sm:$0xff] }
 0x2bc   :  { %8075 = vmatpush1.bf16.msra.mxu1 %v9811_v10  ;;  %7748 = vmatprep.subr.bf16.mxu0 %v9818_v55  ;;  %v9851_v10 = vcombine.low %v2171_v35, %v2175_v41  ;;  %v9858_v55 = vcombine.high %v2178_v49, %v2182_v50  ;;  %v2214_v35 = vld [vmem:[#allocation8 + $0x1ca0] sm:$0xff]  ;;  %v10562_v41 = vpack.c.bf16 %v1281_v4, %v1281_v4 }
 0x2bd   :  { %8076 = vmatprep.subr.bf16.mxu1 %v9820_v56  ;;  %v9860_v56 = vcombine.high %v2179_v52, %v2183_v53  ;;  %v2234_v13 = vld [vmem:[#allocation8 + $0x1d40] sm:$0xff] }
 0x2be   :  { %v2238_v62 = vld [vmem:[#allocation8 + $0x1d60] sm:$0xff] }
 0x2bf   :  { %7749 = vmatpush1.bf16.msra.mxu0 %v9817_v5  ;;  %v9857_v5 = vcombine.low %v2178_v49, %v2182_v50  ;;  %v9890_v49 = vcombine.high %v2210_v32, %v2214_v35 }
 0x2c0   :  { %8077 = vmatpush1.bf16.msra.mxu1 %v9819_v7  ;;  %7750 = vmatprep.subr.bf16.mxu0 %v9826_v44  ;;  %v9859_v7 = vcombine.low %v2179_v52, %v2183_v53  ;;  %v9866_v44 = vcombine.high %v2186_v59, %v2190_v63  ;;  %v2218_v52 = vld [vmem:[#allocation8 + $0x1cc0] sm:$0xff] }
 0x2c1   :  { %8078 = vmatprep.subr.bf16.mxu1 %v9828_v0  ;;  %v9868_v0 = vcombine.high %v2187_v18, %v2191_v3  ;;  %v2222_v53 = vld [vmem:[#allocation8 + $0x1ce0] sm:$0xff] }
 0x2c3   :  { %7751 = vmatpush1.bf16.msra.mxu0 %v9825_v15  ;;  %v9865_v15 = vcombine.low %v2186_v59, %v2190_v63  ;;  %v9898_v59 = vcombine.high %v2218_v52, %v2222_v53 }
 0x2c4   :  { %8079 = vmatpush1.bf16.msra.mxu1 %v9827_v21  ;;  %7752 = vmatprep.subr.bf16.mxu0 %v9834_v37  ;;  %v1278_v21 = vmax.f32 %v10495_v61, 0.0  ;;  %v9867_v37 = vcombine.low %v2187_v18, %v2191_v3  ;;  %v9882_v61 = vcombine.high %v2202_v25, %v2206_v9  ;;  %v2226_v18 = vld [vmem:[#allocation8 + $0x1d00] sm:$0xff] }
 0x2c5   :  { %8080 = vmatprep.subr.bf16.mxu1 %v9836_v22  ;;  %v9874_v22 = vcombine.high %v2194_v12, %v2198_v39  ;;  %v2230_v3 = vld [vmem:[#allocation8 + $0x1d20] sm:$0xff] }
 0x2c7   :  { %7753 = vmatpush1.bf16.msra.mxu0 %v9833_v26  ;;  %v9873_v26 = vcombine.low %v2194_v12, %v2198_v39  ;;  %v9906_v12 = vcombine.high %v2226_v18, %v2230_v3 }
 0x2c8   :  { %8081 = vmatpush1.bf16.msra.mxu1 %v9835_v28  ;;  %7754 = vmatprep.subr.bf16.mxu0 %v9842_v29  ;;  %v2203_v28 = vld [vmem:[#allocation8 + $0x1c48] sm:$0xff] }
 0x2c9   :  { %8082 = vmatprep.subr.bf16.mxu1 %v9844_v57  ;;  %v2207_v29 = vld [vmem:[#allocation8 + $0x1c68] sm:$0xff]  ;;  %v10560_v57 = vpack.c.bf16 %v1278_v21, %v1278_v21 }
 0x2ca   :  { %v9884_v34 = vcombine.high %v2203_v28, %v2207_v29  ;;  %v2239_v21 = vld [vmem:[#allocation8 + $0x1d68] sm:$0xff] }
 0x2cb   :  { %7755 = vmatpush1.bf16.msra.mxu0 %v9841_v42  ;;  %v2211_v42 = vld [vmem:[#allocation8 + $0x1c88] sm:$0xff] }
 0x2cc   :  { %8083 = vmatpush1.bf16.msra.mxu1 %v9843_v43  ;;  %7756 = vmatprep.subr.bf16.mxu0 %v9850_v11  ;;  %v2215_v43 = vld [vmem:[#allocation8 + $0x1ca8] sm:$0xff]  ;;  %v9881_v11 = vcombine.low %v2202_v25, %v2206_v9  ;;  %v2242_v25 = vld [vmem:[#allocation8 + $0x1d80] sm:$0xff] }
 0x2cd   :  { %8084 = vmatprep.subr.bf16.mxu1 %v9852_v48  ;;  %v9883_v48 = vcombine.low %v2203_v28, %v2207_v29  ;;  %v9892_v50 = vcombine.high %v2211_v42, %v2215_v43  ;;  %v2246_v9 = vld [vmem:[#allocation8 + $0x1da0] sm:$0xff]  ;;  %v2247_v28 = vld [vmem:[#allocation8 + $0x1da8] sm:$0xff]  ;;  %v9913_v29 = vcombine.low %v2234_v13, %v2238_v62 }
 0x2cf   :  { %7757 = vmatpush1.bf16.msra.mxu0 %v9849_v54  ;;  %v2219_v54 = vld [vmem:[#allocation8 + $0x1cc8] sm:$0xff] }
 0x2d0   :  { %8085 = vmatpush1.bf16.msra.mxu1 %v9851_v10  ;;  %7758 = vmatprep.subr.bf16.mxu0 %v9858_v55  ;;  %v2223_v10 = vld [vmem:[#allocation8 + $0x1ce8] sm:$0xff]  ;;  %v9889_v55 = vcombine.low %v2210_v32, %v2214_v35  ;;  %v2250_v35 = vld [vmem:[#allocation8 + $0x1dc0] sm:$0xff] }
 0x2d1   :  { %8086 = vmatprep.subr.bf16.mxu1 %v9860_v56  ;;  %v9891_v56 = vcombine.low %v2211_v42, %v2215_v43  ;;  %v9900_v63 = vcombine.high %v2219_v54, %v2223_v10  ;;  %v2251_v42 = vld [vmem:[#allocation8 + $0x1dc8] sm:$0xff] }
 0x2d2   :  { %v2255_v43 = vld [vmem:[#allocation8 + $0x1de8] sm:$0xff] }
 0x2d3   :  { %7759 = vmatpush1.bf16.msra.mxu0 %v9857_v5  ;;  %v2227_v5 = vld [vmem:[#allocation8 + $0x1d08] sm:$0xff] }
 0x2d4   :  { %8087 = vmatpush1.bf16.msra.mxu1 %v9859_v7  ;;  %7760 = vmatprep.subr.bf16.mxu0 %v9866_v44  ;;  %v2231_v7 = vld [vmem:[#allocation8 + $0x1d28] sm:$0xff]  ;;  %v9897_v44 = vcombine.low %v2218_v52, %v2222_v53  ;;  %v2258_v52 = vld [vmem:[#allocation8 + $0x1e00] sm:$0xff] }
 0x2d5   :  { %8088 = vmatprep.subr.bf16.mxu1 %v9868_v0  ;;  %v9899_v0 = vcombine.low %v2219_v54, %v2223_v10  ;;  %v9908_v39 = vcombine.high %v2227_v5, %v2231_v7  ;;  %v2262_v53 = vld [vmem:[#allocation8 + $0x1e20] sm:$0xff]  ;;  %v2259_v54 = vld [vmem:[#allocation8 + $0x1e08] sm:$0xff] }
 0x2d6   :  { %v2263_v10 = vld [vmem:[#allocation8 + $0x1e28] sm:$0xff] }
 0x2d7   :  { %7761 = vmatpush1.bf16.msra.mxu0 %v9865_v15  ;;  %v2235_v15 = vld [vmem:[#allocation8 + $0x1d48] sm:$0xff] }
 0x2d8   :  { %8089 = vmatpush1.bf16.msra.mxu1 %v9867_v37  ;;  %7771 = vmatprep.subr.bf16.mxu0 %v9874_v22  ;;  %v9905_v37 = vcombine.low %v2226_v18, %v2230_v3  ;;  %v9907_v22 = vcombine.low %v2227_v5, %v2231_v7  ;;  %v9916_v4 = vcombine.high %v2235_v15, %v2239_v21  ;;  %v2266_v18 = vld [vmem:[#allocation8 + $0x1e40] sm:$0xff]  ;;  %v2267_v5 = vld [vmem:[#allocation8 + $0x1e48] sm:$0xff] }
 0x2d9   :  { %8099 = vmatprep.subr.bf16.mxu1 %v9876_v45  ;;  %v9914_v45 = vcombine.high %v2234_v13, %v2238_v62  ;;  %v2270_v3 = vld [vmem:[#allocation8 + $0x1e60] sm:$0xff]  ;;  %v2271_v7 = vld [vmem:[#allocation8 + $0x1e68] sm:$0xff] }
 0x2da   :  { %7763 = vmatmul.mubr.bf16.vlgmr.msra.gmra.mrb[16].mxu0 %v10560_v57  ;;  %v2274_v13 = vld [vmem:[#allocation8 + $0x1e80] sm:$0xff] }
 0x2db   :  { %8091 = vmatmul.mubr.bf16.vlgmr.msra.gmra.mrb[16].mxu1 %v10560_v57  ;;  %7772 = vmatpush1.bf16.msra.mxu0 %v9873_v26  ;;  %v2243_v26 = vld [vmem:[#allocation8 + $0x1d88] sm:$0xff]  ;;  %v2278_v62 = vld [vmem:[#allocation8 + $0x1ea0] sm:$0xff] }
 0x2dc   :  { %7803 = vmatprep.mubr.bf16.mxu0 %v10562_v41  ;;  %8100 = vmatpush1.bf16.msra.mxu1 %v9875_v30  ;;  %v9915_v30 = vcombine.low %v2235_v15, %v2239_v21  ;;  %v9924_v32 = vcombine.high %v2243_v26, %v2247_v28  ;;  %v2275_v15 = vld [vmem:[#allocation8 + $0x1e88] sm:$0xff] }
 0x2dd   :  { %8131 = vmatprep.mubr.bf16.mxu1 %v10562_v41  ;;  %7773 = vmatprep.subr.bf16.mxu0 %v9882_v61  ;;  %v9922_v61 = vcombine.high %v2242_v25, %v2246_v9  ;;  %v2279_v21 = vld [vmem:[#allocation8 + $0x1ea8] sm:$0xff] }
 0x2de   :  { %8101 = vmatprep.subr.bf16.mxu1 %v9884_v34  ;;  %v2254_v34 = vld [vmem:[#allocation8 + $0x1de0] sm:$0xff] }
 0x2df   :  { %7774 = vmatpush1.bf16.msra.mxu0 %v9881_v11  ;;  %v9921_v11 = vcombine.low %v2242_v25, %v2246_v9  ;;  %v2282_v25 = vld [vmem:[#allocation8 + $0x1ec0] sm:$0xff] }
 0x2e0   :  { %8102 = vmatpush1.bf16.msra.mxu1 %v9883_v48  ;;  %7775 = vmatprep.subr.bf16.mxu0 %v9890_v49  ;;  %v9923_v48 = vcombine.low %v2243_v26, %v2247_v28  ;;  %v9930_v49 = vcombine.high %v2250_v35, %v2254_v34  ;;  %v2286_v9 = vld [vmem:[#allocation8 + $0x1ee0] sm:$0xff]  ;;  %v2283_v26 = vld [vmem:[#allocation8 + $0x1ec8] sm:$0xff] }
 0x2e1   :  { %8103 = vmatprep.subr.bf16.mxu1 %v9892_v50  ;;  %v9932_v50 = vcombine.high %v2251_v42, %v2255_v43  ;;  %v2287_v28 = vld [vmem:[#allocation8 + $0x1ee8] sm:$0xff] }
 0x2e3   :  { %7776 = vmatpush1.bf16.msra.mxu0 %v9889_v55  ;;  %v9929_v55 = vcombine.low %v2250_v35, %v2254_v34  ;;  %v2290_v35 = vld [vmem:[#allocation8 + $0x1f00] sm:$0xff] }
 0x2e4   :  { %8104 = vmatpush1.bf16.msra.mxu1 %v9891_v56  ;;  %7777 = vmatprep.subr.bf16.mxu0 %v9898_v59  ;;  %v9931_v56 = vcombine.low %v2251_v42, %v2255_v43  ;;  %v9938_v59 = vcombine.high %v2258_v52, %v2262_v53  ;;  %v2294_v34 = vld [vmem:[#allocation8 + $0x1f20] sm:$0xff]  ;;  %v2291_v42 = vld [vmem:[#allocation8 + $0x1f08] sm:$0xff] }
 0x2e5   :  { %8105 = vmatprep.subr.bf16.mxu1 %v9900_v63  ;;  %v9940_v63 = vcombine.high %v2259_v54, %v2263_v10  ;;  %v2295_v43 = vld [vmem:[#allocation8 + $0x1f28] sm:$0xff] }
 0x2e7   :  { %7778 = vmatpush1.bf16.msra.mxu0 %v9897_v44  ;;  %v9937_v44 = vcombine.low %v2258_v52, %v2262_v53  ;;  %v2298_v52 = vld [vmem:[#allocation8 + $0x1f40] sm:$0xff] }
 0x2e8   :  { %8106 = vmatpush1.bf16.msra.mxu1 %v9899_v0  ;;  %7779 = vmatprep.subr.bf16.mxu0 %v9906_v12  ;;  %v9939_v0 = vcombine.low %v2259_v54, %v2263_v10  ;;  %v9946_v12 = vcombine.high %v2266_v18, %v2270_v3  ;;  %v2302_v53 = vld [vmem:[#allocation8 + $0x1f60] sm:$0xff]  ;;  %v2299_v54 = vld [vmem:[#allocation8 + $0x1f48] sm:$0xff] }
 0x2e9   :  { %8107 = vmatprep.subr.bf16.mxu1 %v9908_v39  ;;  %v9948_v39 = vcombine.high %v2267_v5, %v2271_v7  ;;  %v2303_v10 = vld [vmem:[#allocation8 + $0x1f68] sm:$0xff] }
 0x2eb   :  { %7780 = vmatpush1.bf16.msra.mxu0 %v9905_v37  ;;  %v9945_v37 = vcombine.low %v2266_v18, %v2270_v3  ;;  %v2306_v18 = vld [vmem:[#allocation8 + $0x1f80] sm:$0xff] }
 0x2ec   :  { %8108 = vmatpush1.bf16.msra.mxu1 %v9907_v22  ;;  %7781 = vmatprep.subr.bf16.mxu0 %v9914_v45  ;;  %v9947_v22 = vcombine.low %v2267_v5, %v2271_v7  ;;  %v9954_v45 = vcombine.high %v2274_v13, %v2278_v62  ;;  %v2310_v3 = vld [vmem:[#allocation8 + $0x1fa0] sm:$0xff]  ;;  %v2307_v5 = vld [vmem:[#allocation8 + $0x1f88] sm:$0xff] }
 0x2ed   :  { %8109 = vmatprep.subr.bf16.mxu1 %v9916_v4  ;;  %v9956_v4 = vcombine.high %v2275_v15, %v2279_v21  ;;  %v2311_v7 = vld [vmem:[#allocation8 + $0x1fa8] sm:$0xff] }
 0x2ef   :  { %7782 = vmatpush1.bf16.msra.mxu0 %v9913_v29  ;;  %v9953_v29 = vcombine.low %v2274_v13, %v2278_v62  ;;  %v2314_v13 = vld [vmem:[#allocation8 + $0x1fc0] sm:$0xff] }
 0x2f0   :  { %8110 = vmatpush1.bf16.msra.mxu1 %v9915_v30  ;;  %7783 = vmatprep.subr.bf16.mxu0 %v9922_v61  ;;  %v9955_v30 = vcombine.low %v2275_v15, %v2279_v21  ;;  %v9962_v61 = vcombine.high %v2282_v25, %v2286_v9  ;;  %v2318_v62 = vld [vmem:[#allocation8 + $0x1fe0] sm:$0xff]  ;;  %v2315_v15 = vld [vmem:[#allocation8 + $0x1fc8] sm:$0xff] }
 0x2f1   :  { %8111 = vmatprep.subr.bf16.mxu1 %v9924_v32  ;;  %v9964_v32 = vcombine.high %v2283_v26, %v2287_v28  ;;  %v2319_v21 = vld [vmem:[#allocation8 + $0x1fe8] sm:$0xff] }
 0x2f3   :  { %7784 = vmatpush1.bf16.msra.mxu0 %v9921_v11  ;;  %v9961_v11 = vcombine.low %v2282_v25, %v2286_v9  ;;  %v1300_v25 = vld [vmem:[#allocation8 + $0x10] sm:$0xff] }
 0x2f4   :  { %8112 = vmatpush1.bf16.msra.mxu1 %v9923_v48  ;;  %7785 = vmatprep.subr.bf16.mxu0 %v9930_v49  ;;  %v9963_v48 = vcombine.low %v2283_v26, %v2287_v28  ;;  %v9970_v49 = vcombine.high %v2290_v35, %v2294_v34  ;;  %v1304_v9 = vld [vmem:[#allocation8 + $0x30] sm:$0xff]  ;;  %v1301_v26 = vld [vmem:[#allocation8 + $0x18] sm:$0xff] }
 0x2f5   :  { %8113 = vmatprep.subr.bf16.mxu1 %v9932_v50  ;;  %v9972_v50 = vcombine.high %v2291_v42, %v2295_v43  ;;  %v1305_v28 = vld [vmem:[#allocation8 + $0x38] sm:$0xff] }
 0x2f7   :  { %7786 = vmatpush1.bf16.msra.mxu0 %v9929_v55  ;;  %v9969_v55 = vcombine.low %v2290_v35, %v2294_v34  ;;  %v8984_v35 = vcombine.high %v1301_v26, %v1305_v28  ;;  %v1308_v34 = vld [vmem:[#allocation8 + $0x50] sm:$0xff] }
 0x2f8   :  { %8114 = vmatpush1.bf16.msra.mxu1 %v9931_v56  ;;  %7787 = vmatprep.subr.bf16.mxu0 %v9938_v59  ;;  %v9971_v56 = vcombine.low %v2291_v42, %v2295_v43  ;;  %v9978_v59 = vcombine.high %v2298_v52, %v2302_v53  ;;  %v1312_v42 = vld [vmem:[#allocation8 + $0x70] sm:$0xff]  ;;  %v8981_v43 = vcombine.low %v1300_v25, %v1304_v9 }
 0x2f9   :  { %8115 = vmatprep.subr.bf16.mxu1 %v9940_v63  ;;  %v9980_v63 = vcombine.high %v2299_v54, %v2303_v10 }
 0x2fb   :  { %7788 = vmatpush1.bf16.msra.mxu0 %v9937_v44  ;;  %v9977_v44 = vcombine.low %v2298_v52, %v2302_v53  ;;  %v8990_v52 = vcombine.high %v1308_v34, %v1312_v42  ;;  %v1320_v53 = vld [vmem:[#allocation8 + $0xb0] sm:$0xff] }
 0x2fc   :  { %8116 = vmatpush1.bf16.msra.mxu1 %v9939_v0  ;;  %7789 = vmatprep.subr.bf16.mxu0 %v9946_v12  ;;  %v9979_v0 = vcombine.low %v2299_v54, %v2303_v10  ;;  %v9986_v12 = vcombine.high %v2306_v18, %v2310_v3  ;;  %v1317_v10 = vld [vmem:[#allocation8 + $0x98] sm:$0xff] }
 0x2fd   :  { %8117 = vmatprep.subr.bf16.mxu1 %v9948_v39  ;;  %v9988_v39 = vcombine.high %v2307_v5, %v2311_v7 }
 0x2ff   :  { %7790 = vmatpush1.bf16.msra.mxu0 %v9945_v37  ;;  %v9985_v37 = vcombine.low %v2306_v18, %v2310_v3  ;;  %v1324_v3 = vld [vmem:[#allocation8 + $0xd0] sm:$0xff] }
 0x300   :  { %8118 = vmatpush1.bf16.msra.mxu1 %v9947_v22  ;;  %7791 = vmatprep.subr.bf16.mxu0 %v9954_v45  ;;  %v9987_v22 = vcombine.low %v2307_v5, %v2311_v7  ;;  %v9994_v45 = vcombine.high %v2314_v13, %v2318_v62  ;;  %v1328_v5 = vld [vmem:[#allocation8 + $0xf0] sm:$0xff]  ;;  %v1325_v7 = vld [vmem:[#allocation8 + $0xd8] sm:$0xff] }
 0x301   :  { %8119 = vmatprep.subr.bf16.mxu1 %v9956_v4  ;;  %v9996_v4 = vcombine.high %v2315_v15, %v2319_v21 }
 0x303   :  { %7792 = vmatpush1.bf16.msra.mxu0 %v9953_v29  ;;  %v9993_v29 = vcombine.low %v2314_v13, %v2318_v62  ;;  %v1332_v62 = vld [vmem:[#allocation8 + $0x110] sm:$0xff] }
 0x304   :  { %8120 = vmatpush1.bf16.msra.mxu1 %v9955_v30  ;;  %7793 = vmatprep.subr.bf16.mxu0 %v9962_v61  ;;  %v1280_v30 = vmax.f32 %v10506_v27, 0.0  ;;  %v9995_v61 = vcombine.low %v2315_v15, %v2319_v21  ;;  %v1316_v27 = vld [vmem:[#allocation8 + $0x90] sm:$0xff]  ;;  %v1333_v21 = vld [vmem:[#allocation8 + $0x118] sm:$0xff] }
 0x305   :  { %8121 = vmatprep.subr.bf16.mxu1 %v9964_v32  ;;  %v8982_v32 = vcombine.high %v1300_v25, %v1304_v9  ;;  %v1336_v15 = vld [vmem:[#allocation8 + $0x130] sm:$0xff] }
 0x306   :  { %v1340_v25 = vld [vmem:[#allocation8 + $0x150] sm:$0xff] }
 0x307   :  { %7794 = vmatpush1.bf16.msra.mxu0 %v9961_v11  ;;  %v1309_v11 = vld [vmem:[#allocation8 + $0x58] sm:$0xff]  ;;  %v1344_v9 = vld [vmem:[#allocation8 + $0x170] sm:$0xff] }
 0x308   :  { %8122 = vmatpush1.bf16.msra.mxu1 %v9963_v48  ;;  %7795 = vmatprep.subr.bf16.mxu0 %v9970_v49  ;;  %v1313_v48 = vld [vmem:[#allocation8 + $0x78] sm:$0xff]  ;;  %v10569_v49 = vpack.c.bf16 %v1280_v30, %v1280_v30 }
 0x309   :  { %8123 = vmatprep.subr.bf16.mxu1 %v9972_v50  ;;  %v8983_v50 = vcombine.low %v1301_v26, %v1305_v28  ;;  %v8992_v54 = vcombine.high %v1309_v11, %v1313_v48  ;;  %v1341_v26 = vld [vmem:[#allocation8 + $0x158] sm:$0xff] }
 0x30a   :  { %v1345_v28 = vld [vmem:[#allocation8 + $0x178] sm:$0xff] }
 0x30b   :  { %7796 = vmatpush1.bf16.msra.mxu0 %v9969_v55  ;;  %v1321_v55 = vld [vmem:[#allocation8 + $0xb8] sm:$0xff] }
 0x30c   :  { %8124 = vmatpush1.bf16.msra.mxu1 %v9971_v56  ;;  %7797 = vmatprep.subr.bf16.mxu0 %v9978_v59  ;;  %v8989_v56 = vcombine.low %v1308_v34, %v1312_v42  ;;  %v8991_v59 = vcombine.low %v1309_v11, %v1313_v48  ;;  %v9000_v18 = vcombine.high %v1317_v10, %v1321_v55  ;;  %v1352_v34 = vld [vmem:[#allocation8 + $0x1b0] sm:$0xff]  ;;  %v1349_v42 = vld [vmem:[#allocation8 + $0x198] sm:$0xff] }
 0x30d   :  { %8125 = vmatprep.subr.bf16.mxu1 %v9980_v63  ;;  %v8998_v63 = vcombine.high %v1316_v27, %v1320_v53  ;;  %v9021_v11 = vcombine.low %v1340_v25, %v1344_v9  ;;  %v9023_v48 = vcombine.low %v1341_v26, %v1345_v28 }
 0x30f   :  { %7798 = vmatpush1.bf16.msra.mxu0 %v9977_v44  ;;  %v1329_v44 = vld [vmem:[#allocation8 + $0xf8] sm:$0xff] }
 0x310   :  { %8126 = vmatpush1.bf16.msra.mxu1 %v9979_v0  ;;  %7799 = vmatprep.subr.bf16.mxu0 %v9986_v12  ;;  %v8997_v0 = vcombine.low %v1316_v27, %v1320_v53  ;;  %v8999_v12 = vcombine.low %v1317_v10, %v1321_v55  ;;  %v9008_v13 = vcombine.high %v1325_v7, %v1329_v44  ;;  %v1356_v27 = vld [vmem:[#allocation8 + $0x1d0] sm:$0xff]  ;;  %v1361_v10 = vld [vmem:[#allocation8 + $0x1f8] sm:$0xff] }
 0x311   :  { %8127 = vmatprep.subr.bf16.mxu1 %v9988_v39  ;;  %v9006_v39 = vcombine.high %v1324_v3, %v1328_v5  ;;  %v1360_v53 = vld [vmem:[#allocation8 + $0x1f0] sm:$0xff] }
 0x313   :  { %7800 = vmatpush1.bf16.msra.mxu0 %v9985_v37  ;;  %v1337_v37 = vld [vmem:[#allocation8 + $0x138] sm:$0xff] }
 0x314   :  { %8128 = vmatpush1.bf16.msra.mxu1 %v9987_v22  ;;  %7801 = vmatprep.subr.bf16.mxu0 %v9994_v45  ;;  %v9007_v22 = vcombine.low %v1325_v7, %v1329_v44  ;;  %v9014_v45 = vcombine.high %v1332_v62, %v1336_v15  ;;  %v9015_v30 = vcombine.low %v1333_v21, %v1337_v37  ;;  %v1369_v7 = vld [vmem:[#allocation8 + $0x238] sm:$0xff] }
 0x315   :  { %8129 = vmatprep.subr.bf16.mxu1 %v9996_v4  ;;  %v9016_v4 = vcombine.high %v1333_v21, %v1337_v37  ;;  %v9037_v44 = vcombine.low %v1356_v27, %v1360_v53  ;;  %v1377_v21 = vld [vmem:[#allocation8 + $0x278] sm:$0xff] }
 0x317   :  { %7802 = vmatpush1.bf16.msra.mxu0 %v9993_v29  ;;  %v9013_v29 = vcombine.low %v1332_v62, %v1336_v15  ;;  %v1376_v62 = vld [vmem:[#allocation8 + $0x270] sm:$0xff]  ;;  %v1373_v15 = vld [vmem:[#allocation8 + $0x258] sm:$0xff] }
 0x318   :  { %8130 = vmatpush1.bf16.msra.mxu1 %v9995_v61  ;;  %8140 = vmatprep.subr.bf16.mxu0 %v8982_v32  ;;  %v9022_v61 = vcombine.high %v1340_v25, %v1344_v9  ;;  %v9024_v32 = vcombine.high %v1341_v26, %v1345_v28  ;;  %v1384_v25 = vld [vmem:[#allocation8 + $0x2b0] sm:$0xff]  ;;  %v1381_v9 = vld [vmem:[#allocation8 + $0x298] sm:$0xff] }
 0x319   :  { %8468 = vmatprep.subr.bf16.mxu1 %v8984_v35  ;;  %v1348_v35 = vld [vmem:[#allocation8 + $0x190] sm:$0xff]  ;;  %v1385_v26 = vld [vmem:[#allocation8 + $0x2b8] sm:$0xff] }
 0x31a   :  { %7804 = vmatmul.mubr.bf16.vlgmr.msra.gmra.mrb[16].mxu0 %v10569_v49  ;;  %v9029_v55 = vcombine.low %v1348_v35, %v1352_v34 }
 0x31b   :  { %8132 = vmatmul.mubr.bf16.vlgmr.msra.gmra.mrb[16].mxu1 %v10569_v49  ;;  %8141 = vmatpush1.bf16.msra.mxu0 %v8981_v43  ;;  %v1353_v43 = vld [vmem:[#allocation8 + $0x1b8] sm:$0xff] }
 0x31c   :  { %8172 = vmatprep.mubr.bf16.mxu0 %v10427_v36  ;;  %8469 = vmatpush1.bf16.msra.mxu1 %v8983_v50  ;;  %v9030_v50 = vcombine.high %v1348_v35, %v1352_v34  ;;  %v1392_v35 = vld [vmem:[#allocation8 + $0x2f0] sm:$0xff]  ;;  %v1389_v34 = vld [vmem:[#allocation8 + $0x2d8] sm:$0xff] }
 0x31d   :  { %8500 = vmatprep.mubr.bf16.mxu1 %v10427_v36  ;;  %8142 = vmatprep.subr.bf16.mxu0 %v8990_v52  ;;  %v9005_v36 = vcombine.low %v1324_v3, %v1328_v5  ;;  %v9032_v52 = vcombine.high %v1349_v42, %v1353_v43  ;;  %v1368_v3 = vld [vmem:[#allocation8 + $0x230] sm:$0xff]  ;;  %v1365_v5 = vld [vmem:[#allocation8 + $0x218] sm:$0xff] }
 0x31e   :  { %8470 = vmatprep.subr.bf16.mxu1 %v8992_v54  ;;  %v1357_v54 = vld [vmem:[#allocation8 + $0x1d8] sm:$0xff] }
 0x31f   :  { %8143 = vmatpush1.bf16.msra.mxu0 %v8989_v56  ;;  %v9031_v56 = vcombine.low %v1349_v42, %v1353_v43  ;;  %v1393_v42 = vld [vmem:[#allocation8 + $0x2f8] sm:$0xff] }
 0x320   :  { %8471 = vmatpush1.bf16.msra.mxu1 %v8991_v59  ;;  %8144 = vmatprep.subr.bf16.mxu0 %v8998_v63  ;;  %v9038_v59 = vcombine.high %v1356_v27, %v1360_v53  ;;  %v9040_v63 = vcombine.high %v1357_v54, %v1361_v10  ;;  %v1400_v27 = vld [vmem:[#allocation8 + $0x330] sm:$0xff]  ;;  %v1397_v53 = vld [vmem:[#allocation8 + $0x318] sm:$0xff] }
 0x321   :  { %8472 = vmatprep.subr.bf16.mxu1 %v9000_v18  ;;  %v1364_v18 = vld [vmem:[#allocation8 + $0x210] sm:$0xff] }
 0x322   :  { %v9045_v37 = vcombine.low %v1364_v18, %v1368_v3 }
 0x323   :  { %8145 = vmatpush1.bf16.msra.mxu0 %v8997_v0  ;;  %v9039_v0 = vcombine.low %v1357_v54, %v1361_v10  ;;  %v1401_v54 = vld [vmem:[#allocation8 + $0x338] sm:$0xff] }
 0x324   :  { %8473 = vmatpush1.bf16.msra.mxu1 %v8999_v12  ;;  %8146 = vmatprep.subr.bf16.mxu0 %v9006_v39  ;;  %v9046_v12 = vcombine.high %v1364_v18, %v1368_v3  ;;  %v9048_v39 = vcombine.high %v1365_v5, %v1369_v7  ;;  %v1408_v18 = vld [vmem:[#allocation8 + $0x370] sm:$0xff]  ;;  %v1405_v3 = vld [vmem:[#allocation8 + $0x358] sm:$0xff] }
 0x325   :  { %8474 = vmatprep.subr.bf16.mxu1 %v9008_v13  ;;  %v1372_v13 = vld [vmem:[#allocation8 + $0x250] sm:$0xff] }
 0x326   :  { %v9053_v28 = vcombine.low %v1372_v13, %v1376_v62 }
 0x327   :  { %8147 = vmatpush1.bf16.msra.mxu0 %v9005_v36  ;;  %v9047_v36 = vcombine.low %v1365_v5, %v1369_v7  ;;  %v1409_v5 = vld [vmem:[#allocation8 + $0x378] sm:$0xff] }
 0x328   :  { %8475 = vmatpush1.bf16.msra.mxu1 %v9007_v22  ;;  %8148 = vmatprep.subr.bf16.mxu0 %v9014_v45  ;;  %v9054_v22 = vcombine.high %v1372_v13, %v1376_v62  ;;  %v9056_v45 = vcombine.high %v1373_v15, %v1377_v21  ;;  %v1416_v13 = vld [vmem:[#allocation8 + $0x3b0] sm:$0xff]  ;;  %v1413_v62 = vld [vmem:[#allocation8 + $0x398] sm:$0xff] }
 0x329   :  { %8476 = vmatprep.subr.bf16.mxu1 %v9016_v4  ;;  %v1380_v4 = vld [vmem:[#allocation8 + $0x290] sm:$0xff] }
 0x32a   :  { %v9061_v43 = vcombine.low %v1380_v4, %v1384_v25 }
 0x32b   :  { %8149 = vmatpush1.bf16.msra.mxu0 %v9013_v29  ;;  %v9055_v29 = vcombine.low %v1373_v15, %v1377_v21  ;;  %v1417_v15 = vld [vmem:[#allocation8 + $0x3b8] sm:$0xff] }
 0x32c   :  { %8477 = vmatpush1.bf16.msra.mxu1 %v9015_v30  ;;  %8150 = vmatprep.subr.bf16.mxu0 %v9022_v61  ;;  %v9062_v30 = vcombine.high %v1380_v4, %v1384_v25  ;;  %v9064_v61 = vcombine.high %v1381_v9, %v1385_v26  ;;  %v1424_v4 = vld [vmem:[#allocation8 + $0x3f0] sm:$0xff]  ;;  %v1421_v25 = vld [vmem:[#allocation8 + $0x3d8] sm:$0xff] }
 0x32d   :  { %8478 = vmatprep.subr.bf16.mxu1 %v9024_v32  ;;  %v1388_v32 = vld [vmem:[#allocation8 + $0x2d0] sm:$0xff] }
 0x32e   :  { %v9069_v10 = vcombine.low %v1388_v32, %v1392_v35 }
 0x32f   :  { %8151 = vmatpush1.bf16.msra.mxu0 %v9021_v11  ;;  %v9063_v11 = vcombine.low %v1381_v9, %v1385_v26  ;;  %v1425_v9 = vld [vmem:[#allocation8 + $0x3f8] sm:$0xff] }
 0x330   :  { %8479 = vmatpush1.bf16.msra.mxu1 %v9023_v48  ;;  %8152 = vmatprep.subr.bf16.mxu0 %v9030_v50  ;;  %v9070_v48 = vcombine.high %v1388_v32, %v1392_v35  ;;  %v9072_v50 = vcombine.high %v1389_v34, %v1393_v42  ;;  %v1432_v32 = vld [vmem:[#allocation8 + $0x430] sm:$0xff]  ;;  %v1429_v35 = vld [vmem:[#allocation8 + $0x418] sm:$0xff] }
 0x331   :  { %8480 = vmatprep.subr.bf16.mxu1 %v9032_v52  ;;  %v1396_v52 = vld [vmem:[#allocation8 + $0x310] sm:$0xff] }
 0x332   :  { %v9077_v7 = vcombine.low %v1396_v52, %v1400_v27 }
 0x333   :  { %8153 = vmatpush1.bf16.msra.mxu0 %v9029_v55  ;;  %v9071_v55 = vcombine.low %v1389_v34, %v1393_v42  ;;  %v1433_v34 = vld [vmem:[#allocation8 + $0x438] sm:$0xff] }
 0x334   :  { %8481 = vmatpush1.bf16.msra.mxu1 %v9031_v56  ;;  %8154 = vmatprep.subr.bf16.mxu0 %v9038_v59  ;;  %v9078_v56 = vcombine.high %v1396_v52, %v1400_v27  ;;  %v9080_v59 = vcombine.high %v1397_v53, %v1401_v54  ;;  %v1440_v52 = vld [vmem:[#allocation8 + $0x470] sm:$0xff] }
 0x335   :  { %8482 = vmatprep.subr.bf16.mxu1 %v9040_v63  ;;  %v1404_v63 = vld [vmem:[#allocation8 + $0x350] sm:$0xff] }
 0x336   :  { %v9085_v21 = vcombine.low %v1404_v63, %v1408_v18 }
 0x337   :  { %8155 = vmatpush1.bf16.msra.mxu0 %v9037_v44  ;;  %v9079_v44 = vcombine.low %v1397_v53, %v1401_v54  ;;  %v1437_v53 = vld [vmem:[#allocation8 + $0x458] sm:$0xff] }
 0x338   :  { %8483 = vmatpush1.bf16.msra.mxu1 %v9039_v0  ;;  %8156 = vmatprep.subr.bf16.mxu0 %v9046_v12  ;;  %v9086_v0 = vcombine.high %v1404_v63, %v1408_v18  ;;  %v9088_v12 = vcombine.high %v1405_v3, %v1409_v5  ;;  %v1441_v54 = vld [vmem:[#allocation8 + $0x478] sm:$0xff] }
 0x339   :  { %8484 = vmatprep.subr.bf16.mxu1 %v9048_v39  ;;  %v1412_v39 = vld [vmem:[#allocation8 + $0x390] sm:$0xff]  ;;  %v9120_v63 = vcombine.high %v1437_v53, %v1441_v54  ;;  %v1445_v18 = vld [vmem:[#allocation8 + $0x498] sm:$0xff] }
 0x33a   :  { %v9093_v26 = vcombine.low %v1412_v39, %v1416_v13 }
 0x33b   :  { %8157 = vmatpush1.bf16.msra.mxu0 %v9045_v37  ;;  %v9087_v37 = vcombine.low %v1405_v3, %v1409_v5  ;;  %v1449_v3 = vld [vmem:[#allocation8 + $0x4b8] sm:$0xff] }
 0x33c   :  { %8485 = vmatpush1.bf16.msra.mxu1 %v9047_v36  ;;  %8158 = vmatprep.subr.bf16.mxu0 %v9054_v22  ;;  %v9094_v36 = vcombine.high %v1412_v39, %v1416_v13  ;;  %v9096_v22 = vcombine.high %v1413_v62, %v1417_v15  ;;  %v1456_v39 = vld [vmem:[#allocation8 + $0x4f0] sm:$0xff]  ;;  %v1453_v13 = vld [vmem:[#allocation8 + $0x4d8] sm:$0xff] }
 0x33d   :  { %8486 = vmatprep.subr.bf16.mxu1 %v9056_v45  ;;  %v1420_v45 = vld [vmem:[#allocation8 + $0x3d0] sm:$0xff] }
 0x33e   :  { %v9101_v42 = vcombine.low %v1420_v45, %v1424_v4 }
 0x33f   :  { %8159 = vmatpush1.bf16.msra.mxu0 %v9053_v28  ;;  %v9095_v28 = vcombine.low %v1413_v62, %v1417_v15  ;;  %v1457_v62 = vld [vmem:[#allocation8 + $0x4f8] sm:$0xff] }
 0x340   :  { %8487 = vmatpush1.bf16.msra.mxu1 %v9055_v29  ;;  %8160 = vmatprep.subr.bf16.mxu0 %v9062_v30  ;;  %v9102_v29 = vcombine.high %v1420_v45, %v1424_v4  ;;  %v9104_v30 = vcombine.high %v1421_v25, %v1425_v9  ;;  %v1461_v45 = vld [vmem:[#allocation8 + $0x518] sm:$0xff] }
 0x341   :  { %8488 = vmatprep.subr.bf16.mxu1 %v9064_v61  ;;  %v1428_v61 = vld [vmem:[#allocation8 + $0x410] sm:$0xff]  ;;  %v1465_v4 = vld [vmem:[#allocation8 + $0x538] sm:$0xff] }
 0x342   :  { %v9109_v27 = vcombine.low %v1428_v61, %v1432_v32 }
 0x343   :  { %8161 = vmatpush1.bf16.msra.mxu0 %v9061_v43  ;;  %v9103_v43 = vcombine.low %v1421_v25, %v1425_v9  ;;  %v9135_v25 = vcombine.low %v1453_v13, %v1457_v62 }
 0x344   :  { %8489 = vmatpush1.bf16.msra.mxu1 %v9063_v11  ;;  %8162 = vmatprep.subr.bf16.mxu0 %v9070_v48  ;;  %v9110_v11 = vcombine.high %v1428_v61, %v1432_v32  ;;  %v9112_v48 = vcombine.high %v1429_v35, %v1433_v34  ;;  %v1473_v61 = vld [vmem:[#allocation8 + $0x578] sm:$0xff] }
 0x345   :  { %8490 = vmatprep.subr.bf16.mxu1 %v9072_v50  ;;  %v1436_v50 = vld [vmem:[#allocation8 + $0x450] sm:$0xff] }
 0x346   :  { %v9117_v5 = vcombine.low %v1436_v50, %v1440_v52 }
 0x347   :  { %8163 = vmatpush1.bf16.msra.mxu0 %v9069_v10  ;;  %v9111_v10 = vcombine.low %v1429_v35, %v1433_v34  ;;  %v9143_v35 = vcombine.low %v1461_v45, %v1465_v4 }
 0x348   :  { %8491 = vmatpush1.bf16.msra.mxu1 %v9071_v55  ;;  %8164 = vmatprep.subr.bf16.mxu0 %v9078_v56  ;;  %v9118_v55 = vcombine.high %v1436_v50, %v1440_v52  ;;  %v1444_v56 = vld [vmem:[#allocation8 + $0x490] sm:$0xff]  ;;  %v1481_v50 = vld [vmem:[#allocation8 + $0x5b8] sm:$0xff] }
 0x349   :  { %8492 = vmatprep.subr.bf16.mxu1 %v9080_v59  ;;  %v1448_v59 = vld [vmem:[#allocation8 + $0x4b0] sm:$0xff] }
 0x34a   :  { %v9125_v15 = vcombine.low %v1444_v56, %v1448_v59 }
 0x34b   :  { %8165 = vmatpush1.bf16.msra.mxu0 %v9077_v7  ;;  %v9119_v7 = vcombine.low %v1437_v53, %v1441_v54 }
 0x34c   :  { %8493 = vmatpush1.bf16.msra.mxu1 %v9079_v44  ;;  %8166 = vmatprep.subr.bf16.mxu0 %v9086_v0  ;;  %v9126_v44 = vcombine.high %v1444_v56, %v1448_v59  ;;  %v9128_v0 = vcombine.high %v1445_v18, %v1449_v3  ;;  %v1485_v56 = vld [vmem:[#allocation8 + $0x5d8] sm:$0xff] }
 0x34d   :  { %8494 = vmatprep.subr.bf16.mxu1 %v9088_v12  ;;  %v1452_v12 = vld [vmem:[#allocation8 + $0x4d0] sm:$0xff]  ;;  %v1489_v59 = vld [vmem:[#allocation8 + $0x5f8] sm:$0xff] }
 0x34f   :  { %8167 = vmatpush1.bf16.msra.mxu0 %v9085_v21  ;;  %v9134_v21 = vcombine.high %v1452_v12, %v1456_v39 }
 0x350   :  { %8495 = vmatpush1.bf16.msra.mxu1 %v9087_v37  ;;  %8168 = vmatprep.subr.bf16.mxu0 %v9094_v36  ;;  %v9136_v37 = vcombine.high %v1453_v13, %v1457_v62  ;;  %v1460_v36 = vld [vmem:[#allocation8 + $0x510] sm:$0xff]  ;;  %v9167_v13 = vcombine.low %v1485_v56, %v1489_v59 }
 0x351   :  { %8496 = vmatprep.subr.bf16.mxu1 %v9096_v22  ;;  %v1464_v22 = vld [vmem:[#allocation8 + $0x530] sm:$0xff] }
 0x352   :  { %v9142_v9 = vcombine.high %v1460_v36, %v1464_v22  ;;  %v9141_v32 = vcombine.low %v1460_v36, %v1464_v22  ;;  %v1505_v36 = vld [vmem:[#allocation8 + $0x678] sm:$0xff] }
 0x353   :  { %8169 = vmatpush1.bf16.msra.mxu0 %v9093_v26  ;;  %v9144_v26 = vcombine.high %v1461_v45, %v1465_v4 }
 0x354   :  { %8497 = vmatpush1.bf16.msra.mxu1 %v9095_v28  ;;  %8170 = vmatprep.subr.bf16.mxu0 %v9102_v29  ;;  %v1468_v28 = vld [vmem:[#allocation8 + $0x550] sm:$0xff] }
 0x355   :  { %8498 = vmatprep.subr.bf16.mxu1 %v9104_v30  ;;  %v1472_v29 = vld [vmem:[#allocation8 + $0x570] sm:$0xff]  ;;  %v1469_v30 = vld [vmem:[#allocation8 + $0x558] sm:$0xff] }
 0x356   :  { %v9150_v34 = vcombine.high %v1468_v28, %v1472_v29  ;;  %v9149_v52 = vcombine.low %v1468_v28, %v1472_v29  ;;  %v1513_v28 = vld [vmem:[#allocation8 + $0x6b8] sm:$0xff] }
 0x357   :  { %8171 = vmatpush1.bf16.msra.mxu0 %v9101_v42  ;;  %v9152_v42 = vcombine.high %v1469_v30, %v1473_v61 }
 0x358   :  { %8499 = vmatpush1.bf16.msra.mxu1 %v9103_v43  ;;  %8181 = vmatprep.subr.bf16.mxu0 %v9110_v11  ;;  %v1476_v43 = vld [vmem:[#allocation8 + $0x590] sm:$0xff] }
 0x359   :  { %8509 = vmatprep.subr.bf16.mxu1 %v9112_v48  ;;  %v1480_v11 = vld [vmem:[#allocation8 + $0x5b0] sm:$0xff]  ;;  %v1477_v48 = vld [vmem:[#allocation8 + $0x598] sm:$0xff] }
 0x35a   :  { %8173 = vmatmul.mubr.bf16.vlgmr.msra.gmra.mrb[20].mxu0 %v10433_v40  ;;  %v9158_v53 = vcombine.high %v1476_v43, %v1480_v11  ;;  %v9160_v54 = vcombine.high %v1477_v48, %v1481_v50 }
 0x35b   :  { %8501 = vmatmul.mubr.bf16.vlgmr.msra.gmra.mrb[20].mxu1 %v10433_v40  ;;  %8182 = vmatpush1.bf16.msra.mxu0 %v9109_v27  ;;  %v9127_v40 = vcombine.low %v1445_v18, %v1449_v3  ;;  %v9151_v27 = vcombine.low %v1469_v30, %v1473_v61  ;;  %v9159_v18 = vcombine.low %v1477_v48, %v1481_v50 }
 0x35c   :  { %8213 = vmatprep.mubr.bf16.mxu0 %v10439_v58  ;;  %8510 = vmatpush1.bf16.msra.mxu1 %v9111_v10  ;;  %v1484_v10 = vld [vmem:[#allocation8 + $0x5d0] sm:$0xff] }
 0x35d   :  { %8541 = vmatprep.mubr.bf16.mxu1 %v10439_v58  ;;  %8183 = vmatprep.subr.bf16.mxu0 %v9118_v55  ;;  %v9133_v58 = vcombine.low %v1452_v12, %v1456_v39  ;;  %v1488_v55 = vld [vmem:[#allocation8 + $0x5f0] sm:$0xff]  ;;  %v1497_v12 = vld [vmem:[#allocation8 + $0x638] sm:$0xff] }
 0x35e   :  { %8511 = vmatprep.subr.bf16.mxu1 %v9120_v63  ;;  %v9157_v63 = vcombine.low %v1476_v43, %v1480_v11  ;;  %v9166_v3 = vcombine.high %v1484_v10, %v1488_v55  ;;  %v9165_v39 = vcombine.low %v1484_v10, %v1488_v55  ;;  %v1521_v43 = vld [vmem:[#allocation8 + $0x6f8] sm:$0xff] }
 0x35f   :  { %8184 = vmatpush1.bf16.msra.mxu0 %v9117_v5  ;;  %v9168_v5 = vcombine.high %v1485_v56, %v1489_v59  ;;  %v1529_v10 = vld [vmem:[#allocation8 + $0x738] sm:$0xff] }
 0x360   :  { %8512 = vmatpush1.bf16.msra.mxu1 %v9119_v7  ;;  %8185 = vmatprep.subr.bf16.mxu0 %v9126_v44  ;;  %v1492_v7 = vld [vmem:[#allocation8 + $0x610] sm:$0xff] }
 0x361   :  { %8513 = vmatprep.subr.bf16.mxu1 %v9128_v0  ;;  %v1496_v44 = vld [vmem:[#allocation8 + $0x630] sm:$0xff]  ;;  %v1493_v0 = vld [vmem:[#allocation8 + $0x618] sm:$0xff] }
 0x362   :  { %v9174_v62 = vcombine.high %v1492_v7, %v1496_v44  ;;  %v9173_v22 = vcombine.low %v1492_v7, %v1496_v44  ;;  %v9175_v45 = vcombine.low %v1493_v0, %v1497_v12  ;;  %v1537_v7 = vld [vmem:[#allocation8 + $0x778] sm:$0xff] }
 0x363   :  { %8186 = vmatpush1.bf16.msra.mxu0 %v9125_v15  ;;  %v9176_v15 = vcombine.high %v1493_v0, %v1497_v12 }
 0x364   :  { %8514 = vmatpush1.bf16.msra.mxu1 %v9127_v40  ;;  %8187 = vmatprep.subr.bf16.mxu0 %v9134_v21  ;;  %v1500_v40 = vld [vmem:[#allocation8 + $0x650] sm:$0xff] }
 0x365   :  { %8515 = vmatprep.subr.bf16.mxu1 %v9136_v37  ;;  %v1504_v21 = vld [vmem:[#allocation8 + $0x670] sm:$0xff]  ;;  %v1501_v37 = vld [vmem:[#allocation8 + $0x658] sm:$0xff] }
 0x366   :  { %v9182_v4 = vcombine.high %v1500_v40, %v1504_v21  ;;  %v9181_v29 = vcombine.low %v1500_v40, %v1504_v21  ;;  %v9183_v30 = vcombine.low %v1501_v37, %v1505_v36  ;;  %v1545_v40 = vld [vmem:[#allocation8 + $0x7b8] sm:$0xff] }
 0x367   :  { %8188 = vmatpush1.bf16.msra.mxu0 %v9133_v58  ;;  %v9184_v58 = vcombine.high %v1501_v37, %v1505_v36 }
 0x368   :  { %8516 = vmatpush1.bf16.msra.mxu1 %v9135_v25  ;;  %8189 = vmatprep.subr.bf16.mxu0 %v9142_v9  ;;  %v1508_v25 = vld [vmem:[#allocation8 + $0x690] sm:$0xff] }
 0x369   :  { %8517 = vmatprep.subr.bf16.mxu1 %v9144_v26  ;;  %v1512_v9 = vld [vmem:[#allocation8 + $0x6b0] sm:$0xff]  ;;  %v1509_v26 = vld [vmem:[#allocation8 + $0x698] sm:$0xff] }
 0x36a   :  { %v9190_v61 = vcombine.high %v1508_v25, %v1512_v9  ;;  %v9189_v11 = vcombine.low %v1508_v25, %v1512_v9  ;;  %v9191_v48 = vcombine.low %v1509_v26, %v1513_v28  ;;  %v1553_v25 = vld [vmem:[#allocation8 + $0x7f8] sm:$0xff] }
 0x36b   :  { %8190 = vmatpush1.bf16.msra.mxu0 %v9141_v32  ;;  %v9192_v32 = vcombine.high %v1509_v26, %v1513_v28 }
 0x36c   :  { %8518 = vmatpush1.bf16.msra.mxu1 %v9143_v35  ;;  %8191 = vmatprep.subr.bf16.mxu0 %v9150_v34  ;;  %v1516_v35 = vld [vmem:[#allocation8 + $0x6d0] sm:$0xff] }
 0x36d   :  { %8519 = vmatprep.subr.bf16.mxu1 %v9152_v42  ;;  %v1520_v34 = vld [vmem:[#allocation8 + $0x6f0] sm:$0xff]  ;;  %v1517_v42 = vld [vmem:[#allocation8 + $0x6d8] sm:$0xff] }
 0x36e   :  { %v9198_v50 = vcombine.high %v1516_v35, %v1520_v34  ;;  %v9197_v55 = vcombine.low %v1516_v35, %v1520_v34  ;;  %v9199_v56 = vcombine.low %v1517_v42, %v1521_v43  ;;  %v1561_v35 = vld [vmem:[#allocation8 + $0x838] sm:$0xff] }
 0x36f   :  { %8192 = vmatpush1.bf16.msra.mxu0 %v9149_v52  ;;  %v9200_v52 = vcombine.high %v1517_v42, %v1521_v43 }
 0x370   :  { %8520 = vmatpush1.bf16.msra.mxu1 %v9151_v27  ;;  %8193 = vmatprep.subr.bf16.mxu0 %v9158_v53  ;;  %v1524_v27 = vld [vmem:[#allocation8 + $0x710] sm:$0xff] }
 0x371   :  { %8521 = vmatprep.subr.bf16.mxu1 %v9160_v54  ;;  %v1528_v53 = vld [vmem:[#allocation8 + $0x730] sm:$0xff]  ;;  %v1525_v54 = vld [vmem:[#allocation8 + $0x718] sm:$0xff] }
 0x372   :  { %v9206_v59 = vcombine.high %v1524_v27, %v1528_v53  ;;  %v9205_v44 = vcombine.low %v1524_v27, %v1528_v53  ;;  %v9207_v0 = vcombine.low %v1525_v54, %v1529_v10  ;;  %v1565_v27 = vld [vmem:[#allocation8 + $0x858] sm:$0xff] }
 0x373   :  { %8194 = vmatpush1.bf16.msra.mxu0 %v9157_v63  ;;  %v9208_v63 = vcombine.high %v1525_v54, %v1529_v10  ;;  %v1569_v53 = vld [vmem:[#allocation8 + $0x878] sm:$0xff] }
 0x374   :  { %8522 = vmatpush1.bf16.msra.mxu1 %v9159_v18  ;;  %8195 = vmatprep.subr.bf16.mxu0 %v9166_v3  ;;  %v1532_v18 = vld [vmem:[#allocation8 + $0x750] sm:$0xff] }
 0x375   :  { %8523 = vmatprep.subr.bf16.mxu1 %v9168_v5  ;;  %v1536_v3 = vld [vmem:[#allocation8 + $0x770] sm:$0xff]  ;;  %v1533_v5 = vld [vmem:[#allocation8 + $0x758] sm:$0xff] }
 0x376   :  { %v9214_v12 = vcombine.high %v1532_v18, %v1536_v3  ;;  %v9213_v21 = vcombine.low %v1532_v18, %v1536_v3  ;;  %v9215_v37 = vcombine.low %v1533_v5, %v1537_v7  ;;  %v1577_v18 = vld [vmem:[#allocation8 + $0x8b8] sm:$0xff] }
 0x377   :  { %8196 = vmatpush1.bf16.msra.mxu0 %v9165_v39  ;;  %v9216_v39 = vcombine.high %v1533_v5, %v1537_v7  ;;  %v9247_v5 = vcombine.low %v1565_v27, %v1569_v53 }
 0x378   :  { %8524 = vmatpush1.bf16.msra.mxu1 %v9167_v13  ;;  %8197 = vmatprep.subr.bf16.mxu0 %v9174_v62  ;;  %v1540_v13 = vld [vmem:[#allocation8 + $0x790] sm:$0xff] }
 0x379   :  { %8525 = vmatprep.subr.bf16.mxu1 %v9176_v15  ;;  %v1544_v62 = vld [vmem:[#allocation8 + $0x7b0] sm:$0xff]  ;;  %v1541_v15 = vld [vmem:[#allocation8 + $0x798] sm:$0xff] }
 0x37a   :  { %v9222_v36 = vcombine.high %v1540_v13, %v1544_v62  ;;  %v9221_v9 = vcombine.low %v1540_v13, %v1544_v62  ;;  %v9223_v26 = vcombine.low %v1541_v15, %v1545_v40  ;;  %v1585_v13 = vld [vmem:[#allocation8 + $0x8f8] sm:$0xff] }
 0x37b   :  { %8198 = vmatpush1.bf16.msra.mxu0 %v9173_v22  ;;  %v9224_v22 = vcombine.high %v1541_v15, %v1545_v40 }
 0x37c   :  { %8526 = vmatpush1.bf16.msra.mxu1 %v9175_v45  ;;  %8199 = vmatprep.subr.bf16.mxu0 %v9182_v4  ;;  %v1548_v45 = vld [vmem:[#allocation8 + $0x7d0] sm:$0xff] }
 0x37d   :  { %8527 = vmatprep.subr.bf16.mxu1 %v9184_v58  ;;  %v1552_v4 = vld [vmem:[#allocation8 + $0x7f0] sm:$0xff]  ;;  %v1549_v58 = vld [vmem:[#allocation8 + $0x7d8] sm:$0xff] }
 0x37e   :  { %v9230_v28 = vcombine.high %v1548_v45, %v1552_v4  ;;  %v9229_v34 = vcombine.low %v1548_v45, %v1552_v4  ;;  %v9231_v42 = vcombine.low %v1549_v58, %v1553_v25 }
 0x37f   :  { %8200 = vmatpush1.bf16.msra.mxu0 %v9181_v29  ;;  %v9232_v29 = vcombine.high %v1549_v58, %v1553_v25  ;;  %v1596_v25 = vld [vmem:[#allocation8 + $0x950] sm:$0xff] }
 0x380   :  { %8528 = vmatpush1.bf16.msra.mxu1 %v9183_v30  ;;  %8201 = vmatprep.subr.bf16.mxu0 %v9190_v61  ;;  %v1556_v30 = vld [vmem:[#allocation8 + $0x810] sm:$0xff] }
 0x381   :  { %8529 = vmatprep.subr.bf16.mxu1 %v9192_v32  ;;  %v1560_v61 = vld [vmem:[#allocation8 + $0x830] sm:$0xff]  ;;  %v1557_v32 = vld [vmem:[#allocation8 + $0x818] sm:$0xff] }
 0x382   :  { %v9238_v43 = vcombine.high %v1556_v30, %v1560_v61  ;;  %v9239_v54 = vcombine.low %v1557_v32, %v1561_v35 }
 0x383   :  { %8202 = vmatpush1.bf16.msra.mxu0 %v9189_v11  ;;  %v9240_v11 = vcombine.high %v1557_v32, %v1561_v35  ;;  %v1604_v35 = vld [vmem:[#allocation8 + $0x990] sm:$0xff] }
 0x384   :  { %8530 = vmatpush1.bf16.msra.mxu1 %v9191_v48  ;;  %8203 = vmatprep.subr.bf16.mxu0 %v9198_v50  ;;  %v1564_v48 = vld [vmem:[#allocation8 + $0x850] sm:$0xff] }
 0x385   :  { %8531 = vmatprep.subr.bf16.mxu1 %v9200_v52  ;;  %v1568_v50 = vld [vmem:[#allocation8 + $0x870] sm:$0xff]  ;;  %v9237_v52 = vcombine.low %v1556_v30, %v1560_v61 }
 0x386   :  { %v9246_v10 = vcombine.high %v1564_v48, %v1568_v50  ;;  %v9245_v3 = vcombine.low %v1564_v48, %v1568_v50 }
 0x387   :  { %8204 = vmatpush1.bf16.msra.mxu0 %v9197_v55  ;;  %v1572_v55 = vld [vmem:[#allocation8 + $0x890] sm:$0xff] }
 0x388   :  { %8532 = vmatpush1.bf16.msra.mxu1 %v9199_v56  ;;  %8205 = vmatprep.subr.bf16.mxu0 %v9206_v59  ;;  %v1576_v56 = vld [vmem:[#allocation8 + $0x8b0] sm:$0xff]  ;;  %v9248_v59 = vcombine.high %v1565_v27, %v1569_v53 }
 0x389   :  { %8533 = vmatprep.subr.bf16.mxu1 %v9208_v63  ;;  %v1573_v63 = vld [vmem:[#allocation8 + $0x898] sm:$0xff]  ;;  %v9254_v7 = vcombine.high %v1572_v55, %v1576_v56  ;;  %v9253_v62 = vcombine.low %v1572_v55, %v1576_v56  ;;  %v1612_v27 = vld [vmem:[#allocation8 + $0x9d0] sm:$0xff] }
 0x38a   :  { %v1616_v53 = vld [vmem:[#allocation8 + $0x9f0] sm:$0xff] }
 0x38b   :  { %8206 = vmatpush1.bf16.msra.mxu0 %v9205_v44  ;;  %v9256_v44 = vcombine.high %v1573_v63, %v1577_v18 }
 0x38c   :  { %8534 = vmatpush1.bf16.msra.mxu1 %v9207_v0  ;;  %8207 = vmatprep.subr.bf16.mxu0 %v9214_v12  ;;  %v1580_v0 = vld [vmem:[#allocation8 + $0x8d0] sm:$0xff] }
 0x38d   :  { %8535 = vmatprep.subr.bf16.mxu1 %v9216_v39  ;;  %v1584_v12 = vld [vmem:[#allocation8 + $0x8f0] sm:$0xff]  ;;  %v1581_v39 = vld [vmem:[#allocation8 + $0x8d8] sm:$0xff] }
 0x38e   :  { %v9262_v15 = vcombine.high %v1580_v0, %v1584_v12  ;;  %v9264_v40 = vcombine.high %v1581_v39, %v1585_v13  ;;  %v9263_v45 = vcombine.low %v1581_v39, %v1585_v13  ;;  %v1628_v13 = vld [vmem:[#allocation8 + $0xa50] sm:$0xff] }
 0x38f   :  { %8208 = vmatpush1.bf16.msra.mxu0 %v9213_v21  ;;  %v1588_v21 = vld [vmem:[#allocation8 + $0x910] sm:$0xff] }
 0x390   :  { %8536 = vmatpush1.bf16.msra.mxu1 %v9215_v37  ;;  %8209 = vmatprep.subr.bf16.mxu0 %v9222_v36  ;;  %v1592_v37 = vld [vmem:[#allocation8 + $0x930] sm:$0xff]  ;;  %v1589_v36 = vld [vmem:[#allocation8 + $0x918] sm:$0xff] }
 0x391   :  { %8537 = vmatprep.subr.bf16.mxu1 %v9224_v22  ;;  %v1593_v22 = vld [vmem:[#allocation8 + $0x938] sm:$0xff]  ;;  %v9270_v4 = vcombine.high %v1588_v21, %v1592_v37 }
 0x392   :  { %v9272_v58 = vcombine.high %v1589_v36, %v1593_v22  ;;  %v9271_v30 = vcombine.low %v1589_v36, %v1593_v22  ;;  %v1636_v22 = vld [vmem:[#allocation8 + $0xa90] sm:$0xff] }
 0x393   :  { %8210 = vmatpush1.bf16.msra.mxu0 %v9221_v9  ;;  %v1600_v9 = vld [vmem:[#allocation8 + $0x970] sm:$0xff] }
 0x394   :  { %8538 = vmatpush1.bf16.msra.mxu1 %v9223_v26  ;;  %8211 = vmatprep.subr.bf16.mxu0 %v9230_v28  ;;  %v1597_v26 = vld [vmem:[#allocation8 + $0x958] sm:$0xff]  ;;  %v9278_v61 = vcombine.high %v1596_v25, %v1600_v9 }
 0x395   :  { %8539 = vmatprep.subr.bf16.mxu1 %v9232_v29  ;;  %v1601_v28 = vld [vmem:[#allocation8 + $0x978] sm:$0xff]  ;;  %v9269_v29 = vcombine.low %v1588_v21, %v1592_v37 }
 0x396   :  { %v9280_v32 = vcombine.high %v1597_v26, %v1601_v28  ;;  %v9279_v48 = vcombine.low %v1597_v26, %v1601_v28  ;;  %v1644_v28 = vld [vmem:[#allocation8 + $0xad0] sm:$0xff] }
 0x397   :  { %8212 = vmatpush1.bf16.msra.mxu0 %v9229_v34  ;;  %v1608_v34 = vld [vmem:[#allocation8 + $0x9b0] sm:$0xff] }
 0x398   :  { %8540 = vmatpush1.bf16.msra.mxu1 %v9231_v42  ;;  %8222 = vmatprep.subr.bf16.mxu0 %v9238_v43  ;;  %v1605_v42 = vld [vmem:[#allocation8 + $0x998] sm:$0xff]  ;;  %v9286_v50 = vcombine.high %v1604_v35, %v1608_v34  ;;  %v9285_v55 = vcombine.low %v1604_v35, %v1608_v34 }
 0x399   :  { %8550 = vmatprep.subr.bf16.mxu1 %v9240_v11  ;;  %v1609_v43 = vld [vmem:[#allocation8 + $0x9b8] sm:$0xff]  ;;  %v9277_v11 = vcombine.low %v1596_v25, %v1600_v9 }
 0x39a   :  { %8214 = vmatmul.mubr.bf16.vlgmr.msra.gmra.mrb[20].mxu0 %v10473_v33  ;;  %v9287_v56 = vcombine.low %v1605_v42, %v1609_v43 }
 0x39b   :  { %8542 = vmatmul.mubr.bf16.vlgmr.msra.gmra.mrb[20].mxu1 %v10473_v33  ;;  %8223 = vmatpush1.bf16.msra.mxu0 %v9237_v52  ;;  %v9255_v33 = vcombine.low %v1573_v63, %v1577_v18  ;;  %v9288_v52 = vcombine.high %v1605_v42, %v1609_v43  ;;  %v1620_v18 = vld [vmem:[#allocation8 + $0xa10] sm:$0xff] }
 0x39c   :  { %8254 = vmatprep.mubr.bf16.mxu0 %v10477_v46  ;;  %8551 = vmatpush1.bf16.msra.mxu1 %v9239_v54  ;;  %v1613_v54 = vld [vmem:[#allocation8 + $0x9d8] sm:$0xff]  ;;  %v1652_v43 = vld [vmem:[#allocation8 + $0xb10] sm:$0xff] }
 0x39d   :  { %8582 = vmatprep.mubr.bf16.mxu1 %v10477_v46  ;;  %8224 = vmatprep.subr.bf16.mxu0 %v9246_v10  ;;  %v9261_v46 = vcombine.low %v1580_v0, %v1584_v12  ;;  %v1617_v10 = vld [vmem:[#allocation8 + $0x9f8] sm:$0xff] }
 0x39e   :  { %8552 = vmatprep.subr.bf16.mxu1 %v9248_v59  ;;  %v9294_v59 = vcombine.high %v1612_v27, %v1616_v53  ;;  %v9296_v63 = vcombine.high %v1613_v54, %v1617_v10  ;;  %v9295_v0 = vcombine.low %v1613_v54, %v1617_v10  ;;  %v1660_v10 = vld [vmem:[#allocation8 + $0xb50] sm:$0xff] }
 0x39f   :  { %8225 = vmatpush1.bf16.msra.mxu0 %v9245_v3  ;;  %v1624_v3 = vld [vmem:[#allocation8 + $0xa30] sm:$0xff] }
 0x3a0   :  { %8553 = vmatpush1.bf16.msra.mxu1 %v9247_v5  ;;  %8226 = vmatprep.subr.bf16.mxu0 %v9254_v7  ;;  %v1621_v5 = vld [vmem:[#allocation8 + $0xa18] sm:$0xff]  ;;  %v9302_v12 = vcombine.high %v1620_v18, %v1624_v3 }
 0x3a1   :  { %8554 = vmatprep.subr.bf16.mxu1 %v9256_v44  ;;  %v1625_v7 = vld [vmem:[#allocation8 + $0xa38] sm:$0xff]  ;;  %v9293_v44 = vcombine.low %v1612_v27, %v1616_v53 }
 0x3a2   :  { %v9304_v39 = vcombine.high %v1621_v5, %v1625_v7  ;;  %v9303_v21 = vcombine.low %v1621_v5, %v1625_v7  ;;  %v1668_v7 = vld [vmem:[#allocation8 + $0xb90] sm:$0xff] }
 0x3a3   :  { %8227 = vmatpush1.bf16.msra.mxu0 %v9253_v62  ;;  %v1632_v62 = vld [vmem:[#allocation8 + $0xa70] sm:$0xff] }
 0x3a4   :  { %8555 = vmatpush1.bf16.msra.mxu1 %v9255_v33  ;;  %8228 = vmatprep.subr.bf16.mxu0 %v9262_v15  ;;  %v1629_v33 = vld [vmem:[#allocation8 + $0xa58] sm:$0xff]  ;;  %v9310_v37 = vcombine.high %v1628_v13, %v1632_v62 }
 0x3a5   :  { %8556 = vmatprep.subr.bf16.mxu1 %v9264_v40  ;;  %v1633_v15 = vld [vmem:[#allocation8 + $0xa78] sm:$0xff]  ;;  %v9301_v40 = vcombine.low %v1620_v18, %v1624_v3 }
 0x3a6   :  { %v9312_v36 = vcombine.high %v1629_v33, %v1633_v15  ;;  %v9311_v25 = vcombine.low %v1629_v33, %v1633_v15  ;;  %v1676_v15 = vld [vmem:[#allocation8 + $0xbd0] sm:$0xff] }
 0x3a7   :  { %8229 = vmatpush1.bf16.msra.mxu0 %v9261_v46  ;;  %v1640_v46 = vld [vmem:[#allocation8 + $0xab0] sm:$0xff] }
 0x3a8   :  { %8557 = vmatpush1.bf16.msra.mxu1 %v9263_v45  ;;  %8230 = vmatprep.subr.bf16.mxu0 %v9270_v4  ;;  %v1637_v45 = vld [vmem:[#allocation8 + $0xa98] sm:$0xff]  ;;  %v9318_v9 = vcombine.high %v1636_v22, %v1640_v46 }
 0x3a9   :  { %8558 = vmatprep.subr.bf16.mxu1 %v9272_v58  ;;  %v1641_v4 = vld [vmem:[#allocation8 + $0xab8] sm:$0xff]  ;;  %v9309_v58 = vcombine.low %v1628_v13, %v1632_v62 }
 0x3aa   :  { %v9320_v26 = vcombine.high %v1637_v45, %v1641_v4  ;;  %v9319_v35 = vcombine.low %v1637_v45, %v1641_v4  ;;  %v1684_v4 = vld [vmem:[#allocation8 + $0xc10] sm:$0xff] }
 0x3ab   :  { %8231 = vmatpush1.bf16.msra.mxu0 %v9269_v29  ;;  %v1648_v29 = vld [vmem:[#allocation8 + $0xaf0] sm:$0xff] }
 0x3ac   :  { %8559 = vmatpush1.bf16.msra.mxu1 %v9271_v30  ;;  %8232 = vmatprep.subr.bf16.mxu0 %v9278_v61  ;;  %v1645_v30 = vld [vmem:[#allocation8 + $0xad8] sm:$0xff]  ;;  %v9326_v34 = vcombine.high %v1644_v28, %v1648_v29 }
 0x3ad   :  { %8560 = vmatprep.subr.bf16.mxu1 %v9280_v32  ;;  %v1649_v61 = vld [vmem:[#allocation8 + $0xaf8] sm:$0xff]  ;;  %v9317_v32 = vcombine.low %v1636_v22, %v1640_v46 }
 0x3ae   :  { %v9328_v42 = vcombine.high %v1645_v30, %v1649_v61  ;;  %v9327_v27 = vcombine.low %v1645_v30, %v1649_v61  ;;  %v1692_v61 = vld [vmem:[#allocation8 + $0xc50] sm:$0xff] }
 0x3af   :  { %8233 = vmatpush1.bf16.msra.mxu0 %v9277_v11  ;;  %v1656_v11 = vld [vmem:[#allocation8 + $0xb30] sm:$0xff] }
 0x3b0   :  { %8561 = vmatpush1.bf16.msra.mxu1 %v9279_v48  ;;  %8234 = vmatprep.subr.bf16.mxu0 %v9286_v50  ;;  %v1653_v48 = vld [vmem:[#allocation8 + $0xb18] sm:$0xff]  ;;  %v9334_v53 = vcombine.high %v1652_v43, %v1656_v11 }
 0x3b1   :  { %8562 = vmatprep.subr.bf16.mxu1 %v9288_v52  ;;  %v1657_v50 = vld [vmem:[#allocation8 + $0xb38] sm:$0xff]  ;;  %v9325_v52 = vcombine.low %v1644_v28, %v1648_v29 }
 0x3b2   :  { %v9336_v54 = vcombine.high %v1653_v48, %v1657_v50  ;;  %v9335_v18 = vcombine.low %v1653_v48, %v1657_v50  ;;  %v1700_v48 = vld [vmem:[#allocation8 + $0xc90] sm:$0xff] }
 0x3b3   :  { %8235 = vmatpush1.bf16.msra.mxu0 %v9285_v55  ;;  %v1664_v55 = vld [vmem:[#allocation8 + $0xb70] sm:$0xff] }
 0x3b4   :  { %8563 = vmatpush1.bf16.msra.mxu1 %v9287_v56  ;;  %8236 = vmatprep.subr.bf16.mxu0 %v9294_v59  ;;  %v1661_v56 = vld [vmem:[#allocation8 + $0xb58] sm:$0xff]  ;;  %v9342_v3 = vcombine.high %v1660_v10, %v1664_v55  ;;  %v1704_v50 = vld [vmem:[#allocation8 + $0xcb0] sm:$0xff] }
 0x3b5   :  { %8564 = vmatprep.subr.bf16.mxu1 %v9296_v63  ;;  %v1665_v59 = vld [vmem:[#allocation8 + $0xb78] sm:$0xff]  ;;  %v9333_v63 = vcombine.low %v1652_v43, %v1656_v11 }
 0x3b6   :  { %v9344_v5 = vcombine.high %v1661_v56, %v1665_v59  ;;  %v9343_v13 = vcombine.low %v1661_v56, %v1665_v59  ;;  %v1708_v59 = vld [vmem:[#allocation8 + $0xcd0] sm:$0xff] }
 0x3b7   :  { %8237 = vmatpush1.bf16.msra.mxu0 %v9293_v44  ;;  %v1672_v44 = vld [vmem:[#allocation8 + $0xbb0] sm:$0xff] }
 0x3b8   :  { %8565 = vmatpush1.bf16.msra.mxu1 %v9295_v0  ;;  %8238 = vmatprep.subr.bf16.mxu0 %v9302_v12  ;;  %v1669_v0 = vld [vmem:[#allocation8 + $0xb98] sm:$0xff]  ;;  %v9350_v62 = vcombine.high %v1668_v7, %v1672_v44 }
 0x3b9   :  { %8566 = vmatprep.subr.bf16.mxu1 %v9304_v39  ;;  %v1673_v12 = vld [vmem:[#allocation8 + $0xbb8] sm:$0xff]  ;;  %v9341_v39 = vcombine.low %v1660_v10, %v1664_v55  ;;  %v9382_v55 = vcombine.high %v1700_v48, %v1704_v50 }
 0x3ba   :  { %v9352_v33 = vcombine.high %v1669_v0, %v1673_v12  ;;  %v9351_v22 = vcombine.low %v1669_v0, %v1673_v12  ;;  %v1716_v0 = vld [vmem:[#allocation8 + $0xd10] sm:$0xff] }
 0x3bb   :  { %8239 = vmatpush1.bf16.msra.mxu0 %v9301_v40  ;;  %v1680_v40 = vld [vmem:[#allocation8 + $0xbf0] sm:$0xff] }
 0x3bc   :  { %8567 = vmatpush1.bf16.msra.mxu1 %v9303_v21  ;;  %8240 = vmatprep.subr.bf16.mxu0 %v9310_v37  ;;  %v1677_v21 = vld [vmem:[#allocation8 + $0xbd8] sm:$0xff]  ;;  %v9358_v46 = vcombine.high %v1676_v15, %v1680_v40  ;;  %v1720_v12 = vld [vmem:[#allocation8 + $0xd30] sm:$0xff] }
 0x3bd   :  { %8568 = vmatprep.subr.bf16.mxu1 %v9312_v36  ;;  %v1681_v37 = vld [vmem:[#allocation8 + $0xbf8] sm:$0xff]  ;;  %v9349_v36 = vcombine.low %v1668_v7, %v1672_v44 }
 0x3be   :  { %v9360_v45 = vcombine.high %v1677_v21, %v1681_v37  ;;  %v9359_v28 = vcombine.low %v1677_v21, %v1681_v37  ;;  %v1728_v21 = vld [vmem:[#allocation8 + $0xd70] sm:$0xff]  ;;  %v1725_v37 = vld [vmem:[#allocation8 + $0xd58] sm:$0xff] }
 0x3bf   :  { %8241 = vmatpush1.bf16.msra.mxu0 %v9309_v58  ;;  %v1688_v58 = vld [vmem:[#allocation8 + $0xc30] sm:$0xff] }
 0x3c0   :  { %8569 = vmatpush1.bf16.msra.mxu1 %v9311_v25  ;;  %8242 = vmatprep.subr.bf16.mxu0 %v9318_v9  ;;  %v1685_v25 = vld [vmem:[#allocation8 + $0xc18] sm:$0xff]  ;;  %v9366_v29 = vcombine.high %v1684_v4, %v1688_v58 }
 0x3c1   :  { %8570 = vmatprep.subr.bf16.mxu1 %v9320_v26  ;;  %v1689_v9 = vld [vmem:[#allocation8 + $0xc38] sm:$0xff]  ;;  %v9357_v26 = vcombine.low %v1676_v15, %v1680_v40  ;;  %v1724_v40 = vld [vmem:[#allocation8 + $0xd50] sm:$0xff] }
 0x3c2   :  { %v9368_v30 = vcombine.high %v1685_v25, %v1689_v9  ;;  %v9367_v43 = vcombine.low %v1685_v25, %v1689_v9  ;;  %v1732_v25 = vld [vmem:[#allocation8 + $0xd90] sm:$0xff] }
 0x3c3   :  { %8243 = vmatpush1.bf16.msra.mxu0 %v9317_v32  ;;  %v1696_v32 = vld [vmem:[#allocation8 + $0xc70] sm:$0xff] }
 0x3c4   :  { %8571 = vmatpush1.bf16.msra.mxu1 %v9319_v35  ;;  %8244 = vmatprep.subr.bf16.mxu0 %v9326_v34  ;;  %v9365_v35 = vcombine.low %v1684_v4, %v1688_v58  ;;  %v1693_v34 = vld [vmem:[#allocation8 + $0xc58] sm:$0xff]  ;;  %v9374_v11 = vcombine.high %v1692_v61, %v1696_v32  ;;  %v9406_v4 = vcombine.high %v1724_v40, %v1728_v21  ;;  %v1736_v9 = vld [vmem:[#allocation8 + $0xdb0] sm:$0xff] }
 0x3c5   :  { %8572 = vmatprep.subr.bf16.mxu1 %v9328_v42  ;;  %v1697_v42 = vld [vmem:[#allocation8 + $0xc78] sm:$0xff] }
 0x3c6   :  { %v9375_v10 = vcombine.low %v1693_v34, %v1697_v42 }
 0x3c7   :  { %8245 = vmatpush1.bf16.msra.mxu0 %v9325_v52  ;;  %v9376_v52 = vcombine.high %v1693_v34, %v1697_v42  ;;  %v9414_v42 = vcombine.high %v1732_v25, %v1736_v9 }
 0x3c8   :  { %8573 = vmatpush1.bf16.msra.mxu1 %v9327_v27  ;;  %8246 = vmatprep.subr.bf16.mxu0 %v9334_v53  ;;  %v1701_v27 = vld [vmem:[#allocation8 + $0xc98] sm:$0xff] }
 0x3c9   :  { %8574 = vmatprep.subr.bf16.mxu1 %v9336_v54  ;;  %v1705_v53 = vld [vmem:[#allocation8 + $0xcb8] sm:$0xff]  ;;  %v9373_v54 = vcombine.low %v1692_v61, %v1696_v32  ;;  %v9405_v32 = vcombine.low %v1724_v40, %v1728_v21  ;;  %v1756_v40 = vld [vmem:[#allocation8 + $0xe50] sm:$0xff] }
 0x3ca   :  { %v9384_v56 = vcombine.high %v1701_v27, %v1705_v53  ;;  %v1760_v21 = vld [vmem:[#allocation8 + $0xe70] sm:$0xff] }
 0x3cb   :  { %8247 = vmatpush1.bf16.msra.mxu0 %v9333_v63  ;;  %v1712_v63 = vld [vmem:[#allocation8 + $0xcf0] sm:$0xff] }
 0x3cc   :  { %8575 = vmatpush1.bf16.msra.mxu1 %v9335_v18  ;;  %8248 = vmatprep.subr.bf16.mxu0 %v9342_v3  ;;  %v1709_v18 = vld [vmem:[#allocation8 + $0xcd8] sm:$0xff]  ;;  %v9390_v7 = vcombine.high %v1708_v59, %v1712_v63 }
 0x3cd   :  { %8576 = vmatprep.subr.bf16.mxu1 %v9344_v5  ;;  %v1713_v3 = vld [vmem:[#allocation8 + $0xcf8] sm:$0xff]  ;;  %v9381_v5 = vcombine.low %v1700_v48, %v1704_v50  ;;  %v1740_v48 = vld [vmem:[#allocation8 + $0xdd0] sm:$0xff] }
 0x3ce   :  { %v9392_v44 = vcombine.high %v1709_v18, %v1713_v3  ;;  %v1744_v50 = vld [vmem:[#allocation8 + $0xdf0] sm:$0xff] }
 0x3cf   :  { %8249 = vmatpush1.bf16.msra.mxu0 %v9341_v39  ;;  %v1717_v39 = vld [vmem:[#allocation8 + $0xd18] sm:$0xff] }
 0x3d0   :  { %8577 = vmatpush1.bf16.msra.mxu1 %v9343_v13  ;;  %8250 = vmatprep.subr.bf16.mxu0 %v9350_v62  ;;  %v1721_v13 = vld [vmem:[#allocation8 + $0xd38] sm:$0xff]  ;;  %v9391_v62 = vcombine.low %v1709_v18, %v1713_v3  ;;  %v9422_v3 = vcombine.high %v1740_v48, %v1744_v50 }
 0x3d1   :  { %8578 = vmatprep.subr.bf16.mxu1 %v9352_v33  ;;  %v9398_v33 = vcombine.high %v1716_v0, %v1720_v12  ;;  %v9400_v15 = vcombine.high %v1717_v39, %v1721_v13 }
 0x3d3   :  { %8251 = vmatpush1.bf16.msra.mxu0 %v9349_v36  ;;  %v1729_v36 = vld [vmem:[#allocation8 + $0xd78] sm:$0xff] }
 0x3d4   :  { %8579 = vmatpush1.bf16.msra.mxu1 %v9351_v22  ;;  %8252 = vmatprep.subr.bf16.mxu0 %v9358_v46  ;;  %v9397_v22 = vcombine.low %v1716_v0, %v1720_v12  ;;  %v2322_v46 = vld [vmem:[#allocation10] sm:$0xff]  ;;  %v9408_v58 = vcombine.high %v1725_v37, %v1729_v36  ;;  %v9407_v34 = vcombine.low %v1725_v37, %v1729_v36  ;;  %v1752_v0 = vld [vmem:[#allocation8 + $0xe30] sm:$0xff]  ;;  %v1757_v37 = vld [vmem:[#allocation8 + $0xe58] sm:$0xff] }
 0x3d5   :  { %8580 = vmatprep.subr.bf16.mxu1 %v9360_v45  ;;  %v9399_v45 = vcombine.low %v1717_v39, %v1721_v13  ;;  %v2331_v61 = vrot.slane %v2322_v46, %v10416_v19  ;;  %v1749_v39 = vld [vmem:[#allocation8 + $0xe18] sm:$0xff] }
 0x3d6   :  { %v1753_v13 = vld [vmem:[#allocation8 + $0xe38] sm:$0xff] }
 0x3d7   :  { %8253 = vmatpush1.bf16.msra.mxu0 %v9357_v26  ;;  %v2327_v26 = vrot.slane %v2322_v46, %v10411_v17  ;;  %v1761_v36 = vld [vmem:[#allocation8 + $0xe78] sm:$0xff] }
 0x3d8   :  { %8581 = vmatpush1.bf16.msra.mxu1 %v9359_v28  ;;  %8263 = vmatprep.subr.bf16.mxu0 %v9366_v29  ;;  %v1733_v28 = vld [vmem:[#allocation8 + $0xd98] sm:$0xff] }
 0x3d9   :  { %8591 = vmatprep.subr.bf16.mxu1 %v9368_v30  ;;  %v1737_v29 = vld [vmem:[#allocation8 + $0xdb8] sm:$0xff]  ;;  %v2335_v30 = vrot.slane %v2322_v46, %v10452_v38 }
 0x3da   :  { %8255 = vmatmul.mubr.bf16.vlgmr.msra.gmra.mrb[20].mxu0 %v10516_v14  ;;  %v9415_v18 = vcombine.low %v1733_v28, %v1737_v29 }
 0x3db   :  { %8583 = vmatmul.mubr.bf16.vlgmr.msra.gmra.mrb[20].mxu1 %v10516_v14  ;;  %8264 = vmatpush1.bf16.msra.mxu0 %v9365_v35  ;;  %v9383_v14 = vcombine.low %v1701_v27, %v1705_v53  ;;  %v2339_v35 = vrot.slane %v2322_v46, %v10423_v23  ;;  %v1741_v53 = vld [vmem:[#allocation8 + $0xdd8] sm:$0xff]  ;;  %v9431_v46 = vcombine.low %v1749_v39, %v1753_v13 }
 0x3dc   :  { %8295 = vmatprep.mubr.bf16.mxu0 %v10518_v16  ;;  %8592 = vmatpush1.bf16.msra.mxu1 %v9367_v43 }
 0x3dd   :  { %8623 = vmatprep.mubr.bf16.mxu1 %v10518_v16  ;;  %8265 = vmatprep.subr.bf16.mxu0 %v9374_v11  ;;  %v9389_v16 = vcombine.low %v1708_v59, %v1712_v63  ;;  %v9416_v11 = vcombine.high %v1733_v28, %v1737_v29  ;;  %v9437_v28 = vcombine.low %v1756_v40, %v1760_v21 }
 0x3de   :  { %8593 = vmatprep.subr.bf16.mxu1 %v9376_v52  ;;  %v9439_v29 = vcombine.low %v1757_v37, %v1761_v36 }
 0x3df   :  { %8266 = vmatpush1.bf16.msra.mxu0 %v9373_v54  ;;  %v1745_v54 = vld [vmem:[#allocation8 + $0xdf8] sm:$0xff] }
 0x3e0   :  { %8594 = vmatpush1.bf16.msra.mxu1 %v9375_v10  ;;  %8267 = vmatprep.subr.bf16.mxu0 %v9382_v55 }
 0x3e1   :  { %8595 = vmatprep.subr.bf16.mxu1 %v9384_v56  ;;  %v9413_v56 = vcombine.low %v1732_v25, %v1736_v9  ;;  %v1768_v25 = vld [vmem:[#allocation8 + $0xeb0] sm:$0xff]  ;;  %v1765_v9 = vld [vmem:[#allocation8 + $0xe98] sm:$0xff] }
 0x3e3   :  { %8268 = vmatpush1.bf16.msra.mxu0 %v9381_v5 }
 0x3e4   :  { %8596 = vmatpush1.bf16.msra.mxu1 %v9383_v14  ;;  %8269 = vmatprep.subr.bf16.mxu0 %v9390_v7  ;;  %v9424_v7 = vcombine.high %v1741_v53, %v1745_v54 }
 0x3e5   :  { %8597 = vmatprep.subr.bf16.mxu1 %v9392_v44  ;;  %v1748_v44 = vld [vmem:[#allocation8 + $0xe10] sm:$0xff] }
 0x3e7   :  { %8270 = vmatpush1.bf16.msra.mxu0 %v9389_v16  ;;  %v9421_v16 = vcombine.low %v1740_v48, %v1744_v50 }
 0x3e8   :  { %8598 = vmatpush1.bf16.msra.mxu1 %v9391_v62  ;;  %8271 = vmatprep.subr.bf16.mxu0 %v9398_v33  ;;  %v9423_v62 = vcombine.low %v1741_v53, %v1745_v54  ;;  %v9430_v33 = vcombine.high %v1748_v44, %v1752_v0  ;;  %v1785_v53 = vld [vmem:[#allocation8 + $0xf38] sm:$0xff] }
 0x3e9   :  { %8599 = vmatprep.subr.bf16.mxu1 %v9400_v15  ;;  %v9432_v15 = vcombine.high %v1749_v39, %v1753_v13 }
 0x3eb   :  { %8272 = vmatpush1.bf16.msra.mxu0 %v9397_v22  ;;  %v9429_v22 = vcombine.low %v1748_v44, %v1752_v0  ;;  %v1797_v44 = vld [vmem:[#allocation8 + $0xf98] sm:$0xff] }
 0x3ec   :  { %8600 = vmatpush1.bf16.msra.mxu1 %v9399_v45  ;;  %8273 = vmatprep.subr.bf16.mxu0 %v9406_v4  ;;  %v9438_v45 = vcombine.high %v1756_v40, %v1760_v21  ;;  %v9440_v4 = vcombine.high %v1757_v37, %v1761_v36  ;;  %v1801_v0 = vld [vmem:[#allocation8 + $0xfb8] sm:$0xff] }
 0x3ed   :  { %v7805_v43 = vpop.f32.mrb[16].mxu0  ;;  %8601 = vmatprep.subr.bf16.mxu1 %v9408_v58  ;;  %v1764_v58 = vld [vmem:[#allocation8 + $0xe90] sm:$0xff]  ;;  %v1809_v40 = vld [vmem:[#allocation8 + $0xff8] sm:$0xff]  ;;  %v9479_v37 = vcombine.low %v1797_v44, %v1801_v0 }
 0x3ee   :  { %v10009_v17 = vadd.f32 %v7805_v43, %v2327_v26  ;;  %v8133_v52 = vpop.f32.mrb[16].mxu1  ;;  %v7807_v27 = vpop.f32.mrb[17].mxu0  ;;  %v1769_v26 = vld [vmem:[#allocation8 + $0xeb8] sm:$0xff]  ;;  %v9445_v43 = vcombine.low %v1764_v58, %v1768_v25 }
 0x3ef   :  { %v10011_v38 = vadd.f32 %v8133_v52, %v2335_v30  ;;  %v10010_v10 = vadd.f32 %v7807_v27, %v2331_v61  ;;  %v8135_v19 = vpop.f32.mrb[17].mxu1  ;;  %v7809_v55 = vpop.f32.mrb[18].mxu0  ;;  %8274 = vmatpush1.bf16.msra.mxu0 %v9405_v32  ;;  %v9446_v30 = vcombine.high %v1764_v58, %v1768_v25  ;;  %v9448_v61 = vcombine.high %v1765_v9, %v1769_v26  ;;  %v1772_v32 = vld [vmem:[#allocation8 + $0xed0] sm:$0xff]  ;;  %v1781_v27 = vld [vmem:[#allocation8 + $0xf18] sm:$0xff] }
 0x3f0   :  { %v10012_v23 = vadd.f32 %v8135_v19, %v2339_v35  ;;  %v8137_v59 = vpop.f32.mrb[18].mxu1  ;;  %8602 = vmatpush1.bf16.msra.mxu1 %v9407_v34  ;;  %v7810_v63 = vpop.f32.mrb[19].mxu0  ;;  %8275 = vmatprep.subr.bf16.mxu0 %v9414_v42  ;;  %v1776_v35 = vld [vmem:[#allocation8 + $0xef0] sm:$0xff]  ;;  %v1773_v34 = vld [vmem:[#allocation8 + $0xed8] sm:$0xff]  ;;  %v9464_v19 = vcombine.high %v1781_v27, %v1785_v53 }
 0x3f1   :  { %v10005_v5 = vpack.c.bf16 %v10010_v10, %v10009_v17  ;;  %v8138_v14 = vpop.f32.mrb[19].mxu1  ;;  %8603 = vmatprep.subr.bf16.mxu1 %v9416_v11  ;;  %v1777_v42 = vld [vmem:[#allocation8 + $0xef8] sm:$0xff]  ;;  %v9447_v11 = vcombine.low %v1765_v9, %v1769_v26  ;;  %v9454_v48 = vcombine.high %v1772_v32, %v1776_v35  ;;  %v1780_v17 = vld [vmem:[#allocation8 + $0xf10] sm:$0xff]  ;;  %v9453_v54 = vcombine.low %v1772_v32, %v1776_v35 }
 0x3f2   :  { %v10006_v12 = vpack.c.bf16 %v10012_v23, %v10011_v38  ;;  %v9456_v50 = vcombine.high %v1773_v34, %v1777_v42  ;;  %v1784_v52 = vld [vmem:[#allocation8 + $0xf30] sm:$0xff]  ;;  %v9455_v38 = vcombine.low %v1773_v34, %v1777_v42  ;;  %v1789_v23 = vld [vmem:[#allocation8 + $0xf58] sm:$0xff] }
 0x3f3   :  { %8828 = vst [vmem:[#allocation11] sm:$0xff] %v10005_v5  ;;  %8276 = vmatpush1.bf16.msra.mxu0 %v9413_v56  ;;  %v9462_v10 = vcombine.high %v1780_v17, %v1784_v52  ;;  %v1788_v55 = vld [vmem:[#allocation8 + $0xf50] sm:$0xff]  ;;  %v1793_v59 = vld [vmem:[#allocation8 + $0xf78] sm:$0xff]  ;;  %v9461_v63 = vcombine.low %v1780_v17, %v1784_v52 }
 0x3f4   :  { %8829 = vst [vmem:[#allocation11 + $0x8] sm:$0xff] %v10006_v12  ;;  %8604 = vmatpush1.bf16.msra.mxu1 %v9415_v18  ;;  %8277 = vmatprep.subr.bf16.mxu0 %v9422_v3  ;;  %v1792_v56 = vld [vmem:[#allocation8 + $0xf70] sm:$0xff]  ;;  %v9463_v18 = vcombine.low %v1781_v27, %v1785_v53  ;;  %v9472_v5 = vcombine.high %v1789_v23, %v1793_v59  ;;  %v1817_v58 = vld [vmem:[#allocation8 + $0x1038] sm:$0xff] }
 0x3f5   :  { %8605 = vmatprep.subr.bf16.mxu1 %v9424_v7  ;;  %v9470_v3 = vcombine.high %v1788_v55, %v1792_v56  ;;  %v1796_v14 = vld [vmem:[#allocation8 + $0xf90] sm:$0xff]  ;;  %v9469_v12 = vcombine.low %v1788_v55, %v1792_v56  ;;  %v9471_v39 = vcombine.low %v1789_v23, %v1793_v59  ;;  %v1821_v32 = vld [vmem:[#allocation8 + $0x1058] sm:$0xff] }
 0x3f6   :  { %v1800_v7 = vld [vmem:[#allocation8 + $0xfb0] sm:$0xff]  ;;  %v1825_v35 = vld [vmem:[#allocation8 + $0x1078] sm:$0xff] }
 0x3f7   :  { %8278 = vmatpush1.bf16.msra.mxu0 %v9421_v16  ;;  %v9478_v13 = vcombine.high %v1796_v14, %v1800_v7  ;;  %v9480_v16 = vcombine.high %v1797_v44, %v1801_v0  ;;  %v9477_v21 = vcombine.low %v1796_v14, %v1800_v7  ;;  %v1833_v17 = vld [vmem:[#allocation8 + $0x10b8] sm:$0xff]  ;;  %v9503_v27 = vcombine.low %v1821_v32, %v1825_v35  ;;  %v1852_v0 = vld [vmem:[#allocation8 + $0x1150] sm:$0xff] }
 0x3f8   :  { %8606 = vmatpush1.bf16.msra.mxu1 %v9423_v62  ;;  %8279 = vmatprep.subr.bf16.mxu0 %v9430_v33  ;;  %v1804_v62 = vld [vmem:[#allocation8 + $0xfd0] sm:$0xff]  ;;  %v1841_v55 = vld [vmem:[#allocation8 + $0x10f8] sm:$0xff] }
 0x3f9   :  { %8607 = vmatprep.subr.bf16.mxu1 %v9432_v15  ;;  %v1808_v33 = vld [vmem:[#allocation8 + $0xff0] sm:$0xff]  ;;  %v1805_v15 = vld [vmem:[#allocation8 + $0xfd8] sm:$0xff] }
 0x3fa   :  { %v9486_v36 = vcombine.high %v1804_v62, %v1808_v33  ;;  %v9485_v25 = vcombine.low %v1804_v62, %v1808_v33  ;;  %v9487_v9 = vcombine.low %v1805_v15, %v1809_v40 }
 0x3fb   :  { %8280 = vmatpush1.bf16.msra.mxu0 %v9429_v22  ;;  %v9488_v22 = vcombine.high %v1805_v15, %v1809_v40  ;;  %v1860_v40 = vld [vmem:[#allocation8 + $0x1190] sm:$0xff] }
 0x3fc   :  { %8608 = vmatpush1.bf16.msra.mxu1 %v9431_v46  ;;  %8281 = vmatprep.subr.bf16.mxu0 %v9438_v45  ;;  %v1812_v46 = vld [vmem:[#allocation8 + $0x1010] sm:$0xff] }
 0x3fd   :  { %8609 = vmatprep.subr.bf16.mxu1 %v9440_v4  ;;  %v1816_v45 = vld [vmem:[#allocation8 + $0x1030] sm:$0xff]  ;;  %v1813_v4 = vld [vmem:[#allocation8 + $0x1018] sm:$0xff] }
 0x3fe   :  { %v9494_v26 = vcombine.high %v1812_v46, %v1816_v45  ;;  %v9495_v34 = vcombine.low %v1813_v4, %v1817_v58 }
 0x3ff   :  { %8282 = vmatpush1.bf16.msra.mxu0 %v9437_v28  ;;  %v9496_v28 = vcombine.high %v1813_v4, %v1817_v58  ;;  %v1868_v58 = vld [vmem:[#allocation8 + $0x11d0] sm:$0xff] }
 0x400   :  { %8610 = vmatpush1.bf16.msra.mxu1 %v9439_v29  ;;  %8283 = vmatprep.subr.bf16.mxu0 %v9446_v30  ;;  %v1820_v29 = vld [vmem:[#allocation8 + $0x1050] sm:$0xff] }
 0x401   :  { %8611 = vmatprep.subr.bf16.mxu1 %v9448_v61  ;;  %v1824_v30 = vld [vmem:[#allocation8 + $0x1070] sm:$0xff]  ;;  %v9493_v61 = vcombine.low %v1812_v46, %v1816_v45 }
 0x402   :  { %v9502_v42 = vcombine.high %v1820_v29, %v1824_v30  ;;  %v9501_v52 = vcombine.low %v1820_v29, %v1824_v30 }
 0x403   :  { %8284 = vmatpush1.bf16.msra.mxu0 %v9445_v43  ;;  %v1828_v43 = vld [vmem:[#allocation8 + $0x1090] sm:$0xff] }
 0x404   :  { %8612 = vmatpush1.bf16.msra.mxu1 %v9447_v11  ;;  %8285 = vmatprep.subr.bf16.mxu0 %v9454_v48  ;;  %v1832_v11 = vld [vmem:[#allocation8 + $0x10b0] sm:$0xff]  ;;  %v9504_v48 = vcombine.high %v1821_v32, %v1825_v35 }
 0x405   :  { %8613 = vmatprep.subr.bf16.mxu1 %v9456_v50  ;;  %v1829_v50 = vld [vmem:[#allocation8 + $0x1098] sm:$0xff]  ;;  %v9510_v53 = vcombine.high %v1828_v43, %v1832_v11  ;;  %v9509_v56 = vcombine.low %v1828_v43, %v1832_v11  ;;  %v1876_v32 = vld [vmem:[#allocation8 + $0x1210] sm:$0xff] }
 0x406   :  { %v1880_v35 = vld [vmem:[#allocation8 + $0x1230] sm:$0xff] }
 0x407   :  { %8286 = vmatpush1.bf16.msra.mxu0 %v9453_v54  ;;  %v9512_v54 = vcombine.high %v1829_v50, %v1833_v17 }
 0x408   :  { %8614 = vmatpush1.bf16.msra.mxu1 %v9455_v38  ;;  %8287 = vmatprep.subr.bf16.mxu0 %v9462_v10  ;;  %v1836_v38 = vld [vmem:[#allocation8 + $0x10d0] sm:$0xff] }
 0x409   :  { %8615 = vmatprep.subr.bf16.mxu1 %v9464_v19  ;;  %v1840_v10 = vld [vmem:[#allocation8 + $0x10f0] sm:$0xff]  ;;  %v1837_v19 = vld [vmem:[#allocation8 + $0x10d8] sm:$0xff] }
 0x40a   :  { %v9518_v23 = vcombine.high %v1836_v38, %v1840_v10  ;;  %v9520_v59 = vcombine.high %v1837_v19, %v1841_v55  ;;  %v9519_v14 = vcombine.low %v1837_v19, %v1841_v55  ;;  %v1892_v55 = vld [vmem:[#allocation8 + $0x1290] sm:$0xff] }
 0x40b   :  { %8288 = vmatpush1.bf16.msra.mxu0 %v9461_v63  ;;  %v1844_v63 = vld [vmem:[#allocation8 + $0x1110] sm:$0xff] }
 0x40c   :  { %8616 = vmatpush1.bf16.msra.mxu1 %v9463_v18  ;;  %8289 = vmatprep.subr.bf16.mxu0 %v9470_v3  ;;  %v1848_v18 = vld [vmem:[#allocation8 + $0x1130] sm:$0xff]  ;;  %v1845_v3 = vld [vmem:[#allocation8 + $0x1118] sm:$0xff] }
 0x40d   :  { %8617 = vmatprep.subr.bf16.mxu1 %v9472_v5  ;;  %v1849_v5 = vld [vmem:[#allocation8 + $0x1138] sm:$0xff]  ;;  %v9526_v7 = vcombine.high %v1844_v63, %v1848_v18 }
 0x40e   :  { %v9528_v44 = vcombine.high %v1845_v3, %v1849_v5  ;;  %v9527_v62 = vcombine.low %v1845_v3, %v1849_v5  ;;  %v1900_v5 = vld [vmem:[#allocation8 + $0x12d0] sm:$0xff] }
 0x40f   :  { %8290 = vmatpush1.bf16.msra.mxu0 %v9469_v12  ;;  %v1856_v12 = vld [vmem:[#allocation8 + $0x1170] sm:$0xff] }
 0x410   :  { %8618 = vmatpush1.bf16.msra.mxu1 %v9471_v39  ;;  %8291 = vmatprep.subr.bf16.mxu0 %v9478_v13  ;;  %v1853_v39 = vld [vmem:[#allocation8 + $0x1158] sm:$0xff]  ;;  %v9534_v33 = vcombine.high %v1852_v0, %v1856_v12 }
 0x411   :  { %8619 = vmatprep.subr.bf16.mxu1 %v9480_v16  ;;  %v1857_v13 = vld [vmem:[#allocation8 + $0x1178] sm:$0xff]  ;;  %v9525_v16 = vcombine.low %v1844_v63, %v1848_v18 }
 0x412   :  { %v9536_v15 = vcombine.high %v1853_v39, %v1857_v13  ;;  %v9535_v46 = vcombine.low %v1853_v39, %v1857_v13  ;;  %v1908_v13 = vld [vmem:[#allocation8 + $0x1310] sm:$0xff] }
 0x413   :  { %8292 = vmatpush1.bf16.msra.mxu0 %v9477_v21  ;;  %v1864_v21 = vld [vmem:[#allocation8 + $0x11b0] sm:$0xff] }
 0x414   :  { %8620 = vmatpush1.bf16.msra.mxu1 %v9479_v37  ;;  %8293 = vmatprep.subr.bf16.mxu0 %v9486_v36  ;;  %v1861_v37 = vld [vmem:[#allocation8 + $0x1198] sm:$0xff]  ;;  %v9542_v45 = vcombine.high %v1860_v40, %v1864_v21 }
 0x415   :  { %8621 = vmatprep.subr.bf16.mxu1 %v9488_v22  ;;  %v1865_v36 = vld [vmem:[#allocation8 + $0x11b8] sm:$0xff]  ;;  %v9533_v22 = vcombine.low %v1852_v0, %v1856_v12 }
 0x416   :  { %v9544_v4 = vcombine.high %v1861_v37, %v1865_v36  ;;  %v9543_v29 = vcombine.low %v1861_v37, %v1865_v36  ;;  %v1916_v36 = vld [vmem:[#allocation8 + $0x1350] sm:$0xff] }
 0x417   :  { %8294 = vmatpush1.bf16.msra.mxu0 %v9485_v25  ;;  %v1872_v25 = vld [vmem:[#allocation8 + $0x11f0] sm:$0xff] }
 0x418   :  { %8622 = vmatpush1.bf16.msra.mxu1 %v9487_v9  ;;  %8304 = vmatprep.subr.bf16.mxu0 %v9494_v26  ;;  %v1869_v9 = vld [vmem:[#allocation8 + $0x11d8] sm:$0xff]  ;;  %v9550_v30 = vcombine.high %v1868_v58, %v1872_v25  ;;  %v9549_v43 = vcombine.low %v1868_v58, %v1872_v25 }
 0x419   :  { %8632 = vmatprep.subr.bf16.mxu1 %v9496_v28  ;;  %v1873_v26 = vld [vmem:[#allocation8 + $0x11f8] sm:$0xff]  ;;  %v9541_v28 = vcombine.low %v1860_v40, %v1864_v21 }
 0x41a   :  { %8296 = vmatmul.mubr.bf16.vlgmr.msra.gmra.mrb[20].mxu0 %v10529_v6  ;;  %v9551_v11 = vcombine.low %v1869_v9, %v1873_v26 }
 0x41b   :  { %8624 = vmatmul.mubr.bf16.vlgmr.msra.gmra.mrb[20].mxu1 %v10529_v6  ;;  %8305 = vmatpush1.bf16.msra.mxu0 %v9493_v61  ;;  %v9511_v6 = vcombine.low %v1829_v50, %v1833_v17  ;;  %v9552_v61 = vcombine.high %v1869_v9, %v1873_v26  ;;  %v1884_v17 = vld [vmem:[#allocation8 + $0x1250] sm:$0xff] }
 0x41c   :  { %8336 = vmatprep.mubr.bf16.mxu0 %v10531_v51  ;;  %8633 = vmatpush1.bf16.msra.mxu1 %v9495_v34  ;;  %v1877_v34 = vld [vmem:[#allocation8 + $0x1218] sm:$0xff]  ;;  %v1924_v26 = vld [vmem:[#allocation8 + $0x1390] sm:$0xff] }
 0x41d   :  { %8664 = vmatprep.mubr.bf16.mxu1 %v10531_v51  ;;  %8306 = vmatprep.subr.bf16.mxu0 %v9502_v42  ;;  %v9517_v51 = vcombine.low %v1836_v38, %v1840_v10  ;;  %v1881_v42 = vld [vmem:[#allocation8 + $0x1238] sm:$0xff] }
 0x41e   :  { %8634 = vmatprep.subr.bf16.mxu1 %v9504_v48  ;;  %v9558_v48 = vcombine.high %v1876_v32, %v1880_v35  ;;  %v9560_v50 = vcombine.high %v1877_v34, %v1881_v42  ;;  %v9559_v38 = vcombine.low %v1877_v34, %v1881_v42  ;;  %v1932_v42 = vld [vmem:[#allocation8 + $0x13d0] sm:$0xff] }
 0x41f   :  { %8307 = vmatpush1.bf16.msra.mxu0 %v9501_v52  ;;  %v1888_v52 = vld [vmem:[#allocation8 + $0x1270] sm:$0xff] }
 0x420   :  { %8635 = vmatpush1.bf16.msra.mxu1 %v9503_v27  ;;  %8308 = vmatprep.subr.bf16.mxu0 %v9510_v53  ;;  %v1885_v27 = vld [vmem:[#allocation8 + $0x1258] sm:$0xff]  ;;  %v9566_v10 = vcombine.high %v1884_v17, %v1888_v52 }
 0x421   :  { %8636 = vmatprep.subr.bf16.mxu1 %v9512_v54  ;;  %v1889_v53 = vld [vmem:[#allocation8 + $0x1278] sm:$0xff]  ;;  %v9557_v54 = vcombine.low %v1876_v32, %v1880_v35 }
 0x422   :  { %v9568_v19 = vcombine.high %v1885_v27, %v1889_v53  ;;  %v9567_v63 = vcombine.low %v1885_v27, %v1889_v53  ;;  %v1940_v53 = vld [vmem:[#allocation8 + $0x1410] sm:$0xff] }
 0x423   :  { %8309 = vmatpush1.bf16.msra.mxu0 %v9509_v56  ;;  %v1896_v56 = vld [vmem:[#allocation8 + $0x12b0] sm:$0xff] }
 0x424   :  { %8637 = vmatpush1.bf16.msra.mxu1 %v9511_v6  ;;  %8310 = vmatprep.subr.bf16.mxu0 %v9518_v23  ;;  %v1893_v6 = vld [vmem:[#allocation8 + $0x1298] sm:$0xff]  ;;  %v9574_v18 = vcombine.high %v1892_v55, %v1896_v56 }
 0x425   :  { %8638 = vmatprep.subr.bf16.mxu1 %v9520_v59  ;;  %v1897_v23 = vld [vmem:[#allocation8 + $0x12b8] sm:$0xff]  ;;  %v9565_v59 = vcombine.low %v1884_v17, %v1888_v52 }
 0x426   :  { %v9576_v3 = vcombine.high %v1893_v6, %v1897_v23  ;;  %v9575_v0 = vcombine.low %v1893_v6, %v1897_v23  ;;  %v1948_v23 = vld [vmem:[#allocation8 + $0x1450] sm:$0xff] }
 0x427   :  { %8311 = vmatpush1.bf16.msra.mxu0 %v9517_v51  ;;  %v1904_v51 = vld [vmem:[#allocation8 + $0x12f0] sm:$0xff] }
 0x428   :  { %8639 = vmatpush1.bf16.msra.mxu1 %v9519_v14  ;;  %8312 = vmatprep.subr.bf16.mxu0 %v9526_v7  ;;  %v1901_v14 = vld [vmem:[#allocation8 + $0x12d8] sm:$0xff]  ;;  %v9582_v12 = vcombine.high %v1900_v5, %v1904_v51 }
 0x429   :  { %8640 = vmatprep.subr.bf16.mxu1 %v9528_v44  ;;  %v1905_v7 = vld [vmem:[#allocation8 + $0x12f8] sm:$0xff]  ;;  %v9573_v44 = vcombine.low %v1892_v55, %v1896_v56 }
 0x42a   :  { %v9584_v39 = vcombine.high %v1901_v14, %v1905_v7  ;;  %v9583_v40 = vcombine.low %v1901_v14, %v1905_v7  ;;  %v1956_v14 = vld [vmem:[#allocation8 + $0x1490] sm:$0xff] }
 0x42b   :  { %8313 = vmatpush1.bf16.msra.mxu0 %v9525_v16  ;;  %v1912_v16 = vld [vmem:[#allocation8 + $0x1330] sm:$0xff] }
 0x42c   :  { %8641 = vmatpush1.bf16.msra.mxu1 %v9527_v62  ;;  %8314 = vmatprep.subr.bf16.mxu0 %v9534_v33  ;;  %v1909_v62 = vld [vmem:[#allocation8 + $0x1318] sm:$0xff]  ;;  %v9590_v21 = vcombine.high %v1908_v13, %v1912_v16  ;;  %v1960_v7 = vld [vmem:[#allocation8 + $0x14b0] sm:$0xff] }
 0x42d   :  { %8642 = vmatprep.subr.bf16.mxu1 %v9536_v15  ;;  %v1913_v33 = vld [vmem:[#allocation8 + $0x1338] sm:$0xff]  ;;  %v9581_v15 = vcombine.low %v1900_v5, %v1904_v51 }
 0x42e   :  { %v9592_v37 = vcombine.high %v1909_v62, %v1913_v33  ;;  %v9591_v58 = vcombine.low %v1909_v62, %v1913_v33  ;;  %v1964_v33 = vld [vmem:[#allocation8 + $0x14d0] sm:$0xff] }
 0x42f   :  { %8315 = vmatpush1.bf16.msra.mxu0 %v9533_v22  ;;  %v1920_v22 = vld [vmem:[#allocation8 + $0x1370] sm:$0xff] }
 0x430   :  { %8643 = vmatpush1.bf16.msra.mxu1 %v9535_v46  ;;  %8316 = vmatprep.subr.bf16.mxu0 %v9542_v45  ;;  %v1917_v46 = vld [vmem:[#allocation8 + $0x1358] sm:$0xff]  ;;  %v9598_v25 = vcombine.high %v1916_v36, %v1920_v22 }
 0x431   :  { %8644 = vmatprep.subr.bf16.mxu1 %v9544_v4  ;;  %v1921_v45 = vld [vmem:[#allocation8 + $0x1378] sm:$0xff]  ;;  %v9589_v4 = vcombine.low %v1908_v13, %v1912_v16  ;;  %v9638_v16 = vcombine.high %v1956_v14, %v1960_v7 }
 0x432   :  { %v9600_v9 = vcombine.high %v1917_v46, %v1921_v45  ;;  %v9599_v32 = vcombine.low %v1917_v46, %v1921_v45  ;;  %v1972_v46 = vld [vmem:[#allocation8 + $0x1510] sm:$0xff] }
 0x433   :  { %8317 = vmatpush1.bf16.msra.mxu0 %v9541_v28  ;;  %v1928_v28 = vld [vmem:[#allocation8 + $0x13b0] sm:$0xff] }
 0x434   :  { %8645 = vmatpush1.bf16.msra.mxu1 %v9543_v29  ;;  %8318 = vmatprep.subr.bf16.mxu0 %v9550_v30  ;;  %v1925_v29 = vld [vmem:[#allocation8 + $0x1398] sm:$0xff]  ;;  %v9606_v35 = vcombine.high %v1924_v26, %v1928_v28  ;;  %v1976_v45 = vld [vmem:[#allocation8 + $0x1530] sm:$0xff] }
 0x435   :  { %8646 = vmatprep.subr.bf16.mxu1 %v9552_v61  ;;  %v1929_v30 = vld [vmem:[#allocation8 + $0x13b8] sm:$0xff]  ;;  %v9597_v61 = vcombine.low %v1916_v36, %v1920_v22 }
 0x436   :  { %v9608_v34 = vcombine.high %v1925_v29, %v1929_v30  ;;  %v9607_v17 = vcombine.low %v1925_v29, %v1929_v30  ;;  %v1984_v29 = vld [vmem:[#allocation8 + $0x1570] sm:$0xff]  ;;  %v1981_v30 = vld [vmem:[#allocation8 + $0x1558] sm:$0xff] }
 0x437   :  { %8319 = vmatpush1.bf16.msra.mxu0 %v9549_v43  ;;  %v1936_v43 = vld [vmem:[#allocation8 + $0x13f0] sm:$0xff] }
 0x438   :  { %8647 = vmatpush1.bf16.msra.mxu1 %v9551_v11  ;;  %8320 = vmatprep.subr.bf16.mxu0 %v9558_v48  ;;  %v1933_v11 = vld [vmem:[#allocation8 + $0x13d8] sm:$0xff]  ;;  %v9614_v52 = vcombine.high %v1932_v42, %v1936_v43 }
 0x439   :  { %8648 = vmatprep.subr.bf16.mxu1 %v9560_v50  ;;  %v1937_v48 = vld [vmem:[#allocation8 + $0x13f8] sm:$0xff]  ;;  %v9605_v50 = vcombine.low %v1924_v26, %v1928_v28  ;;  %v1980_v28 = vld [vmem:[#allocation8 + $0x1550] sm:$0xff] }
 0x43a   :  { %v9616_v27 = vcombine.high %v1933_v11, %v1937_v48  ;;  %v9615_v55 = vcombine.low %v1933_v11, %v1937_v48  ;;  %v1992_v11 = vld [vmem:[#allocation8 + $0x15b0] sm:$0xff]  ;;  %v1989_v48 = vld [vmem:[#allocation8 + $0x1598] sm:$0xff] }
 0x43b   :  { %8321 = vmatpush1.bf16.msra.mxu0 %v9557_v54  ;;  %v1944_v54 = vld [vmem:[#allocation8 + $0x1430] sm:$0xff] }
 0x43c   :  { %8649 = vmatpush1.bf16.msra.mxu1 %v9559_v38  ;;  %8322 = vmatprep.subr.bf16.mxu0 %v9566_v10  ;;  %v1941_v38 = vld [vmem:[#allocation8 + $0x1418] sm:$0xff]  ;;  %v9622_v56 = vcombine.high %v1940_v53, %v1944_v54 }
 0x43d   :  { %8650 = vmatprep.subr.bf16.mxu1 %v9568_v19  ;;  %v1945_v10 = vld [vmem:[#allocation8 + $0x1438] sm:$0xff]  ;;  %v9613_v19 = vcombine.low %v1932_v42, %v1936_v43  ;;  %v1988_v43 = vld [vmem:[#allocation8 + $0x1590] sm:$0xff] }
 0x43e   :  { %v9624_v6 = vcombine.high %v1941_v38, %v1945_v10  ;;  %v9623_v5 = vcombine.low %v1941_v38, %v1945_v10  ;;  %v2000_v38 = vld [vmem:[#allocation8 + $0x15f0] sm:$0xff]  ;;  %v1997_v10 = vld [vmem:[#allocation8 + $0x15d8] sm:$0xff] }
 0x43f   :  { %8323 = vmatpush1.bf16.msra.mxu0 %v9565_v59  ;;  %v1952_v59 = vld [vmem:[#allocation8 + $0x1470] sm:$0xff] }
 0x440   :  { %8651 = vmatpush1.bf16.msra.mxu1 %v9567_v63  ;;  %8324 = vmatprep.subr.bf16.mxu0 %v9574_v18  ;;  %v9621_v63 = vcombine.low %v1940_v53, %v1944_v54  ;;  %v1949_v18 = vld [vmem:[#allocation8 + $0x1458] sm:$0xff]  ;;  %v9630_v51 = vcombine.high %v1948_v23, %v1952_v59  ;;  %v1996_v54 = vld [vmem:[#allocation8 + $0x15d0] sm:$0xff] }
 0x441   :  { %8652 = vmatprep.subr.bf16.mxu1 %v9576_v3  ;;  %v1953_v3 = vld [vmem:[#allocation8 + $0x1478] sm:$0xff] }
 0x442   :  { %v9631_v13 = vcombine.low %v1949_v18, %v1953_v3 }
 0x443   :  { %8325 = vmatpush1.bf16.msra.mxu0 %v9573_v44  ;;  %v9632_v44 = vcombine.high %v1949_v18, %v1953_v3  ;;  %v2005_v18 = vld [vmem:[#allocation8 + $0x1618] sm:$0xff] }
 0x444   :  { %8653 = vmatpush1.bf16.msra.mxu1 %v9575_v0  ;;  %8326 = vmatprep.subr.bf16.mxu0 %v9582_v12  ;;  %v1957_v0 = vld [vmem:[#allocation8 + $0x1498] sm:$0xff] }
 0x445   :  { %8654 = vmatprep.subr.bf16.mxu1 %v9584_v39  ;;  %v1961_v12 = vld [vmem:[#allocation8 + $0x14b8] sm:$0xff]  ;;  %v9629_v39 = vcombine.low %v1948_v23, %v1952_v59  ;;  %v2004_v59 = vld [vmem:[#allocation8 + $0x1610] sm:$0xff] }
 0x446   :  { %v9640_v62 = vcombine.high %v1957_v0, %v1961_v12  ;;  %v2009_v3 = vld [vmem:[#allocation8 + $0x1638] sm:$0xff] }
 0x447   :  { %8327 = vmatpush1.bf16.msra.mxu0 %v9581_v15  ;;  %v1968_v15 = vld [vmem:[#allocation8 + $0x14f0] sm:$0xff] }
 0x448   :  { %8655 = vmatpush1.bf16.msra.mxu1 %v9583_v40  ;;  %8328 = vmatprep.subr.bf16.mxu0 %v9590_v21  ;;  %v1965_v40 = vld [vmem:[#allocation8 + $0x14d8] sm:$0xff]  ;;  %v9646_v36 = vcombine.high %v1964_v33, %v1968_v15 }
 0x449   :  { %8656 = vmatprep.subr.bf16.mxu1 %v9592_v37  ;;  %v1969_v21 = vld [vmem:[#allocation8 + $0x14f8] sm:$0xff]  ;;  %v9637_v37 = vcombine.low %v1956_v14, %v1960_v7  ;;  %v9688_v7 = vcombine.high %v2005_v18, %v2009_v3 }
 0x44a   :  { %v9648_v22 = vcombine.high %v1965_v40, %v1969_v21 }
 0x44b   :  { %8329 = vmatpush1.bf16.msra.mxu0 %v9589_v4  ;;  %v1973_v4 = vld [vmem:[#allocation8 + $0x1518] sm:$0xff] }
 0x44c   :  { %8657 = vmatpush1.bf16.msra.mxu1 %v9591_v58  ;;  %8330 = vmatprep.subr.bf16.mxu0 %v9598_v25  ;;  %v1977_v58 = vld [vmem:[#allocation8 + $0x1538] sm:$0xff]  ;;  %v9647_v25 = vcombine.low %v1965_v40, %v1969_v21  ;;  %v2024_v40 = vld [vmem:[#allocation8 + $0x16b0] sm:$0xff] }
 0x44d   :  { %8658 = vmatprep.subr.bf16.mxu1 %v9600_v9  ;;  %v9654_v9 = vcombine.high %v1972_v46, %v1976_v45  ;;  %v9656_v26 = vcombine.high %v1973_v4, %v1977_v58  ;;  %v2021_v21 = vld [vmem:[#allocation8 + $0x1698] sm:$0xff] }
 0x44f   :  { %8331 = vmatpush1.bf16.msra.mxu0 %v9597_v61  ;;  %v1985_v61 = vld [vmem:[#allocation8 + $0x1578] sm:$0xff] }
 0x450   :  { %8659 = vmatpush1.bf16.msra.mxu1 %v9599_v32  ;;  %8332 = vmatprep.subr.bf16.mxu0 %v9606_v35  ;;  %v9653_v32 = vcombine.low %v1972_v46, %v1976_v45  ;;  %v9655_v35 = vcombine.low %v1973_v4, %v1977_v58  ;;  %v9664_v42 = vcombine.high %v1981_v30, %v1985_v61  ;;  %v2028_v45 = vld [vmem:[#allocation8 + $0x16d0] sm:$0xff]  ;;  %v2029_v58 = vld [vmem:[#allocation8 + $0x16d8] sm:$0xff] }
 0x451   :  { %8660 = vmatprep.subr.bf16.mxu1 %v9608_v34  ;;  %v9662_v34 = vcombine.high %v1980_v28, %v1984_v29  ;;  %v2032_v4 = vld [vmem:[#allocation8 + $0x16f0] sm:$0xff] }
 0x453   :  { %8333 = vmatpush1.bf16.msra.mxu0 %v9605_v50  ;;  %v1993_v50 = vld [vmem:[#allocation8 + $0x15b8] sm:$0xff] }
 0x454   :  { %8661 = vmatpush1.bf16.msra.mxu1 %v9607_v17  ;;  %8334 = vmatprep.subr.bf16.mxu0 %v9614_v52  ;;  %v9661_v17 = vcombine.low %v1980_v28, %v1984_v29  ;;  %v9663_v52 = vcombine.low %v1981_v30, %v1985_v61  ;;  %v9672_v53 = vcombine.high %v1989_v48, %v1993_v50  ;;  %v2036_v29 = vld [vmem:[#allocation8 + $0x1710] sm:$0xff]  ;;  %v2037_v61 = vld [vmem:[#allocation8 + $0x1718] sm:$0xff] }
 0x455   :  { %8662 = vmatprep.subr.bf16.mxu1 %v9616_v27  ;;  %v9670_v27 = vcombine.high %v1988_v43, %v1992_v11  ;;  %v2040_v30 = vld [vmem:[#allocation8 + $0x1730] sm:$0xff] }
 0x457   :  { %8335 = vmatpush1.bf16.msra.mxu0 %v9613_v19  ;;  %v2001_v19 = vld [vmem:[#allocation8 + $0x15f8] sm:$0xff] }
 0x458   :  { %8663 = vmatpush1.bf16.msra.mxu1 %v9615_v55  ;;  %8345 = vmatprep.subr.bf16.mxu0 %v9622_v56  ;;  %v9669_v55 = vcombine.low %v1988_v43, %v1992_v11  ;;  %v9671_v56 = vcombine.low %v1989_v48, %v1993_v50  ;;  %v9680_v23 = vcombine.high %v1997_v10, %v2001_v19  ;;  %v2044_v11 = vld [vmem:[#allocation8 + $0x1750] sm:$0xff]  ;;  %v2045_v50 = vld [vmem:[#allocation8 + $0x1758] sm:$0xff] }
 0x459   :  { %8673 = vmatprep.subr.bf16.mxu1 %v9624_v6  ;;  %v9678_v6 = vcombine.high %v1996_v54, %v2000_v38  ;;  %v2048_v48 = vld [vmem:[#allocation8 + $0x1770] sm:$0xff] }
 0x45a   :  { %8337 = vmatmul.mubr.bf16.vlgmr.msra.gmra.mrb[20].mxu0 %v10540_v2 }
 0x45b   :  { %8665 = vmatmul.mubr.bf16.vlgmr.msra.gmra.mrb[20].mxu1 %v10540_v2  ;;  %8346 = vmatpush1.bf16.msra.mxu0 %v9621_v63  ;;  %v9639_v2 = vcombine.low %v1957_v0, %v1961_v12  ;;  %v2008_v63 = vld [vmem:[#allocation8 + $0x1630] sm:$0xff]  ;;  %v2013_v12 = vld [vmem:[#allocation8 + $0x1658] sm:$0xff] }
 0x45c   :  { %8377 = vmatprep.mubr.bf16.mxu0 %v10542_v8  ;;  %8674 = vmatpush1.bf16.msra.mxu1 %v9623_v5  ;;  %v9677_v5 = vcombine.low %v1996_v54, %v2000_v38  ;;  %v9686_v14 = vcombine.high %v2004_v59, %v2008_v63  ;;  %v2016_v0 = vld [vmem:[#allocation8 + $0x1670] sm:$0xff] }
 0x45d   :  { %8705 = vmatprep.mubr.bf16.mxu1 %v10542_v8  ;;  %8347 = vmatprep.subr.bf16.mxu0 %v9630_v51  ;;  %v9645_v8 = vcombine.low %v1964_v33, %v1968_v15  ;;  %v9679_v51 = vcombine.low %v1997_v10, %v2001_v19  ;;  %v2020_v15 = vld [vmem:[#allocation8 + $0x1690] sm:$0xff]  ;;  %v2053_v19 = vld [vmem:[#allocation8 + $0x1798] sm:$0xff] }
 0x45e   :  { %8675 = vmatprep.subr.bf16.mxu1 %v9632_v44  ;;  %v2012_v44 = vld [vmem:[#allocation8 + $0x1650] sm:$0xff] }
 0x45f   :  { %8348 = vmatpush1.bf16.msra.mxu0 %v9629_v39  ;;  %v2017_v39 = vld [vmem:[#allocation8 + $0x1678] sm:$0xff]  ;;  %v2052_v38 = vld [vmem:[#allocation8 + $0x1790] sm:$0xff] }
 0x460   :  { %8676 = vmatpush1.bf16.msra.mxu1 %v9631_v13  ;;  %8349 = vmatprep.subr.bf16.mxu0 %v9638_v16  ;;  %v9685_v13 = vcombine.low %v2004_v59, %v2008_v63  ;;  %v9687_v16 = vcombine.low %v2005_v18, %v2009_v3  ;;  %v9696_v33 = vcombine.high %v2013_v12, %v2017_v39  ;;  %v2056_v10 = vld [vmem:[#allocation8 + $0x17b0] sm:$0xff]  ;;  %v2061_v3 = vld [vmem:[#allocation8 + $0x17d8] sm:$0xff] }
 0x461   :  { %8677 = vmatprep.subr.bf16.mxu1 %v9640_v62  ;;  %v9694_v62 = vcombine.high %v2012_v44, %v2016_v0  ;;  %v2060_v63 = vld [vmem:[#allocation8 + $0x17d0] sm:$0xff] }
 0x462   :  { %v2064_v18 = vld [vmem:[#allocation8 + $0x17f0] sm:$0xff] }
 0x463   :  { %8350 = vmatpush1.bf16.msra.mxu0 %v9637_v37  ;;  %v2025_v37 = vld [vmem:[#allocation8 + $0x16b8] sm:$0xff] }
 0x464   :  { %8678 = vmatpush1.bf16.msra.mxu1 %v9639_v2  ;;  %8351 = vmatprep.subr.bf16.mxu0 %v9646_v36  ;;  %v9693_v2 = vcombine.low %v2012_v44, %v2016_v0  ;;  %v9695_v36 = vcombine.low %v2013_v12, %v2017_v39  ;;  %v9704_v46 = vcombine.high %v2021_v21, %v2025_v37  ;;  %v2068_v0 = vld [vmem:[#allocation8 + $0x1810] sm:$0xff]  ;;  %v2069_v39 = vld [vmem:[#allocation8 + $0x1818] sm:$0xff] }
 0x465   :  { %8679 = vmatprep.subr.bf16.mxu1 %v9648_v22  ;;  %v9702_v22 = vcombine.high %v2020_v15, %v2024_v40  ;;  %v2072_v12 = vld [vmem:[#allocation8 + $0x1830] sm:$0xff] }
 0x467   :  { %8352 = vmatpush1.bf16.msra.mxu0 %v9645_v8  ;;  %v2033_v8 = vld [vmem:[#allocation8 + $0x16f8] sm:$0xff] }
 0x468   :  { %8680 = vmatpush1.bf16.msra.mxu1 %v9647_v25  ;;  %8353 = vmatprep.subr.bf16.mxu0 %v9654_v9  ;;  %v9701_v25 = vcombine.low %v2020_v15, %v2024_v40  ;;  %v9703_v9 = vcombine.low %v2021_v21, %v2025_v37  ;;  %v9712_v28 = vcombine.high %v2029_v58, %v2033_v8  ;;  %v2076_v40 = vld [vmem:[#allocation8 + $0x1850] sm:$0xff] }
 0x469   :  { %8681 = vmatprep.subr.bf16.mxu1 %v9656_v26  ;;  %v9710_v26 = vcombine.high %v2028_v45, %v2032_v4  ;;  %v2080_v21 = vld [vmem:[#allocation8 + $0x1870] sm:$0xff]  ;;  %v9749_v37 = vcombine.low %v2068_v0, %v2072_v12 }
 0x46b   :  { %8354 = vmatpush1.bf16.msra.mxu0 %v9653_v32  ;;  %v2041_v32 = vld [vmem:[#allocation8 + $0x1738] sm:$0xff] }
 0x46c   :  { %8682 = vmatpush1.bf16.msra.mxu1 %v9655_v35  ;;  %8355 = vmatprep.subr.bf16.mxu0 %v9662_v34  ;;  %v9709_v35 = vcombine.low %v2028_v45, %v2032_v4  ;;  %v9711_v34 = vcombine.low %v2029_v58, %v2033_v8  ;;  %v9720_v43 = vcombine.high %v2037_v61, %v2041_v32  ;;  %v2084_v45 = vld [vmem:[#allocation8 + $0x1890] sm:$0xff]  ;;  %v2085_v8 = vld [vmem:[#allocation8 + $0x1898] sm:$0xff] }
 0x46d   :  { %8683 = vmatprep.subr.bf16.mxu1 %v9664_v42  ;;  %v9718_v42 = vcombine.high %v2036_v29, %v2040_v30  ;;  %v2088_v4 = vld [vmem:[#allocation8 + $0x18b0] sm:$0xff] }
 0x46f   :  { %8356 = vmatpush1.bf16.msra.mxu0 %v9661_v17  ;;  %v2049_v17 = vld [vmem:[#allocation8 + $0x1778] sm:$0xff] }
 0x470   :  { %8684 = vmatpush1.bf16.msra.mxu1 %v9663_v52  ;;  %8357 = vmatprep.subr.bf16.mxu0 %v9670_v27  ;;  %v9717_v52 = vcombine.low %v2036_v29, %v2040_v30  ;;  %v9719_v27 = vcombine.low %v2037_v61, %v2041_v32  ;;  %v9728_v54 = vcombine.high %v2045_v50, %v2049_v17  ;;  %v2092_v30 = vld [vmem:[#allocation8 + $0x18d0] sm:$0xff]  ;;  %v2093_v32 = vld [vmem:[#allocation8 + $0x18d8] sm:$0xff] }
 0x471   :  { %8685 = vmatprep.subr.bf16.mxu1 %v9672_v53  ;;  %v9726_v53 = vcombine.high %v2044_v11, %v2048_v48  ;;  %v2096_v61 = vld [vmem:[#allocation8 + $0x18f0] sm:$0xff] }
 0x473   :  { %8358 = vmatpush1.bf16.msra.mxu0 %v9669_v55  ;;  %v2057_v55 = vld [vmem:[#allocation8 + $0x17b8] sm:$0xff] }
 0x474   :  { %8686 = vmatpush1.bf16.msra.mxu1 %v9671_v56  ;;  %8359 = vmatprep.subr.bf16.mxu0 %v9678_v6  ;;  %v9725_v56 = vcombine.low %v2044_v11, %v2048_v48  ;;  %v9727_v6 = vcombine.low %v2045_v50, %v2049_v17  ;;  %v9736_v59 = vcombine.high %v2053_v19, %v2057_v55  ;;  %v2100_v11 = vld [vmem:[#allocation8 + $0x1910] sm:$0xff]  ;;  %v2101_v50 = vld [vmem:[#allocation8 + $0x1918] sm:$0xff] }
 0x475   :  { %8687 = vmatprep.subr.bf16.mxu1 %v9680_v23  ;;  %v9734_v23 = vcombine.high %v2052_v38, %v2056_v10  ;;  %v2104_v48 = vld [vmem:[#allocation8 + $0x1930] sm:$0xff]  ;;  %v2105_v17 = vld [vmem:[#allocation8 + $0x1938] sm:$0xff] }
 0x477   :  { %8360 = vmatpush1.bf16.msra.mxu0 %v9677_v5  ;;  %v2065_v5 = vld [vmem:[#allocation8 + $0x17f8] sm:$0xff] }
 0x478   :  { %8688 = vmatpush1.bf16.msra.mxu1 %v9679_v51  ;;  %8361 = vmatprep.subr.bf16.mxu0 %v9686_v14  ;;  %v9733_v51 = vcombine.low %v2052_v38, %v2056_v10  ;;  %v9735_v14 = vcombine.low %v2053_v19, %v2057_v55  ;;  %v9744_v44 = vcombine.high %v2061_v3, %v2065_v5  ;;  %v2112_v38 = vld [vmem:[#allocation8 + $0x1970] sm:$0xff]  ;;  %v2109_v10 = vld [vmem:[#allocation8 + $0x1958] sm:$0xff] }
 0x479   :  { %8689 = vmatprep.subr.bf16.mxu1 %v9688_v7  ;;  %v9742_v7 = vcombine.high %v2060_v63, %v2064_v18  ;;  %v2113_v19 = vld [vmem:[#allocation8 + $0x1978] sm:$0xff]  ;;  %v9781_v55 = vcombine.low %v2100_v11, %v2104_v48 }
 0x47b   :  { %8362 = vmatpush1.bf16.msra.mxu0 %v9685_v13  ;;  %v2073_v13 = vld [vmem:[#allocation8 + $0x1838] sm:$0xff] }
 0x47c   :  { %8690 = vmatpush1.bf16.msra.mxu1 %v9687_v16  ;;  %8363 = vmatprep.subr.bf16.mxu0 %v9694_v62  ;;  %v9741_v16 = vcombine.low %v2060_v63, %v2064_v18  ;;  %v9743_v62 = vcombine.low %v2061_v3, %v2065_v5  ;;  %v9752_v15 = vcombine.high %v2069_v39, %v2073_v13  ;;  %v2120_v63 = vld [vmem:[#allocation8 + $0x19b0] sm:$0xff]  ;;  %v2117_v18 = vld [vmem:[#allocation8 + $0x1998] sm:$0xff] }
 0x47d   :  { %8691 = vmatprep.subr.bf16.mxu1 %v9696_v33  ;;  %v9750_v33 = vcombine.high %v2068_v0, %v2072_v12  ;;  %v2121_v3 = vld [vmem:[#allocation8 + $0x19b8] sm:$0xff]  ;;  %v2128_v0 = vld [vmem:[#allocation8 + $0x19f0] sm:$0xff] }
 0x47e   :  { %v2125_v12 = vld [vmem:[#allocation8 + $0x19d8] sm:$0xff] }
 0x47f   :  { %8364 = vmatpush1.bf16.msra.mxu0 %v9693_v2  ;;  %v2077_v2 = vld [vmem:[#allocation8 + $0x1858] sm:$0xff] }
 0x480   :  { %8692 = vmatpush1.bf16.msra.mxu1 %v9695_v36  ;;  %8365 = vmatprep.subr.bf16.mxu0 %v9702_v22  ;;  %v2081_v36 = vld [vmem:[#allocation8 + $0x1878] sm:$0xff]  ;;  %v9751_v22 = vcombine.low %v2069_v39, %v2073_v13 }
 0x481   :  { %8693 = vmatprep.subr.bf16.mxu1 %v9704_v46  ;;  %v9758_v46 = vcombine.high %v2076_v40, %v2080_v21  ;;  %v9760_v58 = vcombine.high %v2077_v2, %v2081_v36  ;;  %v2129_v39 = vld [vmem:[#allocation8 + $0x19f8] sm:$0xff] }
 0x483   :  { %8366 = vmatpush1.bf16.msra.mxu0 %v9701_v25  ;;  %v2089_v25 = vld [vmem:[#allocation8 + $0x18b8] sm:$0xff] }
 0x484   :  { %8694 = vmatpush1.bf16.msra.mxu1 %v9703_v9  ;;  %8367 = vmatprep.subr.bf16.mxu0 %v9710_v26  ;;  %v9757_v9 = vcombine.low %v2076_v40, %v2080_v21  ;;  %v9759_v26 = vcombine.low %v2077_v2, %v2081_v36  ;;  %v9768_v29 = vcombine.high %v2085_v8, %v2089_v25  ;;  %v2136_v40 = vld [vmem:[#allocation8 + $0x1a30] sm:$0xff]  ;;  %v2133_v21 = vld [vmem:[#allocation8 + $0x1a18] sm:$0xff] }
 0x485   :  { %8695 = vmatprep.subr.bf16.mxu1 %v9712_v28  ;;  %v9766_v28 = vcombine.high %v2084_v45, %v2088_v4  ;;  %v9807_v36 = vcombine.low %v2125_v12, %v2129_v39 }
 0x487   :  { %8368 = vmatpush1.bf16.msra.mxu0 %v9709_v35  ;;  %v2097_v35 = vld [vmem:[#allocation8 + $0x18f8] sm:$0xff] }
 0x488   :  { %8696 = vmatpush1.bf16.msra.mxu1 %v9711_v34  ;;  %8369 = vmatprep.subr.bf16.mxu0 %v9718_v42  ;;  %v9765_v34 = vcombine.low %v2084_v45, %v2088_v4  ;;  %v9774_v42 = vcombine.high %v2092_v30, %v2096_v61  ;;  %v2140_v45 = vld [vmem:[#allocation8 + $0x1a50] sm:$0xff] }
 0x489   :  { %8697 = vmatprep.subr.bf16.mxu1 %v9720_v43  ;;  %v9776_v43 = vcombine.high %v2093_v32, %v2097_v35  ;;  %v2144_v4 = vld [vmem:[#allocation8 + $0x1a70] sm:$0xff] }
 0x48b   :  { %8370 = vmatpush1.bf16.msra.mxu0 %v9717_v52  ;;  %v9775_v52 = vcombine.low %v2093_v32, %v2097_v35  ;;  %v2153_v32 = vld [vmem:[#allocation8 + $0x1ab8] sm:$0xff]  ;;  %v9821_v35 = vcombine.low %v2140_v45, %v2144_v4 }
 0x48c   :  { %8698 = vmatpush1.bf16.msra.mxu1 %v9719_v27  ;;  %8371 = vmatprep.subr.bf16.mxu0 %v9726_v53  ;;  %v9782_v27 = vcombine.high %v2100_v11, %v2104_v48  ;;  %v9784_v53 = vcombine.high %v2101_v50, %v2105_v17  ;;  %v2160_v11 = vld [vmem:[#allocation8 + $0x1af0] sm:$0xff]  ;;  %v2157_v48 = vld [vmem:[#allocation8 + $0x1ad8] sm:$0xff] }
 0x48d   :  { %8699 = vmatprep.subr.bf16.mxu1 %v9728_v54  ;;  %v2108_v54 = vld [vmem:[#allocation8 + $0x1950] sm:$0xff] }
 0x48e   :  { %v9789_v5 = vcombine.low %v2108_v54, %v2112_v38 }
 0x48f   :  { %8372 = vmatpush1.bf16.msra.mxu0 %v9725_v56  ;;  %v9783_v56 = vcombine.low %v2101_v50, %v2105_v17  ;;  %v2161_v50 = vld [vmem:[#allocation8 + $0x1af8] sm:$0xff] }
 0x490   :  { %8700 = vmatpush1.bf16.msra.mxu1 %v9727_v6  ;;  %8373 = vmatprep.subr.bf16.mxu0 %v9734_v23  ;;  %v9790_v6 = vcombine.high %v2108_v54, %v2112_v38  ;;  %v9792_v23 = vcombine.high %v2109_v10, %v2113_v19  ;;  %v2168_v54 = vld [vmem:[#allocation8 + $0x1b30] sm:$0xff]  ;;  %v2165_v38 = vld [vmem:[#allocation8 + $0x1b18] sm:$0xff] }
 0x491   :  { %8701 = vmatprep.subr.bf16.mxu1 %v9736_v59  ;;  %v2116_v59 = vld [vmem:[#allocation8 + $0x1990] sm:$0xff] }
 0x492   :  { %v9797_v13 = vcombine.low %v2116_v59, %v2120_v63 }
 0x493   :  { %8374 = vmatpush1.bf16.msra.mxu0 %v9733_v51  ;;  %v9791_v51 = vcombine.low %v2109_v10, %v2113_v19  ;;  %v2169_v10 = vld [vmem:[#allocation8 + $0x1b38] sm:$0xff] }
 0x494   :  { %8702 = vmatpush1.bf16.msra.mxu1 %v9735_v14  ;;  %8375 = vmatprep.subr.bf16.mxu0 %v9742_v7  ;;  %v9798_v14 = vcombine.high %v2116_v59, %v2120_v63  ;;  %v9800_v7 = vcombine.high %v2117_v18, %v2121_v3  ;;  %v2176_v59 = vld [vmem:[#allocation8 + $0x1b70] sm:$0xff]  ;;  %v2173_v63 = vld [vmem:[#allocation8 + $0x1b58] sm:$0xff] }
 0x495   :  { %8703 = vmatprep.subr.bf16.mxu1 %v9744_v44  ;;  %v2124_v44 = vld [vmem:[#allocation8 + $0x19d0] sm:$0xff] }
 0x496   :  { %v9805_v2 = vcombine.low %v2124_v44, %v2128_v0 }
 0x497   :  { %8376 = vmatpush1.bf16.msra.mxu0 %v9741_v16  ;;  %v9799_v16 = vcombine.low %v2117_v18, %v2121_v3  ;;  %v2177_v18 = vld [vmem:[#allocation8 + $0x1b78] sm:$0xff] }
 0x498   :  { %8704 = vmatpush1.bf16.msra.mxu1 %v9743_v62  ;;  %8386 = vmatprep.subr.bf16.mxu0 %v9750_v33  ;;  %v9806_v62 = vcombine.high %v2124_v44, %v2128_v0  ;;  %v9808_v33 = vcombine.high %v2125_v12, %v2129_v39  ;;  %v2184_v44 = vld [vmem:[#allocation8 + $0x1bb0] sm:$0xff]  ;;  %v2181_v0 = vld [vmem:[#allocation8 + $0x1b98] sm:$0xff] }
 0x499   :  { %8714 = vmatprep.subr.bf16.mxu1 %v9752_v15  ;;  %v2132_v15 = vld [vmem:[#allocation8 + $0x1a10] sm:$0xff]  ;;  %v2185_v12 = vld [vmem:[#allocation8 + $0x1bb8] sm:$0xff] }
 0x49a   :  { %8378 = vmatmul.mubr.bf16.vlgmr.msra.gmra.mrb[20].mxu0 %v10550_v20 }
 0x49b   :  { %8706 = vmatmul.mubr.bf16.vlgmr.msra.gmra.mrb[20].mxu1 %v10550_v20  ;;  %8387 = vmatpush1.bf16.msra.mxu0 %v9749_v37  ;;  %v9767_v20 = vcombine.low %v2085_v8, %v2089_v25  ;;  %v2137_v37 = vld [vmem:[#allocation8 + $0x1a38] sm:$0xff]  ;;  %v9813_v25 = vcombine.low %v2132_v15, %v2136_v40 }
 0x49c   :  { %8418 = vmatprep.mubr.bf16.mxu0 %v10552_v24  ;;  %8715 = vmatpush1.bf16.msra.mxu1 %v9751_v22  ;;  %v9814_v22 = vcombine.high %v2132_v15, %v2136_v40  ;;  %v2145_v8 = vld [vmem:[#allocation8 + $0x1a78] sm:$0xff]  ;;  %v2192_v15 = vld [vmem:[#allocation8 + $0x1bf0] sm:$0xff] }
 0x49d   :  { %8746 = vmatprep.mubr.bf16.mxu1 %v10552_v24  ;;  %8388 = vmatprep.subr.bf16.mxu0 %v9758_v46  ;;  %v9773_v24 = vcombine.low %v2092_v30, %v2096_v61  ;;  %v9816_v46 = vcombine.high %v2133_v21, %v2137_v37  ;;  %v2152_v30 = vld [vmem:[#allocation8 + $0x1ab0] sm:$0xff]  ;;  %v2149_v61 = vld [vmem:[#allocation8 + $0x1a98] sm:$0xff] }
 0x49e   :  { %8716 = vmatprep.subr.bf16.mxu1 %v9760_v58  ;;  %v2141_v58 = vld [vmem:[#allocation8 + $0x1a58] sm:$0xff] }
 0x49f   :  { %8389 = vmatpush1.bf16.msra.mxu0 %v9757_v9  ;;  %v9815_v9 = vcombine.low %v2133_v21, %v2137_v37  ;;  %v2189_v40 = vld [vmem:[#allocation8 + $0x1bd8] sm:$0xff] }
 0x4a0   :  { %8717 = vmatpush1.bf16.msra.mxu1 %v9759_v26  ;;  %8390 = vmatprep.subr.bf16.mxu0 %v9766_v28  ;;  %v9822_v26 = vcombine.high %v2140_v45, %v2144_v4  ;;  %v9824_v28 = vcombine.high %v2141_v58, %v2145_v8  ;;  %v2193_v21 = vld [vmem:[#allocation8 + $0x1bf8] sm:$0xff]  ;;  %v2200_v45 = vld [vmem:[#allocation8 + $0x1c30] sm:$0xff] }
 0x4a1   :  { %8718 = vmatprep.subr.bf16.mxu1 %v9768_v29  ;;  %v2148_v29 = vld [vmem:[#allocation8 + $0x1a90] sm:$0xff]  ;;  %v2197_v4 = vld [vmem:[#allocation8 + $0x1c18] sm:$0xff] }
 0x4a2   :  { %v9829_v17 = vcombine.low %v2148_v29, %v2152_v30 }
 0x4a3   :  { %8391 = vmatpush1.bf16.msra.mxu0 %v9765_v34  ;;  %v9823_v34 = vcombine.low %v2141_v58, %v2145_v8  ;;  %v2201_v58 = vld [vmem:[#allocation8 + $0x1c38] sm:$0xff] }
 0x4a4   :  { %8719 = vmatpush1.bf16.msra.mxu1 %v9767_v20  ;;  %8392 = vmatprep.subr.bf16.mxu0 %v9774_v42  ;;  %v9830_v20 = vcombine.high %v2148_v29, %v2152_v30  ;;  %v9832_v42 = vcombine.high %v2149_v61, %v2153_v32  ;;  %v2208_v29 = vld [vmem:[#allocation8 + $0x1c70] sm:$0xff] }
 0x4a5   :  { %8720 = vmatprep.subr.bf16.mxu1 %v9776_v43  ;;  %v2156_v43 = vld [vmem:[#allocation8 + $0x1ad0] sm:$0xff] }
 0x4a6   :  { %v9837_v19 = vcombine.low %v2156_v43, %v2160_v11 }
 0x4a7   :  { %8393 = vmatpush1.bf16.msra.mxu0 %v9773_v24  ;;  %v9831_v24 = vcombine.low %v2149_v61, %v2153_v32  ;;  %v2205_v61 = vld [vmem:[#allocation8 + $0x1c58] sm:$0xff] }
 0x4a8   :  { %8721 = vmatpush1.bf16.msra.mxu1 %v9775_v52  ;;  %8394 = vmatprep.subr.bf16.mxu0 %v9782_v27  ;;  %v9838_v52 = vcombine.high %v2156_v43, %v2160_v11  ;;  %v9840_v27 = vcombine.high %v2157_v48, %v2161_v50  ;;  %v2209_v32 = vld [vmem:[#allocation8 + $0x1c78] sm:$0xff] }
 0x4a9   :  { %8722 = vmatprep.subr.bf16.mxu1 %v9784_v53  ;;  %v2164_v53 = vld [vmem:[#allocation8 + $0x1b10] sm:$0xff]  ;;  %v9888_v43 = vcombine.high %v2205_v61, %v2209_v32  ;;  %v2213_v11 = vld [vmem:[#allocation8 + $0x1c98] sm:$0xff] }
 0x4aa   :  { %v9845_v3 = vcombine.low %v2164_v53, %v2168_v54 }
 0x4ab   :  { %8395 = vmatpush1.bf16.msra.mxu0 %v9781_v55  ;;  %v9839_v55 = vcombine.low %v2157_v48, %v2161_v50  ;;  %v2217_v48 = vld [vmem:[#allocation8 + $0x1cb8] sm:$0xff] }
 0x4ac   :  { %8723 = vmatpush1.bf16.msra.mxu1 %v9783_v56  ;;  %8396 = vmatprep.subr.bf16.mxu0 %v9790_v6  ;;  %v9846_v56 = vcombine.high %v2164_v53, %v2168_v54  ;;  %v9848_v6 = vcombine.high %v2165_v38, %v2169_v10  ;;  %v2224_v53 = vld [vmem:[#allocation8 + $0x1cf0] sm:$0xff]  ;;  %v2221_v54 = vld [vmem:[#allocation8 + $0x1cd8] sm:$0xff] }
 0x4ad   :  { %8724 = vmatprep.subr.bf16.mxu1 %v9792_v23  ;;  %v2172_v23 = vld [vmem:[#allocation8 + $0x1b50] sm:$0xff] }
 0x4ae   :  { %v9853_v39 = vcombine.low %v2172_v23, %v2176_v59 }
 0x4af   :  { %8397 = vmatpush1.bf16.msra.mxu0 %v9789_v5  ;;  %v9847_v5 = vcombine.low %v2165_v38, %v2169_v10  ;;  %v2225_v38 = vld [vmem:[#allocation8 + $0x1cf8] sm:$0xff] }
 0x4b0   :  { %8725 = vmatpush1.bf16.msra.mxu1 %v9791_v51  ;;  %8398 = vmatprep.subr.bf16.mxu0 %v9798_v14  ;;  %v9854_v51 = vcombine.high %v2172_v23, %v2176_v59  ;;  %v9856_v14 = vcombine.high %v2173_v63, %v2177_v18  ;;  %v2229_v23 = vld [vmem:[#allocation8 + $0x1d18] sm:$0xff] }
 0x4b1   :  { %8726 = vmatprep.subr.bf16.mxu1 %v9800_v7  ;;  %v2180_v7 = vld [vmem:[#allocation8 + $0x1b90] sm:$0xff]  ;;  %v2233_v59 = vld [vmem:[#allocation8 + $0x1d38] sm:$0xff] }
 0x4b2   :  { %v9861_v37 = vcombine.low %v2180_v7, %v2184_v44 }
 0x4b3   :  { %8399 = vmatpush1.bf16.msra.mxu0 %v9797_v13  ;;  %v9855_v13 = vcombine.low %v2173_v63, %v2177_v18  ;;  %v9903_v63 = vcombine.low %v2221_v54, %v2225_v38 }
 0x4b4   :  { %8727 = vmatpush1.bf16.msra.mxu1 %v9799_v16  ;;  %8400 = vmatprep.subr.bf16.mxu0 %v9806_v62  ;;  %v9862_v16 = vcombine.high %v2180_v7, %v2184_v44  ;;  %v9864_v62 = vcombine.high %v2181_v0, %v2185_v12  ;;  %v2241_v7 = vld [vmem:[#allocation8 + $0x1d78] sm:$0xff] }
 0x4b5   :  { %8728 = vmatprep.subr.bf16.mxu1 %v9808_v33  ;;  %v2188_v33 = vld [vmem:[#allocation8 + $0x1bd0] sm:$0xff] }
 0x4b6   :  { %v9869_v8 = vcombine.low %v2188_v33, %v2192_v15 }
 0x4b7   :  { %8401 = vmatpush1.bf16.msra.mxu0 %v9805_v2  ;;  %v9863_v2 = vcombine.low %v2181_v0, %v2185_v12  ;;  %v9911_v0 = vcombine.low %v2229_v23, %v2233_v59 }
 0x4b8   :  { %8729 = vmatpush1.bf16.msra.mxu1 %v9807_v36  ;;  %8402 = vmatprep.subr.bf16.mxu0 %v9814_v22  ;;  %v9870_v36 = vcombine.high %v2188_v33, %v2192_v15  ;;  %v9872_v22 = vcombine.high %v2189_v40, %v2193_v21  ;;  %v2249_v33 = vld [vmem:[#allocation8 + $0x1db8] sm:$0xff] }
 0x4b9   :  { %8730 = vmatprep.subr.bf16.mxu1 %v9816_v46  ;;  %v2196_v46 = vld [vmem:[#allocation8 + $0x1c10] sm:$0xff] }
 0x4ba   :  { %v9877_v30 = vcombine.low %v2196_v46, %v2200_v45 }
 0x4bb   :  { %8403 = vmatpush1.bf16.msra.mxu0 %v9813_v25  ;;  %v9871_v25 = vcombine.low %v2189_v40, %v2193_v21 }
 0x4bc   :  { %8731 = vmatpush1.bf16.msra.mxu1 %v9815_v9  ;;  %8404 = vmatprep.subr.bf16.mxu0 %v9822_v26  ;;  %v9878_v9 = vcombine.high %v2196_v46, %v2200_v45  ;;  %v9880_v26 = vcombine.high %v2197_v4, %v2201_v58  ;;  %v2257_v46 = vld [vmem:[#allocation8 + $0x1df8] sm:$0xff] }
 0x4bd   :  { %8732 = vmatprep.subr.bf16.mxu1 %v9824_v28  ;;  %v2204_v28 = vld [vmem:[#allocation8 + $0x1c50] sm:$0xff] }
 0x4be   :  { %v9885_v50 = vcombine.low %v2204_v28, %v2208_v29 }
 0x4bf   :  { %8405 = vmatpush1.bf16.msra.mxu0 %v9821_v35  ;;  %v9879_v35 = vcombine.low %v2197_v4, %v2201_v58 }
 0x4c0   :  { %8733 = vmatpush1.bf16.msra.mxu1 %v9823_v34  ;;  %8406 = vmatprep.subr.bf16.mxu0 %v9830_v20  ;;  %v9886_v34 = vcombine.high %v2204_v28, %v2208_v29  ;;  %v2212_v20 = vld [vmem:[#allocation8 + $0x1c90] sm:$0xff]  ;;  %v2265_v28 = vld [vmem:[#allocation8 + $0x1e38] sm:$0xff] }
 0x4c1   :  { %8734 = vmatprep.subr.bf16.mxu1 %v9832_v42  ;;  %v2216_v42 = vld [vmem:[#allocation8 + $0x1cb0] sm:$0xff] }
 0x4c2   :  { %v9893_v10 = vcombine.low %v2212_v20, %v2216_v42 }
 0x4c3   :  { %8407 = vmatpush1.bf16.msra.mxu0 %v9829_v17  ;;  %v9887_v17 = vcombine.low %v2205_v61, %v2209_v32 }
 0x4c4   :  { %8735 = vmatpush1.bf16.msra.mxu1 %v9831_v24  ;;  %8408 = vmatprep.subr.bf16.mxu0 %v9838_v52  ;;  %v9894_v24 = vcombine.high %v2212_v20, %v2216_v42  ;;  %v9896_v52 = vcombine.high %v2213_v11, %v2217_v48  ;;  %v2269_v20 = vld [vmem:[#allocation8 + $0x1e58] sm:$0xff] }
 0x4c5   :  { %8736 = vmatprep.subr.bf16.mxu1 %v9840_v27  ;;  %v2220_v27 = vld [vmem:[#allocation8 + $0x1cd0] sm:$0xff]  ;;  %v2273_v42 = vld [vmem:[#allocation8 + $0x1e78] sm:$0xff] }
 0x4c7   :  { %8409 = vmatpush1.bf16.msra.mxu0 %v9837_v19  ;;  %v9902_v19 = vcombine.high %v2220_v27, %v2224_v53 }
 0x4c8   :  { %8737 = vmatpush1.bf16.msra.mxu1 %v9839_v55  ;;  %8410 = vmatprep.subr.bf16.mxu0 %v9846_v56  ;;  %v9904_v55 = vcombine.high %v2221_v54, %v2225_v38  ;;  %v2228_v56 = vld [vmem:[#allocation8 + $0x1d10] sm:$0xff]  ;;  %v9951_v54 = vcombine.low %v2269_v20, %v2273_v42 }
 0x4c9   :  { %8738 = vmatprep.subr.bf16.mxu1 %v9848_v6  ;;  %v2232_v6 = vld [vmem:[#allocation8 + $0x1d30] sm:$0xff] }
 0x4ca   :  { %v9910_v18 = vcombine.high %v2228_v56, %v2232_v6  ;;  %v9909_v44 = vcombine.low %v2228_v56, %v2232_v6  ;;  %v2289_v56 = vld [vmem:[#allocation8 + $0x1ef8] sm:$0xff] }
 0x4cb   :  { %8411 = vmatpush1.bf16.msra.mxu0 %v9845_v3  ;;  %v9912_v3 = vcombine.high %v2229_v23, %v2233_v59 }
 0x4cc   :  { %8739 = vmatpush1.bf16.msra.mxu1 %v9847_v5  ;;  %8412 = vmatprep.subr.bf16.mxu0 %v9854_v51  ;;  %v2236_v5 = vld [vmem:[#allocation8 + $0x1d50] sm:$0xff] }
 0x4cd   :  { %8740 = vmatprep.subr.bf16.mxu1 %v9856_v14  ;;  %v2240_v51 = vld [vmem:[#allocation8 + $0x1d70] sm:$0xff]  ;;  %v2237_v14 = vld [vmem:[#allocation8 + $0x1d58] sm:$0xff] }
 0x4ce   :  { %v9918_v12 = vcombine.high %v2236_v5, %v2240_v51  ;;  %v9917_v15 = vcombine.low %v2236_v5, %v2240_v51  ;;  %v9919_v40 = vcombine.low %v2237_v14, %v2241_v7  ;;  %v2297_v5 = vld [vmem:[#allocation8 + $0x1f38] sm:$0xff] }
 0x4cf   :  { %8413 = vmatpush1.bf16.msra.mxu0 %v9853_v39  ;;  %v9920_v39 = vcombine.high %v2237_v14, %v2241_v7 }
 0x4d0   :  { %8741 = vmatpush1.bf16.msra.mxu1 %v9855_v13  ;;  %8414 = vmatprep.subr.bf16.mxu0 %v9862_v16  ;;  %v2244_v13 = vld [vmem:[#allocation8 + $0x1d90] sm:$0xff] }
 0x4d1   :  { %8742 = vmatprep.subr.bf16.mxu1 %v9864_v62  ;;  %v2248_v16 = vld [vmem:[#allocation8 + $0x1db0] sm:$0xff]  ;;  %v2245_v62 = vld [vmem:[#allocation8 + $0x1d98] sm:$0xff] }
 0x4d2   :  { %v9926_v21 = vcombine.high %v2244_v13, %v2248_v16  ;;  %v9925_v45 = vcombine.low %v2244_v13, %v2248_v16  ;;  %v9927_v4 = vcombine.low %v2245_v62, %v2249_v33  ;;  %v2305_v13 = vld [vmem:[#allocation8 + $0x1f78] sm:$0xff] }
 0x4d3   :  { %8415 = vmatpush1.bf16.msra.mxu0 %v9861_v37  ;;  %v9928_v37 = vcombine.high %v2245_v62, %v2249_v33 }
 0x4d4   :  { %8743 = vmatpush1.bf16.msra.mxu1 %v9863_v2  ;;  %8416 = vmatprep.subr.bf16.mxu0 %v9870_v36  ;;  %v2252_v2 = vld [vmem:[#allocation8 + $0x1dd0] sm:$0xff] }
 0x4d5   :  { %8744 = vmatprep.subr.bf16.mxu1 %v9872_v22  ;;  %v2256_v36 = vld [vmem:[#allocation8 + $0x1df0] sm:$0xff]  ;;  %v2253_v22 = vld [vmem:[#allocation8 + $0x1dd8] sm:$0xff] }
 0x4d6   :  { %v9934_v58 = vcombine.high %v2252_v2, %v2256_v36  ;;  %v9933_v29 = vcombine.low %v2252_v2, %v2256_v36  ;;  %v2313_v2 = vld [vmem:[#allocation8 + $0x1fb8] sm:$0xff] }
 0x4d7   :  { %8417 = vmatpush1.bf16.msra.mxu0 %v9869_v8  ;;  %v9936_v8 = vcombine.high %v2253_v22, %v2257_v46 }
 0x4d8   :  { %8745 = vmatpush1.bf16.msra.mxu1 %v9871_v25  ;;  %8427 = vmatprep.subr.bf16.mxu0 %v9878_v9  ;;  %v2260_v25 = vld [vmem:[#allocation8 + $0x1e10] sm:$0xff] }
 0x4d9   :  { %8755 = vmatprep.subr.bf16.mxu1 %v9880_v26  ;;  %v2264_v9 = vld [vmem:[#allocation8 + $0x1e30] sm:$0xff]  ;;  %v2261_v26 = vld [vmem:[#allocation8 + $0x1e18] sm:$0xff] }
 0x4da   :  { %8419 = vmatmul.mubr.bf16.vlgmr.msra.gmra.mrb[20].mxu0 %v10560_v57  ;;  %v9942_v61 = vcombine.high %v2260_v25, %v2264_v9  ;;  %v9944_v32 = vcombine.high %v2261_v26, %v2265_v28 }
 0x4db   :  { %8747 = vmatmul.mubr.bf16.vlgmr.msra.gmra.mrb[20].mxu1 %v10560_v57  ;;  %8428 = vmatpush1.bf16.msra.mxu0 %v9877_v30  ;;  %v9895_v57 = vcombine.low %v2213_v11, %v2217_v48  ;;  %v9935_v30 = vcombine.low %v2253_v22, %v2257_v46  ;;  %v9943_v11 = vcombine.low %v2261_v26, %v2265_v28 }
 0x4dc   :  { %8459 = vmatprep.mubr.bf16.mxu0 %v10562_v41  ;;  %8756 = vmatpush1.bf16.msra.mxu1 %v9879_v35  ;;  %v2268_v35 = vld [vmem:[#allocation8 + $0x1e50] sm:$0xff] }
 0x4dd   :  { %8787 = vmatprep.mubr.bf16.mxu1 %v10562_v41  ;;  %8429 = vmatprep.subr.bf16.mxu0 %v9886_v34  ;;  %v9901_v41 = vcombine.low %v2220_v27, %v2224_v53  ;;  %v2272_v34 = vld [vmem:[#allocation8 + $0x1e70] sm:$0xff]  ;;  %v2281_v27 = vld [vmem:[#allocation8 + $0x1eb8] sm:$0xff] }
 0x4de   :  { %8757 = vmatprep.subr.bf16.mxu1 %v9888_v43  ;;  %v9941_v43 = vcombine.low %v2260_v25, %v2264_v9  ;;  %v9950_v48 = vcombine.high %v2268_v35, %v2272_v34  ;;  %v9949_v53 = vcombine.low %v2268_v35, %v2272_v34  ;;  %v2321_v25 = vld [vmem:[#allocation8 + $0x1ff8] sm:$0xff] }
 0x4df   :  { %8430 = vmatpush1.bf16.msra.mxu0 %v9885_v50  ;;  %v9952_v50 = vcombine.high %v2269_v20, %v2273_v42 }
 0x4e0   :  { %8758 = vmatpush1.bf16.msra.mxu1 %v9887_v17  ;;  %8431 = vmatprep.subr.bf16.mxu0 %v9894_v24  ;;  %v2276_v17 = vld [vmem:[#allocation8 + $0x1e90] sm:$0xff] }
 0x4e1   :  { %8759 = vmatprep.subr.bf16.mxu1 %v9896_v52  ;;  %v2280_v24 = vld [vmem:[#allocation8 + $0x1eb0] sm:$0xff]  ;;  %v2277_v52 = vld [vmem:[#allocation8 + $0x1e98] sm:$0xff] }
 0x4e2   :  { %v9958_v38 = vcombine.high %v2276_v17, %v2280_v24  ;;  %v9957_v6 = vcombine.low %v2276_v17, %v2280_v24  ;;  %v9959_v23 = vcombine.low %v2277_v52, %v2281_v27 }
 0x4e3   :  { %8432 = vmatpush1.bf16.msra.mxu0 %v9893_v10  ;;  %v9960_v10 = vcombine.high %v2277_v52, %v2281_v27 }
 0x4e4   :  { %8760 = vmatpush1.bf16.msra.mxu1 %v9895_v57  ;;  %8433 = vmatprep.subr.bf16.mxu0 %v9902_v19  ;;  %v2284_v57 = vld [vmem:[#allocation8 + $0x1ed0] sm:$0xff] }
 0x4e5   :  { %8761 = vmatprep.subr.bf16.mxu1 %v9904_v55  ;;  %v2288_v19 = vld [vmem:[#allocation8 + $0x1ef0] sm:$0xff]  ;;  %v2285_v55 = vld [vmem:[#allocation8 + $0x1ed8] sm:$0xff] }
 0x4e6   :  { %v9966_v59 = vcombine.high %v2284_v57, %v2288_v19  ;;  %v9965_v51 = vcombine.low %v2284_v57, %v2288_v19  ;;  %v9967_v14 = vcombine.low %v2285_v55, %v2289_v56 }
 0x4e7   :  { %8434 = vmatpush1.bf16.msra.mxu0 %v9901_v41  ;;  %v9968_v41 = vcombine.high %v2285_v55, %v2289_v56 }
 0x4e8   :  { %8762 = vmatpush1.bf16.msra.mxu1 %v9903_v63  ;;  %8435 = vmatprep.subr.bf16.mxu0 %v9910_v18  ;;  %v2292_v63 = vld [vmem:[#allocation8 + $0x1f10] sm:$0xff] }
 0x4e9   :  { %8763 = vmatprep.subr.bf16.mxu1 %v9912_v3  ;;  %v2296_v18 = vld [vmem:[#allocation8 + $0x1f30] sm:$0xff]  ;;  %v2293_v3 = vld [vmem:[#allocation8 + $0x1f18] sm:$0xff] }
 0x4ea   :  { %v9974_v7 = vcombine.high %v2292_v63, %v2296_v18  ;;  %v9973_v16 = vcombine.low %v2292_v63, %v2296_v18  ;;  %v9975_v62 = vcombine.low %v2293_v3, %v2297_v5 }
 0x4eb   :  { %8436 = vmatpush1.bf16.msra.mxu0 %v9909_v44  ;;  %v9976_v44 = vcombine.high %v2293_v3, %v2297_v5 }
 0x4ec   :  { %8764 = vmatpush1.bf16.msra.mxu1 %v9911_v0  ;;  %8437 = vmatprep.subr.bf16.mxu0 %v9918_v12  ;;  %v2300_v0 = vld [vmem:[#allocation8 + $0x1f50] sm:$0xff] }
 0x4ed   :  { %8765 = vmatprep.subr.bf16.mxu1 %v9920_v39  ;;  %v2304_v12 = vld [vmem:[#allocation8 + $0x1f70] sm:$0xff]  ;;  %v2301_v39 = vld [vmem:[#allocation8 + $0x1f58] sm:$0xff] }
 0x4ee   :  { %v9982_v33 = vcombine.high %v2300_v0, %v2304_v12  ;;  %v9981_v36 = vcombine.low %v2300_v0, %v2304_v12  ;;  %v9983_v22 = vcombine.low %v2301_v39, %v2305_v13 }
 0x4ef   :  { %8438 = vmatpush1.bf16.msra.mxu0 %v9917_v15  ;;  %v9984_v15 = vcombine.high %v2301_v39, %v2305_v13 }
 0x4f0   :  { %8766 = vmatpush1.bf16.msra.mxu1 %v9919_v40  ;;  %8439 = vmatprep.subr.bf16.mxu0 %v9926_v21  ;;  %v2308_v40 = vld [vmem:[#allocation8 + $0x1f90] sm:$0xff] }
 0x4f1   :  { %8767 = vmatprep.subr.bf16.mxu1 %v9928_v37  ;;  %v2312_v21 = vld [vmem:[#allocation8 + $0x1fb0] sm:$0xff]  ;;  %v2309_v37 = vld [vmem:[#allocation8 + $0x1f98] sm:$0xff] }
 0x4f2   :  { %v9990_v46 = vcombine.high %v2308_v40, %v2312_v21  ;;  %v9989_v9 = vcombine.low %v2308_v40, %v2312_v21  ;;  %v9991_v26 = vcombine.low %v2309_v37, %v2313_v2 }
 0x4f3   :  { %8440 = vmatpush1.bf16.msra.mxu0 %v9925_v45  ;;  %v9992_v45 = vcombine.high %v2309_v37, %v2313_v2 }
 0x4f4   :  { %8768 = vmatpush1.bf16.msra.mxu1 %v9927_v4  ;;  %8441 = vmatprep.subr.bf16.mxu0 %v9934_v58  ;;  %v2316_v4 = vld [vmem:[#allocation8 + $0x1fd0] sm:$0xff] }
 0x4f5   :  { %8769 = vmatprep.subr.bf16.mxu1 %v9936_v8  ;;  %v2320_v58 = vld [vmem:[#allocation8 + $0x1ff0] sm:$0xff]  ;;  %v2317_v8 = vld [vmem:[#allocation8 + $0x1fd8] sm:$0xff] }
 0x4f6   :  { %v9998_v28 = vcombine.high %v2316_v4, %v2320_v58 }
 0x4f7   :  { %8442 = vmatpush1.bf16.msra.mxu0 %v9933_v29  ;;  %v10000_v29 = vcombine.high %v2317_v8, %v2321_v25 }
 0x4f8   :  { %8770 = vmatpush1.bf16.msra.mxu1 %v9935_v30  ;;  %8443 = vmatprep.subr.bf16.mxu0 %v9942_v61  ;;  %v9997_v30 = vcombine.low %v2316_v4, %v2320_v58  ;;  %v9999_v61 = vcombine.low %v2317_v8, %v2321_v25 }
 0x4f9   :  { %8771 = vmatprep.subr.bf16.mxu1 %v9944_v32  ;;  %v10142_v32 = vld [vmem:[#allocation10] sm:$0xff] }
 0x4fa   :  { %v2343_v35 = vrot.slane %v10142_v32, %v10486_v31  ;;  %v2351_v34 = vrot.slane %v10142_v32, %v10493_v60  ;;  %v2347_v20 = vrot.slane %v10142_v32, %v10455_v47  ;;  %v2355_v42 = vrot.slane %v10142_v32, %v10498_v1 }
 0x4fb   :  { %8444 = vmatpush1.bf16.msra.mxu0 %v9941_v43 }
 0x4fc   :  { %8772 = vmatpush1.bf16.msra.mxu1 %v9943_v11  ;;  %8445 = vmatprep.subr.bf16.mxu0 %v9950_v48 }
 0x4fd   :  { %8773 = vmatprep.subr.bf16.mxu1 %v9952_v50 }
 0x4ff   :  { %8446 = vmatpush1.bf16.msra.mxu0 %v9949_v53 }
 0x500   :  { %8774 = vmatpush1.bf16.msra.mxu1 %v9951_v54  ;;  %8447 = vmatprep.subr.bf16.mxu0 %v9958_v38 }
 0x501   :  { %8775 = vmatprep.subr.bf16.mxu1 %v9960_v10 }
 0x503   :  { %8448 = vmatpush1.bf16.msra.mxu0 %v9957_v6 }
 0x504   :  { %8776 = vmatpush1.bf16.msra.mxu1 %v9959_v23  ;;  %8449 = vmatprep.subr.bf16.mxu0 %v9966_v59 }
 0x505   :  { %8777 = vmatprep.subr.bf16.mxu1 %v9968_v41 }
 0x507   :  { %8450 = vmatpush1.bf16.msra.mxu0 %v9965_v51 }
 0x508   :  { %8778 = vmatpush1.bf16.msra.mxu1 %v9967_v14  ;;  %8451 = vmatprep.subr.bf16.mxu0 %v9974_v7 }
 0x509   :  { %8779 = vmatprep.subr.bf16.mxu1 %v9976_v44 }
 0x50b   :  { %8452 = vmatpush1.bf16.msra.mxu0 %v9973_v16 }
 0x50c   :  { %8780 = vmatpush1.bf16.msra.mxu1 %v9975_v62  ;;  %8453 = vmatprep.subr.bf16.mxu0 %v9982_v33 }
 0x50d   :  { %8781 = vmatprep.subr.bf16.mxu1 %v9984_v15 }
 0x50f   :  { %8454 = vmatpush1.bf16.msra.mxu0 %v9981_v36 }
 0x510   :  { %8782 = vmatpush1.bf16.msra.mxu1 %v9983_v22  ;;  %8455 = vmatprep.subr.bf16.mxu0 %v9990_v46 }
 0x511   :  { %8783 = vmatprep.subr.bf16.mxu1 %v9992_v45 }
 0x513   :  { %8456 = vmatpush1.bf16.msra.mxu0 %v9989_v9 }
 0x514   :  { %8784 = vmatpush1.bf16.msra.mxu1 %v9991_v26  ;;  %8457 = vmatprep.subr.bf16.mxu0 %v9998_v28 }
 0x515   :  { %8785 = vmatprep.subr.bf16.mxu1 %v10000_v29 }
 0x517   :  { %8458 = vmatpush1.bf16.msra.mxu0 %v9997_v30 }
 0x518   :  { %8786 = vmatpush1.bf16.msra.mxu1 %v9999_v61 }
 0x51a   :  { %8460 = vmatmul.mubr.bf16.vlgmr.msra.gmra.mrb[20].mxu0 %v10569_v49 }
 0x51b   :  { %8788 = vmatmul.mubr.bf16.vlgmr.msra.gmra.mrb[20].mxu1 %v10569_v49 }
 0x5ed   :  { %v8461_v43 = vpop.f32.mrb[20].mxu0 }
 0x5ee   :  { %v10013_v11 = vadd.f32 %v8461_v43, %v2343_v35  ;;  %v8789_v48 = vpop.f32.mrb[20].mxu1  ;;  %v8463_v50 = vpop.f32.mrb[21].mxu0 }
 0x5ef   :  { %v10015_v17 = vadd.f32 %v8789_v48, %v2351_v34  ;;  %v10014_v24 = vadd.f32 %v8463_v50, %v2347_v20  ;;  %v8791_v52 = vpop.f32.mrb[21].mxu1  ;;  %v8465_v27 = vpop.f32.mrb[22].mxu0 }
 0x5f0   :  { %v10016_v49 = vadd.f32 %v8791_v52, %v2355_v42  ;;  %v8793_v53 = vpop.f32.mrb[22].mxu1  ;;  %v8466_v54 = vpop.f32.mrb[23].mxu0 }
 0x5f1   :  { %v10007_v31 = vpack.c.bf16 %v10014_v24, %v10013_v11  ;;  %v8794_v38 = vpop.f32.mrb[23].mxu1 }
 0x5f2   :  { %v10008_v60 = vpack.c.bf16 %v10016_v49, %v10015_v17 }
 0x5f3   :  { %8830 = vst [vmem:[#allocation11 + $0x10] sm:$0xff] %v10007_v31 }
 0x5f4   :  { %8831 = vst [vmem:[#allocation11 + $0x18] sm:$0xff] %v10008_v60 }
 0x5f5   :  { %10264 = shalt.err (!%p10261_p2)
}
 0x5f6   :  { %s10265_s3 = scalar_lea.hbm %s10630_s5, 512 }
 0x5f7   :  { %p10266_p3 = scmp.ne.s32.totalorder %s10630_s5, %s10265_s3  ;;  %p10269_p4 = scmp.lt.u32.totalorder %s10265_s3, %s10630_s5 }
 0x5f9   :  { %p10271_p5 = pnand %p10269_p4, %p10266_p3 }
 0x5fb   :  { %10274 = shalt.err (!%p10271_p5)
}
 0x5fc   :  { %8841 = dma.vmem_to_hbm [thread:$0]  %s8839_s27, 512, %s10630_s5, [#allocation4]  }
 0x5fd   :  { %10281 = dma.done.wait [#allocation4], 512  }
 0x5fe   :  { %10282 = vsyncadd [#allocation4], 4294966784 }
 0x5ff   :  { %8845 = vsyncpa [#allocation3], 1 }
 0x600   :  { %8846 = vsyncpa [#allocation6], 1 }
 0x601   :  { %8847 = vsyncpa [#allocation9], 1 }
 0x602   :  { %8848 = vsyncpa [#allocation4], 1 }

</bundles_post_ra>
